<compile_context>
chip_gen: v5e
topology: v5e:2x2
jax: 0.10.0
libtpu: 0.0.40
codegen_flags: <defaults>
</compile_context>

<pallas_src>
import functools

import jax
import jax.numpy as jnp
from jax import lax
from jax.experimental import pallas as pl
from jax.experimental.pallas import tpu as pltpu


def _lstm2_kernel(xg_ref, whh1_hbm, w2_hbm, b2_hbm,        # inputs
                  y_ref,                                    # output
                  whh1_v, w2_v, b2_v, h1, c1, h2, c2, dma_sem,   # scratch
                  *, hidden_dim, t_chunk, compute_dtype):
    """One grid step == one (batch-chunk, time-chunk) tile.

    Recurrent state (h1, c1, h2, c2) and the weights live in VMEM scratch and
    persist across the time-chunk grid axis; they are re-initialized /
    re-loaded whenever a new batch chunk starts (t == 0).
    """
    t = pl.program_id(1)
    H = hidden_dim
    cd = compute_dtype
    Bc = y_ref.shape[1]

    @pl.when(t == 0)
    def _init():
        # Single-buffered weight residency: one manual DMA per batch chunk.
        cps = [pltpu.make_async_copy(whh1_hbm, whh1_v, dma_sem.at[0]),
               pltpu.make_async_copy(w2_hbm, w2_v, dma_sem.at[1]),
               pltpu.make_async_copy(b2_hbm, b2_v, dma_sem.at[2])]
        for cp in cps:
            cp.start()
        for cp in cps:
            cp.wait()
        h1[...] = jnp.zeros_like(h1)
        c1[...] = jnp.zeros_like(c1)
        h2[...] = jnp.zeros_like(h2)
        c2[...] = jnp.zeros_like(c2)

    # Hoisted out of the per-timestep loop (JAX does not CSE broadcasts).
    w_hh1 = whh1_v[...]                                     # (H, 4H)  bf16
    w_l2 = w2_v[...]                                        # (2H, 4H) bf16
    b_l2 = jnp.broadcast_to(b2_v[...], (Bc, 4 * H))         # (Bc, 4H) f32

    def split_gates(g):                                     # lane-aligned (H = 128)
        return (jax.nn.sigmoid(g[:, 0 * H:1 * H]),          # i
                jax.nn.sigmoid(g[:, 1 * H:2 * H]),          # f
                jnp.tanh(g[:, 2 * H:3 * H]),                # g
                jax.nn.sigmoid(g[:, 3 * H:4 * H]))          # o

    def body(k, carry):
        h1v, c1v, h2v, c2v = carry
        # ---- layer 1: input projection precomputed; only h @ W_hh here.
        g1 = xg_ref[k] + jnp.dot(h1v.astype(cd), w_hh1,
                                 preferred_element_type=jnp.float32)
        i1, f1, gg1, o1 = split_gates(g1)
        c1n = f1 * c1v + i1 * gg1
        h1n = o1 * jnp.tanh(c1n)
        # ---- layer 2: fused [x ; h] @ [W_ih ; W_hh] -> one MXU push per step.
        hcat = jnp.concatenate([h1n, h2v], axis=-1).astype(cd)
        g2 = jnp.dot(hcat, w_l2, preferred_element_type=jnp.float32) + b_l2
        i2, f2, gg2, o2 = split_gates(g2)
        c2n = f2 * c2v + i2 * gg2
        h2n = o2 * jnp.tanh(c2n)
        y_ref[k] = h2n.astype(y_ref.dtype)
        return h1n, c1n, h2n, c2n

    carry = (h1[...], c1[...], h2[...], c2[...])
    h1n, c1n, h2n, c2n = lax.fori_loop(0, t_chunk, body, carry, unroll=True)
    h1[...] = h1n
    c1[...] = c1n
    h2[...] = h2n
    c2[...] = c2n


def activity_lstm_forward(x, params, *, time_block=8, batch_block=None,
                          compute_dtype=jnp.bfloat16):
    """x: (B, T, D) float32. Returns (y: (B, T, H), out: (B, O)).

    compute_dtype controls MXU operand precision (bf16 on v6e/v7x for 2x
    matmul throughput and half the weight DMA; use jnp.float32 for bit-exact
    PyTorch-f32 numerics). Accumulation and gate math are always f32.
    """
    B, T, D = x.shape
    H = params["w_hh1"].shape[0]
    Bc = B if batch_block is None else batch_block
    Tc = time_block
    assert T % Tc == 0 and B % Bc == 0
    cd = compute_dtype

    # Hoist the layer-1 input projection out of the recurrence: one batched
    # (T*B, D) x (D, 4H) matmul with the bias folded in.  Time-major layout.
    x_tm = jnp.transpose(x, (1, 0, 2))                                  # (T, B, D)
    xg = (jnp.einsum("tbd,dg->tbg", x_tm.astype(cd),
                     params["w_ih1"].astype(cd),
                     preferred_element_type=jnp.float32)
          + params["b1"].astype(jnp.float32))                           # (T, B, 4H)

    w_hh1 = params["w_hh1"].astype(cd)                                  # (H, 4H)
    w_l2 = jnp.concatenate([params["w_ih2"], params["w_hh2"]],
                           axis=0).astype(cd)                           # (2H, 4H)
    b_l2 = params["b2"].astype(jnp.float32)                             # (1, 4H)

    kernel = functools.partial(_lstm2_kernel, hidden_dim=H, t_chunk=Tc,
                               compute_dtype=cd)
    y_tm = pl.pallas_call(
        kernel,
        out_shape=jax.ShapeDtypeStruct((T, B, H), x.dtype),
        grid_spec=pltpu.PrefetchScalarGridSpec(
            num_scalar_prefetch=0,
            grid=(B // Bc, T // Tc),
            in_specs=[
                # precomputed layer-1 gates, one (Tc, Bc, 4H) slab per step
                pl.BlockSpec((Tc, Bc, 4 * H), lambda b, t: (t, b, 0)),
                # weights stay in HBM; DMA'd once into VMEM scratch (no 2x buf)
                pl.BlockSpec(memory_space=pl.ANY),
                pl.BlockSpec(memory_space=pl.ANY),
                pl.BlockSpec(memory_space=pl.ANY),
            ],
            out_specs=pl.BlockSpec((Tc, Bc, H), lambda b, t: (t, b, 0)),
            scratch_shapes=[
                pltpu.VMEM((H, 4 * H), cd),            # W_hh layer 1
                pltpu.VMEM((2 * H, 4 * H), cd),        # [W_ih2 ; W_hh2]
                pltpu.VMEM((1, 4 * H), jnp.float32),   # b2
                pltpu.VMEM((Bc, H), jnp.float32),      # h1
                pltpu.VMEM((Bc, H), jnp.float32),      # c1
                pltpu.VMEM((Bc, H), jnp.float32),      # h2
                pltpu.VMEM((Bc, H), jnp.float32),      # c2
                pltpu.SemaphoreType.DMA((3,)),
            ],
        ),
        compiler_params=pltpu.CompilerParams(
            # batch chunks are independent -> parallel (v7x: 2 TensorCores);
            # the recurrence forces the time axis to stay sequential.
            dimension_semantics=("parallel", "arbitrary"),
            vmem_limit_bytes=32 * 1024 * 1024,
        ),
    )(xg, w_hh1, w_l2, b_l2)

    y = jnp.transpose(y_tm, (1, 0, 2))                                  # (B, T, H)
    # Final-step Linear: one-shot (B,H)x(H,O) with O=8 (lane-sparse) -> cheaper
    # in plain JAX than as an extra resident output block in the pipeline.
    out = jnp.dot(y_tm[-1].astype(jnp.float32), params["w_fc"]) + params["b_fc"]
    return y, out.astype(x.dtype)


# ----------------------------- reference (pure JAX) -----------------------------

def _ref_forward(x, p, compute_dtype=jnp.bfloat16):
    """Mirrors the kernel math (same dtype casts / fused layer-2 matmul)."""
    cd = compute_dtype
    B, T, D = x.shape
    H = p["w_hh1"].shape[0]

    xg = (jnp.einsum("btd,dg->btg", x.astype(cd), p["w_ih1"].astype(cd),
                     preferred_element_type=jnp.float32) + p["b1"])
    w_hh1 = p["w_hh1"].astype(cd)
    w_l2 = jnp.concatenate([p["w_ih2"], p["w_hh2"]], axis=0).astype(cd)
    b_l2 = p["b2"].astype(jnp.float32)

    def split_gates(g):
        return (jax.nn.sigmoid(g[:, 0 * H:1 * H]),
                jax.nn.sigmoid(g[:, 1 * H:2 * H]),
                jnp.tanh(g[:, 2 * H:3 * H]),
                jax.nn.sigmoid(g[:, 3 * H:4 * H]))

    def step(carry, xg_t):
        h1, c1, h2, c2 = carry
        g1 = xg_t + jnp.dot(h1.astype(cd), w_hh1,
                            preferred_element_type=jnp.float32)
        i1, f1, gg1, o1 = split_gates(g1)
        c1 = f1 * c1 + i1 * gg1
        h1 = o1 * jnp.tanh(c1)
        g2 = (jnp.dot(jnp.concatenate([h1, h2], axis=-1).astype(cd), w_l2,
                      preferred_element_type=jnp.float32) + b_l2)
        i2, f2, gg2, o2 = split_gates(g2)
        c2 = f2 * c2 + i2 * gg2
        h2 = o2 * jnp.tanh(c2)
        return (h1, c1, h2, c2), h2

    z = jnp.zeros((B, H), jnp.float32)
    _, ys = lax.scan(step, (z, z, z, z), jnp.transpose(xg, (1, 0, 2)))
    y = jnp.transpose(ys, (1, 0, 2)).astype(x.dtype)
    out = jnp.dot(y[:, -1, :].astype(jnp.float32), p["w_fc"]) + p["b_fc"]
    return y, out.astype(x.dtype)


# ----------------------------- parameter init -----------------------------

def init_params(key, input_dim, hidden_dim, output_dim):
    """Deterministic init mimicking PyTorch's U(-1/sqrt(H), 1/sqrt(H)).
    Weights are stored pre-transposed for right-multiplication (x @ W)."""
    H, D, O = hidden_dim, input_dim, output_dim
    k = 1.0 / jnp.sqrt(jnp.float32(H))
    keys = jax.random.split(key, 10)

    def u(kk, shape):
        return jax.random.uniform(kk, shape, jnp.float32, -k, k)

    # nn.LSTM stores (4H, in) / (4H, H); transpose to (in, 4H) / (H, 4H).
    w_ih1 = u(keys[0], (4 * H, D)).T
    w_hh1 = u(keys[1], (4 * H, H)).T
    b1 = (u(keys[2], (4 * H,)) + u(keys[3], (4 * H,))).reshape(1, 4 * H)
    w_ih2 = u(keys[4], (4 * H, H)).T
    w_hh2 = u(keys[5], (4 * H, H)).T
    b2 = (u(keys[6], (4 * H,)) + u(keys[7], (4 * H,))).reshape(1, 4 * H)
    w_fc = u(keys[8], (O, H)).T
    b_fc = u(keys[9], (O,)).reshape(1, O)

    return dict(w_ih1=w_ih1, w_hh1=w_hh1, b1=b1,
                w_ih2=w_ih2, w_hh2=w_hh2, b2=b2,
                w_fc=w_fc, b_fc=b_fc)


if __name__ == "__main__":
    # Module defaults: hidden_dim=128, output_dim=8. Small but aligned shapes:
    # B=16 (two sublane-aligned batch chunks), T=16 (two time chunks), D=16.
    B, T, D, H, O = 16, 16, 16, 128, 8
    key = jax.random.PRNGKey(0)
    kx, kp = jax.random.split(key)
    x = jax.random.normal(kx, (B, T, D), jnp.float32)
    params = init_params(kp, D, H, O)

    y, out = activity_lstm_forward(x, params, time_block=8, batch_block=8,
                                   compute_dtype=jnp.bfloat16)
    jax.block_until_ready((y, out))

    y_ref, out_ref = _ref_forward(x, params, compute_dtype=jnp.bfloat16)
    assert y.shape == (B, T, H) and out.shape == (B, O)
    assert jnp.allclose(y, y_ref, atol=1e-3, rtol=1e-3)
    assert jnp.allclose(out, out_ref, atol=1e-3, rtol=1e-3)

    print("KERNEL_OK")
</pallas_src>

<mosaic_0001>
module attributes {stable_mosaic.version = 11 : i64} {
  func.func @_lstm2_kernel(%arg0: i32, %arg1: i32, %arg2: memref<8x8x512xf32, #tpu.memory_space<vmem>>, %arg3: memref<128x512xbf16, #tpu.memory_space<any>>, %arg4: memref<256x512xbf16, #tpu.memory_space<any>>, %arg5: memref<1x512xf32, #tpu.memory_space<any>>, %arg6: memref<8x8x128xf32, #tpu.memory_space<vmem>>, %arg7: memref<128x512xbf16, #tpu.memory_space<vmem>>, %arg8: memref<256x512xbf16, #tpu.memory_space<vmem>>, %arg9: memref<1x512xf32, #tpu.memory_space<vmem>>, %arg10: memref<8x128xf32, #tpu.memory_space<vmem>>, %arg11: memref<8x128xf32, #tpu.memory_space<vmem>>, %arg12: memref<8x128xf32, #tpu.memory_space<vmem>>, %arg13: memref<8x128xf32, #tpu.memory_space<vmem>>, %arg14: memref<3x!tpu.dma_semaphore, #tpu.memory_space<semaphore_mem>>) attributes {dimension_semantics = [#tpu.dimension_semantics<parallel>, #tpu.dimension_semantics<arbitrary>], iteration_bounds = array<i64: 2, 2>, scalar_prefetch = 0 : i64, scratch_operands = 8 : i64, tpu.core_type = #tpu.core_type<tc>, window_params = [{transform_indices = @transform_0, window_bounds = array<i64: 8, 8, 512>}, {}, {}, {}, {transform_indices = @transform_4, window_bounds = array<i64: 8, 8, 128>}]} {
    %c0_i32 = arith.constant 0 : i32
    %0 = arith.cmpi eq, %arg1, %c0_i32 : i32
    %1 = arith.extui %0 : i1 to i32
    %c0_i32_0 = arith.constant 0 : i32
    %2 = arith.cmpi ne, %1, %c0_i32_0 : i32
    scf.if %2 {
      %c0_i32_118 = arith.constant 0 : i32
      %528 = tpu.memref_slice %arg14[%c0_i32_118] : memref<3x!tpu.dma_semaphore, #tpu.memory_space<semaphore_mem>> -> memref<1x!tpu.dma_semaphore, #tpu.memory_space<semaphore_mem>>
      %529 = tpu.memref_squeeze %528 : memref<1x!tpu.dma_semaphore, #tpu.memory_space<semaphore_mem>> -> memref<!tpu.dma_semaphore, #tpu.memory_space<semaphore_mem>>
      tpu.enqueue_dma source(%arg3 : memref<128x512xbf16, #tpu.memory_space<any>>) target(%arg7 : memref<128x512xbf16, #tpu.memory_space<vmem>>) target_semaphore(%529 : memref<!tpu.dma_semaphore, #tpu.memory_space<semaphore_mem>>)
      %c1_i32_119 = arith.constant 1 : i32
      %530 = tpu.memref_slice %arg14[%c1_i32_119] : memref<3x!tpu.dma_semaphore, #tpu.memory_space<semaphore_mem>> -> memref<1x!tpu.dma_semaphore, #tpu.memory_space<semaphore_mem>>
      %531 = tpu.memref_squeeze %530 : memref<1x!tpu.dma_semaphore, #tpu.memory_space<semaphore_mem>> -> memref<!tpu.dma_semaphore, #tpu.memory_space<semaphore_mem>>
      tpu.enqueue_dma source(%arg4 : memref<256x512xbf16, #tpu.memory_space<any>>) target(%arg8 : memref<256x512xbf16, #tpu.memory_space<vmem>>) target_semaphore(%531 : memref<!tpu.dma_semaphore, #tpu.memory_space<semaphore_mem>>)
      %c2_i32_120 = arith.constant 2 : i32
      %532 = tpu.memref_slice %arg14[%c2_i32_120] : memref<3x!tpu.dma_semaphore, #tpu.memory_space<semaphore_mem>> -> memref<1x!tpu.dma_semaphore, #tpu.memory_space<semaphore_mem>>
      %533 = tpu.memref_squeeze %532 : memref<1x!tpu.dma_semaphore, #tpu.memory_space<semaphore_mem>> -> memref<!tpu.dma_semaphore, #tpu.memory_space<semaphore_mem>>
      tpu.enqueue_dma source(%arg5 : memref<1x512xf32, #tpu.memory_space<any>>) target(%arg9 : memref<1x512xf32, #tpu.memory_space<vmem>>) target_semaphore(%533 : memref<!tpu.dma_semaphore, #tpu.memory_space<semaphore_mem>>)
      %c0_i32_121 = arith.constant 0 : i32
      %534 = tpu.memref_slice %arg14[%c0_i32_121] : memref<3x!tpu.dma_semaphore, #tpu.memory_space<semaphore_mem>> -> memref<1x!tpu.dma_semaphore, #tpu.memory_space<semaphore_mem>>
      %535 = tpu.memref_squeeze %534 : memref<1x!tpu.dma_semaphore, #tpu.memory_space<semaphore_mem>> -> memref<!tpu.dma_semaphore, #tpu.memory_space<semaphore_mem>>
      tpu.wait_dma2 semaphore(%535 : memref<!tpu.dma_semaphore, #tpu.memory_space<semaphore_mem>>) src(%arg3 : memref<128x512xbf16, #tpu.memory_space<any>>) dst(%arg7 : memref<128x512xbf16, #tpu.memory_space<vmem>>)
      %c1_i32_122 = arith.constant 1 : i32
      %536 = tpu.memref_slice %arg14[%c1_i32_122] : memref<3x!tpu.dma_semaphore, #tpu.memory_space<semaphore_mem>> -> memref<1x!tpu.dma_semaphore, #tpu.memory_space<semaphore_mem>>
      %537 = tpu.memref_squeeze %536 : memref<1x!tpu.dma_semaphore, #tpu.memory_space<semaphore_mem>> -> memref<!tpu.dma_semaphore, #tpu.memory_space<semaphore_mem>>
      tpu.wait_dma2 semaphore(%537 : memref<!tpu.dma_semaphore, #tpu.memory_space<semaphore_mem>>) src(%arg4 : memref<256x512xbf16, #tpu.memory_space<any>>) dst(%arg8 : memref<256x512xbf16, #tpu.memory_space<vmem>>)
      %c2_i32_123 = arith.constant 2 : i32
      %538 = tpu.memref_slice %arg14[%c2_i32_123] : memref<3x!tpu.dma_semaphore, #tpu.memory_space<semaphore_mem>> -> memref<1x!tpu.dma_semaphore, #tpu.memory_space<semaphore_mem>>
      %539 = tpu.memref_squeeze %538 : memref<1x!tpu.dma_semaphore, #tpu.memory_space<semaphore_mem>> -> memref<!tpu.dma_semaphore, #tpu.memory_space<semaphore_mem>>
      tpu.wait_dma2 semaphore(%539 : memref<!tpu.dma_semaphore, #tpu.memory_space<semaphore_mem>>) src(%arg5 : memref<1x512xf32, #tpu.memory_space<any>>) dst(%arg9 : memref<1x512xf32, #tpu.memory_space<vmem>>)
      %cst_124 = arith.constant 0.000000e+00 : f32
      %540 = vector.broadcast %cst_124 : f32 to vector<8x128xf32>
      %c0_125 = arith.constant 0 : index
      %c0_126 = arith.constant 0 : index
      %541 = vector.load %arg10[%c0_125, %c0_126] : memref<8x128xf32, #tpu.memory_space<vmem>>, vector<8x128xf32>
      tpu.vector_store %arg10[%c0_125, %c0_126], %540 {strides = array<i32>} : memref<8x128xf32, #tpu.memory_space<vmem>>, vector<8x128xf32>,
      %cst_127 = arith.constant 0.000000e+00 : f32
      %542 = vector.broadcast %cst_127 : f32 to vector<8x128xf32>
      %c0_128 = arith.constant 0 : index
      %c0_129 = arith.constant 0 : index
      %543 = vector.load %arg11[%c0_128, %c0_129] : memref<8x128xf32, #tpu.memory_space<vmem>>, vector<8x128xf32>
      tpu.vector_store %arg11[%c0_128, %c0_129], %542 {strides = array<i32>} : memref<8x128xf32, #tpu.memory_space<vmem>>, vector<8x128xf32>,
      %cst_130 = arith.constant 0.000000e+00 : f32
      %544 = vector.broadcast %cst_130 : f32 to vector<8x128xf32>
      %c0_131 = arith.constant 0 : index
      %c0_132 = arith.constant 0 : index
      %545 = vector.load %arg12[%c0_131, %c0_132] : memref<8x128xf32, #tpu.memory_space<vmem>>, vector<8x128xf32>
      tpu.vector_store %arg12[%c0_131, %c0_132], %544 {strides = array<i32>} : memref<8x128xf32, #tpu.memory_space<vmem>>, vector<8x128xf32>,
      %cst_133 = arith.constant 0.000000e+00 : f32
      %546 = vector.broadcast %cst_133 : f32 to vector<8x128xf32>
      %c0_134 = arith.constant 0 : index
      %c0_135 = arith.constant 0 : index
      %547 = vector.load %arg13[%c0_134, %c0_135] : memref<8x128xf32, #tpu.memory_space<vmem>>, vector<8x128xf32>
      tpu.vector_store %arg13[%c0_134, %c0_135], %546 {strides = array<i32>} : memref<8x128xf32, #tpu.memory_space<vmem>>, vector<8x128xf32>,
    } else {
    }
    %c0 = arith.constant 0 : index
    %c0_1 = arith.constant 0 : index
    %3 = vector.load %arg7[%c0, %c0_1] : memref<128x512xbf16, #tpu.memory_space<vmem>>, vector<128x512xbf16>
    %c0_2 = arith.constant 0 : index
    %c0_3 = arith.constant 0 : index
    %4 = vector.load %arg8[%c0_2, %c0_3] : memref<256x512xbf16, #tpu.memory_space<vmem>>, vector<256x512xbf16>
    %c0_4 = arith.constant 0 : index
    %c0_5 = arith.constant 0 : index
    %5 = vector.load %arg9[%c0_4, %c0_5] : memref<1x512xf32, #tpu.memory_space<vmem>>, vector<1x512xf32>
    %6 = vector.shape_cast %5 : vector<1x512xf32> to vector<1x512xf32>
    %7 = vector.broadcast %6 : vector<1x512xf32> to vector<8x512xf32>
    %c0_6 = arith.constant 0 : index
    %c0_7 = arith.constant 0 : index
    %8 = vector.load %arg10[%c0_6, %c0_7] : memref<8x128xf32, #tpu.memory_space<vmem>>, vector<8x128xf32>
    %c0_8 = arith.constant 0 : index
    %c0_9 = arith.constant 0 : index
    %9 = vector.load %arg11[%c0_8, %c0_9] : memref<8x128xf32, #tpu.memory_space<vmem>>, vector<8x128xf32>
    %c0_10 = arith.constant 0 : index
    %c0_11 = arith.constant 0 : index
    %10 = vector.load %arg12[%c0_10, %c0_11] : memref<8x128xf32, #tpu.memory_space<vmem>>, vector<8x128xf32>
    %c0_12 = arith.constant 0 : index
    %c0_13 = arith.constant 0 : index
    %11 = vector.load %arg13[%c0_12, %c0_13] : memref<8x128xf32, #tpu.memory_space<vmem>>, vector<8x128xf32>
    %c0_i32_14 = arith.constant 0 : i32
    %12 = arith.index_cast %c0_i32_14 : i32 to index
    %c0_15 = arith.constant 0 : index
    %c0_16 = arith.constant 0 : index
    %13 = vector.load %arg2[%12, %c0_15, %c0_16] : memref<8x8x512xf32, #tpu.memory_space<vmem>>, vector<1x8x512xf32>
    %14 = vector.shape_cast %13 : vector<1x8x512xf32> to vector<8x512xf32>
    %15 = arith.truncf %8 : vector<8x128xf32> to vector<8x128xbf16>
    %cst = arith.constant dense<0.000000e+00> : vector<8x512xf32>
    %16 = tpu.matmul %15, %3, %cst {dimension_numbers = #tpu.dot_dimension_numbers<[1], [0], [0], [1], [0, 0, 1, 1], [], []>} : vector<8x128xbf16>, vector<128x512xbf16>, vector<8x512xf32> -> vector<8x512xf32>
    %17 = arith.addf %14, %16 : vector<8x512xf32>
    %18 = vector.extract_strided_slice %17 {offsets = [0, 0], sizes = [8, 128], strides = [1, 1]} : vector<8x512xf32> to vector<8x128xf32>
    %19 = arith.negf %18 : vector<8x128xf32>
    %20 = math.exp %19 : vector<8x128xf32>
    %cst_17 = arith.constant 1.000000e+00 : f32
    %21 = vector.broadcast %cst_17 : f32 to vector<8x128xf32>
    %22 = arith.addf %21, %20 : vector<8x128xf32>
    %23 = arith.divf %21, %22 : vector<8x128xf32>
    %24 = vector.extract_strided_slice %17 {offsets = [0, 128], sizes = [8, 128], strides = [1, 1]} : vector<8x512xf32> to vector<8x128xf32>
    %25 = arith.negf %24 : vector<8x128xf32>
    %26 = math.exp %25 : vector<8x128xf32>
    %cst_18 = arith.constant 1.000000e+00 : f32
    %27 = vector.broadcast %cst_18 : f32 to vector<8x128xf32>
    %28 = arith.addf %27, %26 : vector<8x128xf32>
    %29 = arith.divf %27, %28 : vector<8x128xf32>
    %30 = vector.extract_strided_slice %17 {offsets = [0, 256], sizes = [8, 128], strides = [1, 1]} : vector<8x512xf32> to vector<8x128xf32>
    %31 = math.tanh %30 : vector<8x128xf32>
    %32 = vector.extract_strided_slice %17 {offsets = [0, 384], sizes = [8, 128], strides = [1, 1]} : vector<8x512xf32> to vector<8x128xf32>
    %33 = arith.negf %32 : vector<8x128xf32>
    %34 = math.exp %33 : vector<8x128xf32>
    %cst_19 = arith.constant 1.000000e+00 : f32
    %35 = vector.broadcast %cst_19 : f32 to vector<8x128xf32>
    %36 = arith.addf %35, %34 : vector<8x128xf32>
    %37 = arith.divf %35, %36 : vector<8x128xf32>
    %38 = arith.mulf %29, %9 : vector<8x128xf32>
    %39 = arith.mulf %23, %31 : vector<8x128xf32>
    %40 = arith.addf %38, %39 : vector<8x128xf32>
    %41 = math.tanh %40 : vector<8x128xf32>
    %42 = arith.mulf %37, %41 : vector<8x128xf32>
    %43 = tpu.concatenate %42, %10 in 1 : vector<8x128xf32>, vector<8x128xf32> -> vector<8x256xf32>
    %44 = arith.truncf %43 : vector<8x256xf32> to vector<8x256xbf16>
    %cst_20 = arith.constant dense<0.000000e+00> : vector<8x512xf32>
    %45 = tpu.matmul %44, %4, %cst_20 {dimension_numbers = #tpu.dot_dimension_numbers<[1], [0], [0], [1], [0, 0, 1, 1], [], []>} : vector<8x256xbf16>, vector<256x512xbf16>, vector<8x512xf32> -> vector<8x512xf32>
    %46 = arith.addf %45, %7 : vector<8x512xf32>
    %47 = vector.extract_strided_slice %46 {offsets = [0, 0], sizes = [8, 128], strides = [1, 1]} : vector<8x512xf32> to vector<8x128xf32>
    %48 = arith.negf %47 : vector<8x128xf32>
    %49 = math.exp %48 : vector<8x128xf32>
    %cst_21 = arith.constant 1.000000e+00 : f32
    %50 = vector.broadcast %cst_21 : f32 to vector<8x128xf32>
    %51 = arith.addf %50, %49 : vector<8x128xf32>
    %52 = arith.divf %50, %51 : vector<8x128xf32>
    %53 = vector.extract_strided_slice %46 {offsets = [0, 128], sizes = [8, 128], strides = [1, 1]} : vector<8x512xf32> to vector<8x128xf32>
    %54 = arith.negf %53 : vector<8x128xf32>
    %55 = math.exp %54 : vector<8x128xf32>
    %cst_22 = arith.constant 1.000000e+00 : f32
    %56 = vector.broadcast %cst_22 : f32 to vector<8x128xf32>
    %57 = arith.addf %56, %55 : vector<8x128xf32>
    %58 = arith.divf %56, %57 : vector<8x128xf32>
    %59 = vector.extract_strided_slice %46 {offsets = [0, 256], sizes = [8, 128], strides = [1, 1]} : vector<8x512xf32> to vector<8x128xf32>
    %60 = math.tanh %59 : vector<8x128xf32>
    %61 = vector.extract_strided_slice %46 {offsets = [0, 384], sizes = [8, 128], strides = [1, 1]} : vector<8x512xf32> to vector<8x128xf32>
    %62 = arith.negf %61 : vector<8x128xf32>
    %63 = math.exp %62 : vector<8x128xf32>
    %cst_23 = arith.constant 1.000000e+00 : f32
    %64 = vector.broadcast %cst_23 : f32 to vector<8x128xf32>
    %65 = arith.addf %64, %63 : vector<8x128xf32>
    %66 = arith.divf %64, %65 : vector<8x128xf32>
    %67 = arith.mulf %58, %11 : vector<8x128xf32>
    %68 = arith.mulf %52, %60 : vector<8x128xf32>
    %69 = arith.addf %67, %68 : vector<8x128xf32>
    %70 = math.tanh %69 : vector<8x128xf32>
    %71 = arith.mulf %66, %70 : vector<8x128xf32>
    %72 = arith.index_cast %c0_i32_14 : i32 to index
    %c0_24 = arith.constant 0 : index
    %c0_25 = arith.constant 0 : index
    %73 = vector.load %arg6[%72, %c0_24, %c0_25] : memref<8x8x128xf32, #tpu.memory_space<vmem>>, vector<1x8x128xf32>
    %74 = vector.shape_cast %73 : vector<1x8x128xf32> to vector<8x128xf32>
    %75 = vector.shape_cast %71 : vector<8x128xf32> to vector<1x8x128xf32>
    tpu.vector_store %arg6[%72, %c0_24, %c0_25], %75 {strides = array<i32>} : memref<8x8x128xf32, #tpu.memory_space<vmem>>, vector<1x8x128xf32>,
    %c1_i32 = arith.constant 1 : i32
    %76 = arith.index_cast %c1_i32 : i32 to index
    %c0_26 = arith.constant 0 : index
    %c0_27 = arith.constant 0 : index
    %77 = vector.load %arg2[%76, %c0_26, %c0_27] : memref<8x8x512xf32, #tpu.memory_space<vmem>>, vector<1x8x512xf32>
    %78 = vector.shape_cast %77 : vector<1x8x512xf32> to vector<8x512xf32>
    %79 = arith.truncf %42 : vector<8x128xf32> to vector<8x128xbf16>
    %cst_28 = arith.constant dense<0.000000e+00> : vector<8x512xf32>
    %80 = tpu.matmul %79, %3, %cst_28 {dimension_numbers = #tpu.dot_dimension_numbers<[1], [0], [0], [1], [0, 0, 1, 1], [], []>} : vector<8x128xbf16>, vector<128x512xbf16>, vector<8x512xf32> -> vector<8x512xf32>
    %81 = arith.addf %78, %80 : vector<8x512xf32>
    %82 = vector.extract_strided_slice %81 {offsets = [0, 0], sizes = [8, 128], strides = [1, 1]} : vector<8x512xf32> to vector<8x128xf32>
    %83 = arith.negf %82 : vector<8x128xf32>
    %84 = math.exp %83 : vector<8x128xf32>
    %cst_29 = arith.constant 1.000000e+00 : f32
    %85 = vector.broadcast %cst_29 : f32 to vector<8x128xf32>
    %86 = arith.addf %85, %84 : vector<8x128xf32>
    %87 = arith.divf %85, %86 : vector<8x128xf32>
    %88 = vector.extract_strided_slice %81 {offsets = [0, 128], sizes = [8, 128], strides = [1, 1]} : vector<8x512xf32> to vector<8x128xf32>
    %89 = arith.negf %88 : vector<8x128xf32>
    %90 = math.exp %89 : vector<8x128xf32>
    %cst_30 = arith.constant 1.000000e+00 : f32
    %91 = vector.broadcast %cst_30 : f32 to vector<8x128xf32>
    %92 = arith.addf %91, %90 : vector<8x128xf32>
    %93 = arith.divf %91, %92 : vector<8x128xf32>
    %94 = vector.extract_strided_slice %81 {offsets = [0, 256], sizes = [8, 128], strides = [1, 1]} : vector<8x512xf32> to vector<8x128xf32>
    %95 = math.tanh %94 : vector<8x128xf32>
    %96 = vector.extract_strided_slice %81 {offsets = [0, 384], sizes = [8, 128], strides = [1, 1]} : vector<8x512xf32> to vector<8x128xf32>
    %97 = arith.negf %96 : vector<8x128xf32>
    %98 = math.exp %97 : vector<8x128xf32>
    %cst_31 = arith.constant 1.000000e+00 : f32
    %99 = vector.broadcast %cst_31 : f32 to vector<8x128xf32>
    %100 = arith.addf %99, %98 : vector<8x128xf32>
    %101 = arith.divf %99, %100 : vector<8x128xf32>
    %102 = arith.mulf %93, %40 : vector<8x128xf32>
    %103 = arith.mulf %87, %95 : vector<8x128xf32>
    %104 = arith.addf %102, %103 : vector<8x128xf32>
    %105 = math.tanh %104 : vector<8x128xf32>
    %106 = arith.mulf %101, %105 : vector<8x128xf32>
    %107 = tpu.concatenate %106, %71 in 1 : vector<8x128xf32>, vector<8x128xf32> -> vector<8x256xf32>
    %108 = arith.truncf %107 : vector<8x256xf32> to vector<8x256xbf16>
    %cst_32 = arith.constant dense<0.000000e+00> : vector<8x512xf32>
    %109 = tpu.matmul %108, %4, %cst_32 {dimension_numbers = #tpu.dot_dimension_numbers<[1], [0], [0], [1], [0, 0, 1, 1], [], []>} : vector<8x256xbf16>, vector<256x512xbf16>, vector<8x512xf32> -> vector<8x512xf32>
    %110 = arith.addf %109, %7 : vector<8x512xf32>
    %111 = vector.extract_strided_slice %110 {offsets = [0, 0], sizes = [8, 128], strides = [1, 1]} : vector<8x512xf32> to vector<8x128xf32>
    %112 = arith.negf %111 : vector<8x128xf32>
    %113 = math.exp %112 : vector<8x128xf32>
    %cst_33 = arith.constant 1.000000e+00 : f32
    %114 = vector.broadcast %cst_33 : f32 to vector<8x128xf32>
    %115 = arith.addf %114, %113 : vector<8x128xf32>
    %116 = arith.divf %114, %115 : vector<8x128xf32>
    %117 = vector.extract_strided_slice %110 {offsets = [0, 128], sizes = [8, 128], strides = [1, 1]} : vector<8x512xf32> to vector<8x128xf32>
    %118 = arith.negf %117 : vector<8x128xf32>
    %119 = math.exp %118 : vector<8x128xf32>
    %cst_34 = arith.constant 1.000000e+00 : f32
    %120 = vector.broadcast %cst_34 : f32 to vector<8x128xf32>
    %121 = arith.addf %120, %119 : vector<8x128xf32>
    %122 = arith.divf %120, %121 : vector<8x128xf32>
    %123 = vector.extract_strided_slice %110 {offsets = [0, 256], sizes = [8, 128], strides = [1, 1]} : vector<8x512xf32> to vector<8x128xf32>
    %124 = math.tanh %123 : vector<8x128xf32>
    %125 = vector.extract_strided_slice %110 {offsets = [0, 384], sizes = [8, 128], strides = [1, 1]} : vector<8x512xf32> to vector<8x128xf32>
    %126 = arith.negf %125 : vector<8x128xf32>
    %127 = math.exp %126 : vector<8x128xf32>
    %cst_35 = arith.constant 1.000000e+00 : f32
    %128 = vector.broadcast %cst_35 : f32 to vector<8x128xf32>
    %129 = arith.addf %128, %127 : vector<8x128xf32>
    %130 = arith.divf %128, %129 : vector<8x128xf32>
    %131 = arith.mulf %122, %69 : vector<8x128xf32>
    %132 = arith.mulf %116, %124 : vector<8x128xf32>
    %133 = arith.addf %131, %132 : vector<8x128xf32>
    %134 = math.tanh %133 : vector<8x128xf32>
    %135 = arith.mulf %130, %134 : vector<8x128xf32>
    %136 = arith.index_cast %c1_i32 : i32 to index
    %c0_36 = arith.constant 0 : index
    %c0_37 = arith.constant 0 : index
    %137 = vector.load %arg6[%136, %c0_36, %c0_37] : memref<8x8x128xf32, #tpu.memory_space<vmem>>, vector<1x8x128xf32>
    %138 = vector.shape_cast %137 : vector<1x8x128xf32> to vector<8x128xf32>
    %139 = vector.shape_cast %135 : vector<8x128xf32> to vector<1x8x128xf32>
    tpu.vector_store %arg6[%136, %c0_36, %c0_37], %139 {strides = array<i32>} : memref<8x8x128xf32, #tpu.memory_space<vmem>>, vector<1x8x128xf32>,
    %c2_i32 = arith.constant 2 : i32
    %140 = arith.index_cast %c2_i32 : i32 to index
    %c0_38 = arith.constant 0 : index
    %c0_39 = arith.constant 0 : index
    %141 = vector.load %arg2[%140, %c0_38, %c0_39] : memref<8x8x512xf32, #tpu.memory_space<vmem>>, vector<1x8x512xf32>
    %142 = vector.shape_cast %141 : vector<1x8x512xf32> to vector<8x512xf32>
    %143 = arith.truncf %106 : vector<8x128xf32> to vector<8x128xbf16>
    %cst_40 = arith.constant dense<0.000000e+00> : vector<8x512xf32>
    %144 = tpu.matmul %143, %3, %cst_40 {dimension_numbers = #tpu.dot_dimension_numbers<[1], [0], [0], [1], [0, 0, 1, 1], [], []>} : vector<8x128xbf16>, vector<128x512xbf16>, vector<8x512xf32> -> vector<8x512xf32>
    %145 = arith.addf %142, %144 : vector<8x512xf32>
    %146 = vector.extract_strided_slice %145 {offsets = [0, 0], sizes = [8, 128], strides = [1, 1]} : vector<8x512xf32> to vector<8x128xf32>
    %147 = arith.negf %146 : vector<8x128xf32>
    %148 = math.exp %147 : vector<8x128xf32>
    %cst_41 = arith.constant 1.000000e+00 : f32
    %149 = vector.broadcast %cst_41 : f32 to vector<8x128xf32>
    %150 = arith.addf %149, %148 : vector<8x128xf32>
    %151 = arith.divf %149, %150 : vector<8x128xf32>
    %152 = vector.extract_strided_slice %145 {offsets = [0, 128], sizes = [8, 128], strides = [1, 1]} : vector<8x512xf32> to vector<8x128xf32>
    %153 = arith.negf %152 : vector<8x128xf32>
    %154 = math.exp %153 : vector<8x128xf32>
    %cst_42 = arith.constant 1.000000e+00 : f32
    %155 = vector.broadcast %cst_42 : f32 to vector<8x128xf32>
    %156 = arith.addf %155, %154 : vector<8x128xf32>
    %157 = arith.divf %155, %156 : vector<8x128xf32>
    %158 = vector.extract_strided_slice %145 {offsets = [0, 256], sizes = [8, 128], strides = [1, 1]} : vector<8x512xf32> to vector<8x128xf32>
    %159 = math.tanh %158 : vector<8x128xf32>
    %160 = vector.extract_strided_slice %145 {offsets = [0, 384], sizes = [8, 128], strides = [1, 1]} : vector<8x512xf32> to vector<8x128xf32>
    %161 = arith.negf %160 : vector<8x128xf32>
    %162 = math.exp %161 : vector<8x128xf32>
    %cst_43 = arith.constant 1.000000e+00 : f32
    %163 = vector.broadcast %cst_43 : f32 to vector<8x128xf32>
    %164 = arith.addf %163, %162 : vector<8x128xf32>
    %165 = arith.divf %163, %164 : vector<8x128xf32>
    %166 = arith.mulf %157, %104 : vector<8x128xf32>
    %167 = arith.mulf %151, %159 : vector<8x128xf32>
    %168 = arith.addf %166, %167 : vector<8x128xf32>
    %169 = math.tanh %168 : vector<8x128xf32>
    %170 = arith.mulf %165, %169 : vector<8x128xf32>
    %171 = tpu.concatenate %170, %135 in 1 : vector<8x128xf32>, vector<8x128xf32> -> vector<8x256xf32>
    %172 = arith.truncf %171 : vector<8x256xf32> to vector<8x256xbf16>
    %cst_44 = arith.constant dense<0.000000e+00> : vector<8x512xf32>
    %173 = tpu.matmul %172, %4, %cst_44 {dimension_numbers = #tpu.dot_dimension_numbers<[1], [0], [0], [1], [0, 0, 1, 1], [], []>} : vector<8x256xbf16>, vector<256x512xbf16>, vector<8x512xf32> -> vector<8x512xf32>
    %174 = arith.addf %173, %7 : vector<8x512xf32>
    %175 = vector.extract_strided_slice %174 {offsets = [0, 0], sizes = [8, 128], strides = [1, 1]} : vector<8x512xf32> to vector<8x128xf32>
    %176 = arith.negf %175 : vector<8x128xf32>
    %177 = math.exp %176 : vector<8x128xf32>
    %cst_45 = arith.constant 1.000000e+00 : f32
    %178 = vector.broadcast %cst_45 : f32 to vector<8x128xf32>
    %179 = arith.addf %178, %177 : vector<8x128xf32>
    %180 = arith.divf %178, %179 : vector<8x128xf32>
    %181 = vector.extract_strided_slice %174 {offsets = [0, 128], sizes = [8, 128], strides = [1, 1]} : vector<8x512xf32> to vector<8x128xf32>
    %182 = arith.negf %181 : vector<8x128xf32>
    %183 = math.exp %182 : vector<8x128xf32>
    %cst_46 = arith.constant 1.000000e+00 : f32
    %184 = vector.broadcast %cst_46 : f32 to vector<8x128xf32>
    %185 = arith.addf %184, %183 : vector<8x128xf32>
    %186 = arith.divf %184, %185 : vector<8x128xf32>
    %187 = vector.extract_strided_slice %174 {offsets = [0, 256], sizes = [8, 128], strides = [1, 1]} : vector<8x512xf32> to vector<8x128xf32>
    %188 = math.tanh %187 : vector<8x128xf32>
    %189 = vector.extract_strided_slice %174 {offsets = [0, 384], sizes = [8, 128], strides = [1, 1]} : vector<8x512xf32> to vector<8x128xf32>
    %190 = arith.negf %189 : vector<8x128xf32>
    %191 = math.exp %190 : vector<8x128xf32>
    %cst_47 = arith.constant 1.000000e+00 : f32
    %192 = vector.broadcast %cst_47 : f32 to vector<8x128xf32>
    %193 = arith.addf %192, %191 : vector<8x128xf32>
    %194 = arith.divf %192, %193 : vector<8x128xf32>
    %195 = arith.mulf %186, %133 : vector<8x128xf32>
    %196 = arith.mulf %180, %188 : vector<8x128xf32>
    %197 = arith.addf %195, %196 : vector<8x128xf32>
    %198 = math.tanh %197 : vector<8x128xf32>
    %199 = arith.mulf %194, %198 : vector<8x128xf32>
    %200 = arith.index_cast %c2_i32 : i32 to index
    %c0_48 = arith.constant 0 : index
    %c0_49 = arith.constant 0 : index
    %201 = vector.load %arg6[%200, %c0_48, %c0_49] : memref<8x8x128xf32, #tpu.memory_space<vmem>>, vector<1x8x128xf32>
    %202 = vector.shape_cast %201 : vector<1x8x128xf32> to vector<8x128xf32>
    %203 = vector.shape_cast %199 : vector<8x128xf32> to vector<1x8x128xf32>
    tpu.vector_store %arg6[%200, %c0_48, %c0_49], %203 {strides = array<i32>} : memref<8x8x128xf32, #tpu.memory_space<vmem>>, vector<1x8x128xf32>,
    %c3_i32 = arith.constant 3 : i32
    %204 = arith.index_cast %c3_i32 : i32 to index
    %c0_50 = arith.constant 0 : index
    %c0_51 = arith.constant 0 : index
    %205 = vector.load %arg2[%204, %c0_50, %c0_51] : memref<8x8x512xf32, #tpu.memory_space<vmem>>, vector<1x8x512xf32>
    %206 = vector.shape_cast %205 : vector<1x8x512xf32> to vector<8x512xf32>
    %207 = arith.truncf %170 : vector<8x128xf32> to vector<8x128xbf16>
    %cst_52 = arith.constant dense<0.000000e+00> : vector<8x512xf32>
    %208 = tpu.matmul %207, %3, %cst_52 {dimension_numbers = #tpu.dot_dimension_numbers<[1], [0], [0], [1], [0, 0, 1, 1], [], []>} : vector<8x128xbf16>, vector<128x512xbf16>, vector<8x512xf32> -> vector<8x512xf32>
    %209 = arith.addf %206, %208 : vector<8x512xf32>
    %210 = vector.extract_strided_slice %209 {offsets = [0, 0], sizes = [8, 128], strides = [1, 1]} : vector<8x512xf32> to vector<8x128xf32>
    %211 = arith.negf %210 : vector<8x128xf32>
    %212 = math.exp %211 : vector<8x128xf32>
    %cst_53 = arith.constant 1.000000e+00 : f32
    %213 = vector.broadcast %cst_53 : f32 to vector<8x128xf32>
    %214 = arith.addf %213, %212 : vector<8x128xf32>
    %215 = arith.divf %213, %214 : vector<8x128xf32>
    %216 = vector.extract_strided_slice %209 {offsets = [0, 128], sizes = [8, 128], strides = [1, 1]} : vector<8x512xf32> to vector<8x128xf32>
    %217 = arith.negf %216 : vector<8x128xf32>
    %218 = math.exp %217 : vector<8x128xf32>
    %cst_54 = arith.constant 1.000000e+00 : f32
    %219 = vector.broadcast %cst_54 : f32 to vector<8x128xf32>
    %220 = arith.addf %219, %218 : vector<8x128xf32>
    %221 = arith.divf %219, %220 : vector<8x128xf32>
    %222 = vector.extract_strided_slice %209 {offsets = [0, 256], sizes = [8, 128], strides = [1, 1]} : vector<8x512xf32> to vector<8x128xf32>
    %223 = math.tanh %222 : vector<8x128xf32>
    %224 = vector.extract_strided_slice %209 {offsets = [0, 384], sizes = [8, 128], strides = [1, 1]} : vector<8x512xf32> to vector<8x128xf32>
    %225 = arith.negf %224 : vector<8x128xf32>
    %226 = math.exp %225 : vector<8x128xf32>
    %cst_55 = arith.constant 1.000000e+00 : f32
    %227 = vector.broadcast %cst_55 : f32 to vector<8x128xf32>
    %228 = arith.addf %227, %226 : vector<8x128xf32>
    %229 = arith.divf %227, %228 : vector<8x128xf32>
    %230 = arith.mulf %221, %168 : vector<8x128xf32>
    %231 = arith.mulf %215, %223 : vector<8x128xf32>
    %232 = arith.addf %230, %231 : vector<8x128xf32>
    %233 = math.tanh %232 : vector<8x128xf32>
    %234 = arith.mulf %229, %233 : vector<8x128xf32>
    %235 = tpu.concatenate %234, %199 in 1 : vector<8x128xf32>, vector<8x128xf32> -> vector<8x256xf32>
    %236 = arith.truncf %235 : vector<8x256xf32> to vector<8x256xbf16>
    %cst_56 = arith.constant dense<0.000000e+00> : vector<8x512xf32>
    %237 = tpu.matmul %236, %4, %cst_56 {dimension_numbers = #tpu.dot_dimension_numbers<[1], [0], [0], [1], [0, 0, 1, 1], [], []>} : vector<8x256xbf16>, vector<256x512xbf16>, vector<8x512xf32> -> vector<8x512xf32>
    %238 = arith.addf %237, %7 : vector<8x512xf32>
    %239 = vector.extract_strided_slice %238 {offsets = [0, 0], sizes = [8, 128], strides = [1, 1]} : vector<8x512xf32> to vector<8x128xf32>
    %240 = arith.negf %239 : vector<8x128xf32>
    %241 = math.exp %240 : vector<8x128xf32>
    %cst_57 = arith.constant 1.000000e+00 : f32
    %242 = vector.broadcast %cst_57 : f32 to vector<8x128xf32>
    %243 = arith.addf %242, %241 : vector<8x128xf32>
    %244 = arith.divf %242, %243 : vector<8x128xf32>
    %245 = vector.extract_strided_slice %238 {offsets = [0, 128], sizes = [8, 128], strides = [1, 1]} : vector<8x512xf32> to vector<8x128xf32>
    %246 = arith.negf %245 : vector<8x128xf32>
    %247 = math.exp %246 : vector<8x128xf32>
    %cst_58 = arith.constant 1.000000e+00 : f32
    %248 = vector.broadcast %cst_58 : f32 to vector<8x128xf32>
    %249 = arith.addf %248, %247 : vector<8x128xf32>
    %250 = arith.divf %248, %249 : vector<8x128xf32>
    %251 = vector.extract_strided_slice %238 {offsets = [0, 256], sizes = [8, 128], strides = [1, 1]} : vector<8x512xf32> to vector<8x128xf32>
    %252 = math.tanh %251 : vector<8x128xf32>
    %253 = vector.extract_strided_slice %238 {offsets = [0, 384], sizes = [8, 128], strides = [1, 1]} : vector<8x512xf32> to vector<8x128xf32>
    %254 = arith.negf %253 : vector<8x128xf32>
    %255 = math.exp %254 : vector<8x128xf32>
    %cst_59 = arith.constant 1.000000e+00 : f32
    %256 = vector.broadcast %cst_59 : f32 to vector<8x128xf32>
    %257 = arith.addf %256, %255 : vector<8x128xf32>
    %258 = arith.divf %256, %257 : vector<8x128xf32>
    %259 = arith.mulf %250, %197 : vector<8x128xf32>
    %260 = arith.mulf %244, %252 : vector<8x128xf32>
    %261 = arith.addf %259, %260 : vector<8x128xf32>
    %262 = math.tanh %261 : vector<8x128xf32>
    %263 = arith.mulf %258, %262 : vector<8x128xf32>
    %264 = arith.index_cast %c3_i32 : i32 to index
    %c0_60 = arith.constant 0 : index
    %c0_61 = arith.constant 0 : index
    %265 = vector.load %arg6[%264, %c0_60, %c0_61] : memref<8x8x128xf32, #tpu.memory_space<vmem>>, vector<1x8x128xf32>
    %266 = vector.shape_cast %265 : vector<1x8x128xf32> to vector<8x128xf32>
    %267 = vector.shape_cast %263 : vector<8x128xf32> to vector<1x8x128xf32>
    tpu.vector_store %arg6[%264, %c0_60, %c0_61], %267 {strides = array<i32>} : memref<8x8x128xf32, #tpu.memory_space<vmem>>, vector<1x8x128xf32>,
    %c4_i32 = arith.constant 4 : i32
    %268 = arith.index_cast %c4_i32 : i32 to index
    %c0_62 = arith.constant 0 : index
    %c0_63 = arith.constant 0 : index
    %269 = vector.load %arg2[%268, %c0_62, %c0_63] : memref<8x8x512xf32, #tpu.memory_space<vmem>>, vector<1x8x512xf32>
    %270 = vector.shape_cast %269 : vector<1x8x512xf32> to vector<8x512xf32>
    %271 = arith.truncf %234 : vector<8x128xf32> to vector<8x128xbf16>
    %cst_64 = arith.constant dense<0.000000e+00> : vector<8x512xf32>
    %272 = tpu.matmul %271, %3, %cst_64 {dimension_numbers = #tpu.dot_dimension_numbers<[1], [0], [0], [1], [0, 0, 1, 1], [], []>} : vector<8x128xbf16>, vector<128x512xbf16>, vector<8x512xf32> -> vector<8x512xf32>
    %273 = arith.addf %270, %272 : vector<8x512xf32>
    %274 = vector.extract_strided_slice %273 {offsets = [0, 0], sizes = [8, 128], strides = [1, 1]} : vector<8x512xf32> to vector<8x128xf32>
    %275 = arith.negf %274 : vector<8x128xf32>
    %276 = math.exp %275 : vector<8x128xf32>
    %cst_65 = arith.constant 1.000000e+00 : f32
    %277 = vector.broadcast %cst_65 : f32 to vector<8x128xf32>
    %278 = arith.addf %277, %276 : vector<8x128xf32>
    %279 = arith.divf %277, %278 : vector<8x128xf32>
    %280 = vector.extract_strided_slice %273 {offsets = [0, 128], sizes = [8, 128], strides = [1, 1]} : vector<8x512xf32> to vector<8x128xf32>
    %281 = arith.negf %280 : vector<8x128xf32>
    %282 = math.exp %281 : vector<8x128xf32>
    %cst_66 = arith.constant 1.000000e+00 : f32
    %283 = vector.broadcast %cst_66 : f32 to vector<8x128xf32>
    %284 = arith.addf %283, %282 : vector<8x128xf32>
    %285 = arith.divf %283, %284 : vector<8x128xf32>
    %286 = vector.extract_strided_slice %273 {offsets = [0, 256], sizes = [8, 128], strides = [1, 1]} : vector<8x512xf32> to vector<8x128xf32>
    %287 = math.tanh %286 : vector<8x128xf32>
    %288 = vector.extract_strided_slice %273 {offsets = [0, 384], sizes = [8, 128], strides = [1, 1]} : vector<8x512xf32> to vector<8x128xf32>
    %289 = arith.negf %288 : vector<8x128xf32>
    %290 = math.exp %289 : vector<8x128xf32>
    %cst_67 = arith.constant 1.000000e+00 : f32
    %291 = vector.broadcast %cst_67 : f32 to vector<8x128xf32>
    %292 = arith.addf %291, %290 : vector<8x128xf32>
    %293 = arith.divf %291, %292 : vector<8x128xf32>
    %294 = arith.mulf %285, %232 : vector<8x128xf32>
    %295 = arith.mulf %279, %287 : vector<8x128xf32>
    %296 = arith.addf %294, %295 : vector<8x128xf32>
    %297 = math.tanh %296 : vector<8x128xf32>
    %298 = arith.mulf %293, %297 : vector<8x128xf32>
    %299 = tpu.concatenate %298, %263 in 1 : vector<8x128xf32>, vector<8x128xf32> -> vector<8x256xf32>
    %300 = arith.truncf %299 : vector<8x256xf32> to vector<8x256xbf16>
    %cst_68 = arith.constant dense<0.000000e+00> : vector<8x512xf32>
    %301 = tpu.matmul %300, %4, %cst_68 {dimension_numbers = #tpu.dot_dimension_numbers<[1], [0], [0], [1], [0, 0, 1, 1], [], []>} : vector<8x256xbf16>, vector<256x512xbf16>, vector<8x512xf32> -> vector<8x512xf32>
    %302 = arith.addf %301, %7 : vector<8x512xf32>
    %303 = vector.extract_strided_slice %302 {offsets = [0, 0], sizes = [8, 128], strides = [1, 1]} : vector<8x512xf32> to vector<8x128xf32>
    %304 = arith.negf %303 : vector<8x128xf32>
    %305 = math.exp %304 : vector<8x128xf32>
    %cst_69 = arith.constant 1.000000e+00 : f32
    %306 = vector.broadcast %cst_69 : f32 to vector<8x128xf32>
    %307 = arith.addf %306, %305 : vector<8x128xf32>
    %308 = arith.divf %306, %307 : vector<8x128xf32>
    %309 = vector.extract_strided_slice %302 {offsets = [0, 128], sizes = [8, 128], strides = [1, 1]} : vector<8x512xf32> to vector<8x128xf32>
    %310 = arith.negf %309 : vector<8x128xf32>
    %311 = math.exp %310 : vector<8x128xf32>
    %cst_70 = arith.constant 1.000000e+00 : f32
    %312 = vector.broadcast %cst_70 : f32 to vector<8x128xf32>
    %313 = arith.addf %312, %311 : vector<8x128xf32>
    %314 = arith.divf %312, %313 : vector<8x128xf32>
    %315 = vector.extract_strided_slice %302 {offsets = [0, 256], sizes = [8, 128], strides = [1, 1]} : vector<8x512xf32> to vector<8x128xf32>
    %316 = math.tanh %315 : vector<8x128xf32>
    %317 = vector.extract_strided_slice %302 {offsets = [0, 384], sizes = [8, 128], strides = [1, 1]} : vector<8x512xf32> to vector<8x128xf32>
    %318 = arith.negf %317 : vector<8x128xf32>
    %319 = math.exp %318 : vector<8x128xf32>
    %cst_71 = arith.constant 1.000000e+00 : f32
    %320 = vector.broadcast %cst_71 : f32 to vector<8x128xf32>
    %321 = arith.addf %320, %319 : vector<8x128xf32>
    %322 = arith.divf %320, %321 : vector<8x128xf32>
    %323 = arith.mulf %314, %261 : vector<8x128xf32>
    %324 = arith.mulf %308, %316 : vector<8x128xf32>
    %325 = arith.addf %323, %324 : vector<8x128xf32>
    %326 = math.tanh %325 : vector<8x128xf32>
    %327 = arith.mulf %322, %326 : vector<8x128xf32>
    %328 = arith.index_cast %c4_i32 : i32 to index
    %c0_72 = arith.constant 0 : index
    %c0_73 = arith.constant 0 : index
    %329 = vector.load %arg6[%328, %c0_72, %c0_73] : memref<8x8x128xf32, #tpu.memory_space<vmem>>, vector<1x8x128xf32>
    %330 = vector.shape_cast %329 : vector<1x8x128xf32> to vector<8x128xf32>
    %331 = vector.shape_cast %327 : vector<8x128xf32> to vector<1x8x128xf32>
    tpu.vector_store %arg6[%328, %c0_72, %c0_73], %331 {strides = array<i32>} : memref<8x8x128xf32, #tpu.memory_space<vmem>>, vector<1x8x128xf32>,
    %c5_i32 = arith.constant 5 : i32
    %332 = arith.index_cast %c5_i32 : i32 to index
    %c0_74 = arith.constant 0 : index
    %c0_75 = arith.constant 0 : index
    %333 = vector.load %arg2[%332, %c0_74, %c0_75] : memref<8x8x512xf32, #tpu.memory_space<vmem>>, vector<1x8x512xf32>
    %334 = vector.shape_cast %333 : vector<1x8x512xf32> to vector<8x512xf32>
    %335 = arith.truncf %298 : vector<8x128xf32> to vector<8x128xbf16>
    %cst_76 = arith.constant dense<0.000000e+00> : vector<8x512xf32>
    %336 = tpu.matmul %335, %3, %cst_76 {dimension_numbers = #tpu.dot_dimension_numbers<[1], [0], [0], [1], [0, 0, 1, 1], [], []>} : vector<8x128xbf16>, vector<128x512xbf16>, vector<8x512xf32> -> vector<8x512xf32>
    %337 = arith.addf %334, %336 : vector<8x512xf32>
    %338 = vector.extract_strided_slice %337 {offsets = [0, 0], sizes = [8, 128], strides = [1, 1]} : vector<8x512xf32> to vector<8x128xf32>
    %339 = arith.negf %338 : vector<8x128xf32>
    %340 = math.exp %339 : vector<8x128xf32>
    %cst_77 = arith.constant 1.000000e+00 : f32
    %341 = vector.broadcast %cst_77 : f32 to vector<8x128xf32>
    %342 = arith.addf %341, %340 : vector<8x128xf32>
    %343 = arith.divf %341, %342 : vector<8x128xf32>
    %344 = vector.extract_strided_slice %337 {offsets = [0, 128], sizes = [8, 128], strides = [1, 1]} : vector<8x512xf32> to vector<8x128xf32>
    %345 = arith.negf %344 : vector<8x128xf32>
    %346 = math.exp %345 : vector<8x128xf32>
    %cst_78 = arith.constant 1.000000e+00 : f32
    %347 = vector.broadcast %cst_78 : f32 to vector<8x128xf32>
    %348 = arith.addf %347, %346 : vector<8x128xf32>
    %349 = arith.divf %347, %348 : vector<8x128xf32>
    %350 = vector.extract_strided_slice %337 {offsets = [0, 256], sizes = [8, 128], strides = [1, 1]} : vector<8x512xf32> to vector<8x128xf32>
    %351 = math.tanh %350 : vector<8x128xf32>
    %352 = vector.extract_strided_slice %337 {offsets = [0, 384], sizes = [8, 128], strides = [1, 1]} : vector<8x512xf32> to vector<8x128xf32>
    %353 = arith.negf %352 : vector<8x128xf32>
    %354 = math.exp %353 : vector<8x128xf32>
    %cst_79 = arith.constant 1.000000e+00 : f32
    %355 = vector.broadcast %cst_79 : f32 to vector<8x128xf32>
    %356 = arith.addf %355, %354 : vector<8x128xf32>
    %357 = arith.divf %355, %356 : vector<8x128xf32>
    %358 = arith.mulf %349, %296 : vector<8x128xf32>
    %359 = arith.mulf %343, %351 : vector<8x128xf32>
    %360 = arith.addf %358, %359 : vector<8x128xf32>
    %361 = math.tanh %360 : vector<8x128xf32>
    %362 = arith.mulf %357, %361 : vector<8x128xf32>
    %363 = tpu.concatenate %362, %327 in 1 : vector<8x128xf32>, vector<8x128xf32> -> vector<8x256xf32>
    %364 = arith.truncf %363 : vector<8x256xf32> to vector<8x256xbf16>
    %cst_80 = arith.constant dense<0.000000e+00> : vector<8x512xf32>
    %365 = tpu.matmul %364, %4, %cst_80 {dimension_numbers = #tpu.dot_dimension_numbers<[1], [0], [0], [1], [0, 0, 1, 1], [], []>} : vector<8x256xbf16>, vector<256x512xbf16>, vector<8x512xf32> -> vector<8x512xf32>
    %366 = arith.addf %365, %7 : vector<8x512xf32>
    %367 = vector.extract_strided_slice %366 {offsets = [0, 0], sizes = [8, 128], strides = [1, 1]} : vector<8x512xf32> to vector<8x128xf32>
    %368 = arith.negf %367 : vector<8x128xf32>
    %369 = math.exp %368 : vector<8x128xf32>
    %cst_81 = arith.constant 1.000000e+00 : f32
    %370 = vector.broadcast %cst_81 : f32 to vector<8x128xf32>
    %371 = arith.addf %370, %369 : vector<8x128xf32>
    %372 = arith.divf %370, %371 : vector<8x128xf32>
    %373 = vector.extract_strided_slice %366 {offsets = [0, 128], sizes = [8, 128], strides = [1, 1]} : vector<8x512xf32> to vector<8x128xf32>
    %374 = arith.negf %373 : vector<8x128xf32>
    %375 = math.exp %374 : vector<8x128xf32>
    %cst_82 = arith.constant 1.000000e+00 : f32
    %376 = vector.broadcast %cst_82 : f32 to vector<8x128xf32>
    %377 = arith.addf %376, %375 : vector<8x128xf32>
    %378 = arith.divf %376, %377 : vector<8x128xf32>
    %379 = vector.extract_strided_slice %366 {offsets = [0, 256], sizes = [8, 128], strides = [1, 1]} : vector<8x512xf32> to vector<8x128xf32>
    %380 = math.tanh %379 : vector<8x128xf32>
    %381 = vector.extract_strided_slice %366 {offsets = [0, 384], sizes = [8, 128], strides = [1, 1]} : vector<8x512xf32> to vector<8x128xf32>
    %382 = arith.negf %381 : vector<8x128xf32>
    %383 = math.exp %382 : vector<8x128xf32>
    %cst_83 = arith.constant 1.000000e+00 : f32
    %384 = vector.broadcast %cst_83 : f32 to vector<8x128xf32>
    %385 = arith.addf %384, %383 : vector<8x128xf32>
    %386 = arith.divf %384, %385 : vector<8x128xf32>
    %387 = arith.mulf %378, %325 : vector<8x128xf32>
    %388 = arith.mulf %372, %380 : vector<8x128xf32>
    %389 = arith.addf %387, %388 : vector<8x128xf32>
    %390 = math.tanh %389 : vector<8x128xf32>
    %391 = arith.mulf %386, %390 : vector<8x128xf32>
    %392 = arith.index_cast %c5_i32 : i32 to index
    %c0_84 = arith.constant 0 : index
    %c0_85 = arith.constant 0 : index
    %393 = vector.load %arg6[%392, %c0_84, %c0_85] : memref<8x8x128xf32, #tpu.memory_space<vmem>>, vector<1x8x128xf32>
    %394 = vector.shape_cast %393 : vector<1x8x128xf32> to vector<8x128xf32>
    %395 = vector.shape_cast %391 : vector<8x128xf32> to vector<1x8x128xf32>
    tpu.vector_store %arg6[%392, %c0_84, %c0_85], %395 {strides = array<i32>} : memref<8x8x128xf32, #tpu.memory_space<vmem>>, vector<1x8x128xf32>,
    %c6_i32 = arith.constant 6 : i32
    %396 = arith.index_cast %c6_i32 : i32 to index
    %c0_86 = arith.constant 0 : index
    %c0_87 = arith.constant 0 : index
    %397 = vector.load %arg2[%396, %c0_86, %c0_87] : memref<8x8x512xf32, #tpu.memory_space<vmem>>, vector<1x8x512xf32>
    %398 = vector.shape_cast %397 : vector<1x8x512xf32> to vector<8x512xf32>
    %399 = arith.truncf %362 : vector<8x128xf32> to vector<8x128xbf16>
    %cst_88 = arith.constant dense<0.000000e+00> : vector<8x512xf32>
    %400 = tpu.matmul %399, %3, %cst_88 {dimension_numbers = #tpu.dot_dimension_numbers<[1], [0], [0], [1], [0, 0, 1, 1], [], []>} : vector<8x128xbf16>, vector<128x512xbf16>, vector<8x512xf32> -> vector<8x512xf32>
    %401 = arith.addf %398, %400 : vector<8x512xf32>
    %402 = vector.extract_strided_slice %401 {offsets = [0, 0], sizes = [8, 128], strides = [1, 1]} : vector<8x512xf32> to vector<8x128xf32>
    %403 = arith.negf %402 : vector<8x128xf32>
    %404 = math.exp %403 : vector<8x128xf32>
    %cst_89 = arith.constant 1.000000e+00 : f32
    %405 = vector.broadcast %cst_89 : f32 to vector<8x128xf32>
    %406 = arith.addf %405, %404 : vector<8x128xf32>
    %407 = arith.divf %405, %406 : vector<8x128xf32>
    %408 = vector.extract_strided_slice %401 {offsets = [0, 128], sizes = [8, 128], strides = [1, 1]} : vector<8x512xf32> to vector<8x128xf32>
    %409 = arith.negf %408 : vector<8x128xf32>
    %410 = math.exp %409 : vector<8x128xf32>
    %cst_90 = arith.constant 1.000000e+00 : f32
    %411 = vector.broadcast %cst_90 : f32 to vector<8x128xf32>
    %412 = arith.addf %411, %410 : vector<8x128xf32>
    %413 = arith.divf %411, %412 : vector<8x128xf32>
    %414 = vector.extract_strided_slice %401 {offsets = [0, 256], sizes = [8, 128], strides = [1, 1]} : vector<8x512xf32> to vector<8x128xf32>
    %415 = math.tanh %414 : vector<8x128xf32>
    %416 = vector.extract_strided_slice %401 {offsets = [0, 384], sizes = [8, 128], strides = [1, 1]} : vector<8x512xf32> to vector<8x128xf32>
    %417 = arith.negf %416 : vector<8x128xf32>
    %418 = math.exp %417 : vector<8x128xf32>
    %cst_91 = arith.constant 1.000000e+00 : f32
    %419 = vector.broadcast %cst_91 : f32 to vector<8x128xf32>
    %420 = arith.addf %419, %418 : vector<8x128xf32>
    %421 = arith.divf %419, %420 : vector<8x128xf32>
    %422 = arith.mulf %413, %360 : vector<8x128xf32>
    %423 = arith.mulf %407, %415 : vector<8x128xf32>
    %424 = arith.addf %422, %423 : vector<8x128xf32>
    %425 = math.tanh %424 : vector<8x128xf32>
    %426 = arith.mulf %421, %425 : vector<8x128xf32>
    %427 = tpu.concatenate %426, %391 in 1 : vector<8x128xf32>, vector<8x128xf32> -> vector<8x256xf32>
    %428 = arith.truncf %427 : vector<8x256xf32> to vector<8x256xbf16>
    %cst_92 = arith.constant dense<0.000000e+00> : vector<8x512xf32>
    %429 = tpu.matmul %428, %4, %cst_92 {dimension_numbers = #tpu.dot_dimension_numbers<[1], [0], [0], [1], [0, 0, 1, 1], [], []>} : vector<8x256xbf16>, vector<256x512xbf16>, vector<8x512xf32> -> vector<8x512xf32>
    %430 = arith.addf %429, %7 : vector<8x512xf32>
    %431 = vector.extract_strided_slice %430 {offsets = [0, 0], sizes = [8, 128], strides = [1, 1]} : vector<8x512xf32> to vector<8x128xf32>
    %432 = arith.negf %431 : vector<8x128xf32>
    %433 = math.exp %432 : vector<8x128xf32>
    %cst_93 = arith.constant 1.000000e+00 : f32
    %434 = vector.broadcast %cst_93 : f32 to vector<8x128xf32>
    %435 = arith.addf %434, %433 : vector<8x128xf32>
    %436 = arith.divf %434, %435 : vector<8x128xf32>
    %437 = vector.extract_strided_slice %430 {offsets = [0, 128], sizes = [8, 128], strides = [1, 1]} : vector<8x512xf32> to vector<8x128xf32>
    %438 = arith.negf %437 : vector<8x128xf32>
    %439 = math.exp %438 : vector<8x128xf32>
    %cst_94 = arith.constant 1.000000e+00 : f32
    %440 = vector.broadcast %cst_94 : f32 to vector<8x128xf32>
    %441 = arith.addf %440, %439 : vector<8x128xf32>
    %442 = arith.divf %440, %441 : vector<8x128xf32>
    %443 = vector.extract_strided_slice %430 {offsets = [0, 256], sizes = [8, 128], strides = [1, 1]} : vector<8x512xf32> to vector<8x128xf32>
    %444 = math.tanh %443 : vector<8x128xf32>
    %445 = vector.extract_strided_slice %430 {offsets = [0, 384], sizes = [8, 128], strides = [1, 1]} : vector<8x512xf32> to vector<8x128xf32>
    %446 = arith.negf %445 : vector<8x128xf32>
    %447 = math.exp %446 : vector<8x128xf32>
    %cst_95 = arith.constant 1.000000e+00 : f32
    %448 = vector.broadcast %cst_95 : f32 to vector<8x128xf32>
    %449 = arith.addf %448, %447 : vector<8x128xf32>
    %450 = arith.divf %448, %449 : vector<8x128xf32>
    %451 = arith.mulf %442, %389 : vector<8x128xf32>
    %452 = arith.mulf %436, %444 : vector<8x128xf32>
    %453 = arith.addf %451, %452 : vector<8x128xf32>
    %454 = math.tanh %453 : vector<8x128xf32>
    %455 = arith.mulf %450, %454 : vector<8x128xf32>
    %456 = arith.index_cast %c6_i32 : i32 to index
    %c0_96 = arith.constant 0 : index
    %c0_97 = arith.constant 0 : index
    %457 = vector.load %arg6[%456, %c0_96, %c0_97] : memref<8x8x128xf32, #tpu.memory_space<vmem>>, vector<1x8x128xf32>
    %458 = vector.shape_cast %457 : vector<1x8x128xf32> to vector<8x128xf32>
    %459 = vector.shape_cast %455 : vector<8x128xf32> to vector<1x8x128xf32>
    tpu.vector_store %arg6[%456, %c0_96, %c0_97], %459 {strides = array<i32>} : memref<8x8x128xf32, #tpu.memory_space<vmem>>, vector<1x8x128xf32>,
    %c7_i32 = arith.constant 7 : i32
    %460 = arith.index_cast %c7_i32 : i32 to index
    %c0_98 = arith.constant 0 : index
    %c0_99 = arith.constant 0 : index
    %461 = vector.load %arg2[%460, %c0_98, %c0_99] : memref<8x8x512xf32, #tpu.memory_space<vmem>>, vector<1x8x512xf32>
    %462 = vector.shape_cast %461 : vector<1x8x512xf32> to vector<8x512xf32>
    %463 = arith.truncf %426 : vector<8x128xf32> to vector<8x128xbf16>
    %cst_100 = arith.constant dense<0.000000e+00> : vector<8x512xf32>
    %464 = tpu.matmul %463, %3, %cst_100 {dimension_numbers = #tpu.dot_dimension_numbers<[1], [0], [0], [1], [0, 0, 1, 1], [], []>} : vector<8x128xbf16>, vector<128x512xbf16>, vector<8x512xf32> -> vector<8x512xf32>
    %465 = arith.addf %462, %464 : vector<8x512xf32>
    %466 = vector.extract_strided_slice %465 {offsets = [0, 0], sizes = [8, 128], strides = [1, 1]} : vector<8x512xf32> to vector<8x128xf32>
    %467 = arith.negf %466 : vector<8x128xf32>
    %468 = math.exp %467 : vector<8x128xf32>
    %cst_101 = arith.constant 1.000000e+00 : f32
    %469 = vector.broadcast %cst_101 : f32 to vector<8x128xf32>
    %470 = arith.addf %469, %468 : vector<8x128xf32>
    %471 = arith.divf %469, %470 : vector<8x128xf32>
    %472 = vector.extract_strided_slice %465 {offsets = [0, 128], sizes = [8, 128], strides = [1, 1]} : vector<8x512xf32> to vector<8x128xf32>
    %473 = arith.negf %472 : vector<8x128xf32>
    %474 = math.exp %473 : vector<8x128xf32>
    %cst_102 = arith.constant 1.000000e+00 : f32
    %475 = vector.broadcast %cst_102 : f32 to vector<8x128xf32>
    %476 = arith.addf %475, %474 : vector<8x128xf32>
    %477 = arith.divf %475, %476 : vector<8x128xf32>
    %478 = vector.extract_strided_slice %465 {offsets = [0, 256], sizes = [8, 128], strides = [1, 1]} : vector<8x512xf32> to vector<8x128xf32>
    %479 = math.tanh %478 : vector<8x128xf32>
    %480 = vector.extract_strided_slice %465 {offsets = [0, 384], sizes = [8, 128], strides = [1, 1]} : vector<8x512xf32> to vector<8x128xf32>
    %481 = arith.negf %480 : vector<8x128xf32>
    %482 = math.exp %481 : vector<8x128xf32>
    %cst_103 = arith.constant 1.000000e+00 : f32
    %483 = vector.broadcast %cst_103 : f32 to vector<8x128xf32>
    %484 = arith.addf %483, %482 : vector<8x128xf32>
    %485 = arith.divf %483, %484 : vector<8x128xf32>
    %486 = arith.mulf %477, %424 : vector<8x128xf32>
    %487 = arith.mulf %471, %479 : vector<8x128xf32>
    %488 = arith.addf %486, %487 : vector<8x128xf32>
    %489 = math.tanh %488 : vector<8x128xf32>
    %490 = arith.mulf %485, %489 : vector<8x128xf32>
    %491 = tpu.concatenate %490, %455 in 1 : vector<8x128xf32>, vector<8x128xf32> -> vector<8x256xf32>
    %492 = arith.truncf %491 : vector<8x256xf32> to vector<8x256xbf16>
    %cst_104 = arith.constant dense<0.000000e+00> : vector<8x512xf32>
    %493 = tpu.matmul %492, %4, %cst_104 {dimension_numbers = #tpu.dot_dimension_numbers<[1], [0], [0], [1], [0, 0, 1, 1], [], []>} : vector<8x256xbf16>, vector<256x512xbf16>, vector<8x512xf32> -> vector<8x512xf32>
    %494 = arith.addf %493, %7 : vector<8x512xf32>
    %495 = vector.extract_strided_slice %494 {offsets = [0, 0], sizes = [8, 128], strides = [1, 1]} : vector<8x512xf32> to vector<8x128xf32>
    %496 = arith.negf %495 : vector<8x128xf32>
    %497 = math.exp %496 : vector<8x128xf32>
    %cst_105 = arith.constant 1.000000e+00 : f32
    %498 = vector.broadcast %cst_105 : f32 to vector<8x128xf32>
    %499 = arith.addf %498, %497 : vector<8x128xf32>
    %500 = arith.divf %498, %499 : vector<8x128xf32>
    %501 = vector.extract_strided_slice %494 {offsets = [0, 128], sizes = [8, 128], strides = [1, 1]} : vector<8x512xf32> to vector<8x128xf32>
    %502 = arith.negf %501 : vector<8x128xf32>
    %503 = math.exp %502 : vector<8x128xf32>
    %cst_106 = arith.constant 1.000000e+00 : f32
    %504 = vector.broadcast %cst_106 : f32 to vector<8x128xf32>
    %505 = arith.addf %504, %503 : vector<8x128xf32>
    %506 = arith.divf %504, %505 : vector<8x128xf32>
    %507 = vector.extract_strided_slice %494 {offsets = [0, 256], sizes = [8, 128], strides = [1, 1]} : vector<8x512xf32> to vector<8x128xf32>
    %508 = math.tanh %507 : vector<8x128xf32>
    %509 = vector.extract_strided_slice %494 {offsets = [0, 384], sizes = [8, 128], strides = [1, 1]} : vector<8x512xf32> to vector<8x128xf32>
    %510 = arith.negf %509 : vector<8x128xf32>
    %511 = math.exp %510 : vector<8x128xf32>
    %cst_107 = arith.constant 1.000000e+00 : f32
    %512 = vector.broadcast %cst_107 : f32 to vector<8x128xf32>
    %513 = arith.addf %512, %511 : vector<8x128xf32>
    %514 = arith.divf %512, %513 : vector<8x128xf32>
    %515 = arith.mulf %506, %453 : vector<8x128xf32>
    %516 = arith.mulf %500, %508 : vector<8x128xf32>
    %517 = arith.addf %515, %516 : vector<8x128xf32>
    %518 = math.tanh %517 : vector<8x128xf32>
    %519 = arith.mulf %514, %518 : vector<8x128xf32>
    %520 = arith.index_cast %c7_i32 : i32 to index
    %c0_108 = arith.constant 0 : index
    %c0_109 = arith.constant 0 : index
    %521 = vector.load %arg6[%520, %c0_108, %c0_109] : memref<8x8x128xf32, #tpu.memory_space<vmem>>, vector<1x8x128xf32>
    %522 = vector.shape_cast %521 : vector<1x8x128xf32> to vector<8x128xf32>
    %523 = vector.shape_cast %519 : vector<8x128xf32> to vector<1x8x128xf32>
    tpu.vector_store %arg6[%520, %c0_108, %c0_109], %523 {strides = array<i32>} : memref<8x8x128xf32, #tpu.memory_space<vmem>>, vector<1x8x128xf32>,
    %c8_i32 = arith.constant 8 : i32
    %c0_110 = arith.constant 0 : index
    %c0_111 = arith.constant 0 : index
    %524 = vector.load %arg10[%c0_110, %c0_111] : memref<8x128xf32, #tpu.memory_space<vmem>>, vector<8x128xf32>
    tpu.vector_store %arg10[%c0_110, %c0_111], %490 {strides = array<i32>} : memref<8x128xf32, #tpu.memory_space<vmem>>, vector<8x128xf32>,
    %c0_112 = arith.constant 0 : index
    %c0_113 = arith.constant 0 : index
    %525 = vector.load %arg11[%c0_112, %c0_113] : memref<8x128xf32, #tpu.memory_space<vmem>>, vector<8x128xf32>
    tpu.vector_store %arg11[%c0_112, %c0_113], %488 {strides = array<i32>} : memref<8x128xf32, #tpu.memory_space<vmem>>, vector<8x128xf32>,
    %c0_114 = arith.constant 0 : index
    %c0_115 = arith.constant 0 : index
    %526 = vector.load %arg12[%c0_114, %c0_115] : memref<8x128xf32, #tpu.memory_space<vmem>>, vector<8x128xf32>
    tpu.vector_store %arg12[%c0_114, %c0_115], %519 {strides = array<i32>} : memref<8x128xf32, #tpu.memory_space<vmem>>, vector<8x128xf32>,
    %c0_116 = arith.constant 0 : index
    %c0_117 = arith.constant 0 : index
    %527 = vector.load %arg13[%c0_116, %c0_117] : memref<8x128xf32, #tpu.memory_space<vmem>>, vector<8x128xf32>
    tpu.vector_store %arg13[%c0_116, %c0_117], %517 {strides = array<i32>} : memref<8x128xf32, #tpu.memory_space<vmem>>, vector<8x128xf32>,
    return
  }
  func.func @transform_0(%arg0: i32, %arg1: i32) -> (i32, i32, i32) {
    %c0_i32 = arith.constant 0 : i32
    %c0_i32_0 = arith.constant 0 : i32
    return %arg1, %arg0, %c0_i32 : i32, i32, i32
  }
  func.func @transform_4(%arg0: i32, %arg1: i32) -> (i32, i32, i32) {
    %c0_i32 = arith.constant 0 : i32
    %c0_i32_0 = arith.constant 0 : i32
    return %arg1, %arg0, %c0_i32 : i32, i32, i32
  }
}

</mosaic_0001>

<bundles_post_ra>
// kernel: tpu_custom_call.1
= control target key start
LH: loop header
LB: loop body
LE: loop exit
PB: predicated region body
PF: predicated region fallthrough
CT: control target
= control target key end

     0   :  { %9 = vsyncpa [#allocation11], 0  ;;  %s6051_s0 = inlined_call_operand.hbm [shape: f32[16,16,512], index: 0, kind: input, shape index: {}]   ;;  %s6052_s1 = inlined_call_operand.hbm [shape: bf16[128,512], index: 1, kind: input, shape index: {}]   ;;  %s6053_s2 = inlined_call_operand.hbm [shape: bf16[256,512], index: 2, kind: input, shape index: {}]   ;;  %s6054_s3 = inlined_call_operand.hbm [shape: f32[1,512], index: 3, kind: input, shape index: {}]   ;;  %s6055_s4 = inlined_call_operand.hbm [shape: f32[16,16,128], index: 4, kind: output, shape index: {}]  }
   0x1   :  { %11 = vsyncpa [#allocation11 + $0x1], 0 }
   0x2   :  { %12 = vsyncpa [#allocation12], 0 }
   0x3   :  { %14 = vsyncpa [#allocation12 + $0x1], 0  ;;  %s4475_s15 = smov 0   ;;  %s4477_s16 = smov 0  }
   0x4   :  { %s4479_s17 = smov 0   ;;  %s4481_s18 = smov 0  }
   0x5   :  { %s4483_s19 = smov 0   ;;  %s4485_s20 = smov 0  }
   0x6   :  { %s4487_s21 = smov 0   ;;  %s4489_s22 = smov 0  }
   0x7 LB: > { %6259 = sst [smem:[#allocation27_spill]] %s4418_s17  ;;  %s3301_s23 = sadd.s32 4294967295, %s4438_s22   ;;  %s4438_s22 = sphi %s4489_s22, %s20_s22   ;;  %s4434_s21 = sphi %s4487_s21, %s6806_s21   ;;  %s4430_s20 = sphi %s4485_s20, %s6810_s20   ;;  %s4426_s19 = sphi %s4483_s19, %s6804_s19   ;;  %s4422_s18 = sphi %s4481_s18, %s6809_s18   ;;  %s4418_s17 = sphi %s4479_s17, %s6803_s17   ;;  %s4414_s16 = sphi %s4477_s16, %s6808_s16   ;;  %s4410_s15 = sphi %s4475_s15, %s6807_s15  }
   0x8   : > { %6260 = sst [smem:[#allocation28_spill]] %s4434_s21  ;;  %s3302_s24 = sadd.s32 4294967294, %s4438_s22  }
   0x9   : > { %s29_s25 = sadd.s32 1, %s4430_s20  ;;  %s32_s26 = sadd.s32 1, %s4434_s21 }
   0xa   : > { %p30_p0 = scmp.ge.s32.totalorder %s29_s25, 2  ;;  %s41_s27 = sadd.s32 1, %s4418_s17 }
   0xb   : > { %p48_p1 = scmp.ne.s32.totalorder %s4418_s17, %s4414_s16  ;;  %p49_p2 = scmp.eq.s32.totalorder %s4438_s22, 0 }
   0xc   : > { %s6812_s25 = smov (%p30_p0, %s29_s25), 0  ;;  %s6814_s26 = smov (!%p30_p0, %s32_s26), %s4434_s21 }
   0xd   : > { %6261 = sst [smem:[#allocation29_spill]] %s6812_s25  ;;  %s36_s28 = ssub.s32 %s4430_s20, %s6812_s25 }
   0xe   : > { %p4528_p3 = por %p49_p2, %p48_p1  ;;  %p34_p4 = scmp.ge.s32.totalorder %s6814_s26, 2 }
   0xf   : > { %p54_p5 = scmp.ne.s32.totalorder %s4414_s16, %s4410_s15  ;;  %p55_p6 = scmp.eq.s32.totalorder %s3301_s23, 0 }
  0x10   : > { %p80_p7 = scmp.eq.s32.totalorder %s3301_s23, 3  ;;  %s6816_s26 = smov (%p34_p4, %s6814_s26), 0 }
  0x11   : > { %6263 = sst [smem:[#allocation30_spill]] %s6816_s26  ;;  %p4536_p8 = por %p55_p6, %p54_p5 }
  0x12   : > { %p4540_p9 = por %p80_p7, %p48_p1  ;;  %s37_s6 = ssub.s32 %s4434_s21, %s6816_s26 }
  0x13   : > { %p86_p10 = scmp.eq.s32.totalorder %s3302_s24, 3  ;;  %s38_s7 = sor.u32 %s37_s6, %s36_s28 }
  0x14   : > { %p39_p11 = scmp.eq.s32.totalorder %s38_s7, 0  ;;  %p3900_p13 = scmp.lt.s32.totalorder %s4438_s22, 4 }
  0x15   : > { %p4546_p12 = por %p86_p10, %p54_p5  ;;  %s106_s9 = sand.u32 1, %s4418_s17  }
  0x16   : > { %s4553_s10 = scalar_select %p39_p11, %s4418_s17, %s41_s27  }
  0x17   : > { %s3305_s11 = sshll.u32 %s106_s9, 8  ;;  %s3307_s12 = sshll.u32 %s4434_s21, 2 }
  0x18   : > { %6267 = sst [smem:[#allocation31_spill]] %s4553_s10  ;;  %s3790_s13 = sshll.u32 %s4430_s20, 6 }
  0x19   : > { %s110_s14 = scalar_lea.vmem [#allocation10], %s3305_s11  ;;  %s116_s26 = sadd.s32 %s3790_s13, %s3307_s12 }
  0x1a   : > { %s121_s23 = sshll.u32 %s110_s14, 4  ;;  %s3309_s24 = sshll.u32 %s116_s26, 3  ;;  %s122_s23 = int_to_ptr.vmem [resolvable:$true] %s121_s23 }
  0x1b   : > { %p3893_p0 = pnand %p3900_p13, %p4528_p3  ;;  %s118_s7 = scalar_lea.hbm %s6051_s0, %s3309_s24 }
  0x1c   : > { %s119_s25 = sshll.u32 %s118_s7, 4  ;;  %p3310_p1 = scmp.ge.s32.totalorder %s4438_s22, 1  ;;  %s120_s25 = int_to_ptr.hbm [resolvable:$true] %s119_s25 }
  0x1d   : > { %s107_s27 = scalar_lea.sflag [#allocation11], %s106_s9  ;;  %s4440_s10 = smov 1024  }
  0x1e   : > { %s4441_s17 = smov 512   ;;  %s4442_s21 = smov 32  }
  0x1f   : > { %3895 = dma.hbm_to_vmem [thread:$0]  (!%p3893_p0), %s120_s25, 4096, %s122_s23, %s107_s27, %s4440_s10, %s4441_s17, %s4442_s21  }
  0x20   : > { %p129_p2 = scmp.lt.s32.totalorder %s4438_s22, 5 }
  0x22   : > { %p130_p4 = pnand %p3310_p1, %p129_p2 }
  0x24   : > { %133 = sbr.rel (%p130_p4) target bundleno = 1881 (0x759), region = 24 }
  0x29   : > { %s4565_s26 = sand.u32 1, %s4414_s16  }
  0x2a   : > { %s3311_s29 = sshll.u32 %s4565_s26, 8  ;;  %s136_s11 = scalar_lea.sflag [#allocation11], %s4565_s26 }
  0x2b   : > { %s4569_s12 = scalar_lea.vmem [#allocation10], %s3311_s29 }
  0x2c   : > { %4395 = dma.done.wait (%p4536_p8), %s136_s11, 4096  }
  0x2d   : > { %4397 = vsyncadd (%p4536_p8), %s136_s11, 4294963200  ;;  %s3312_s17 = sshll.u32 %s4565_s26, 6  ;;  %p3313_p3 = scmp.ne.s32.totalorder %s4422_s18, 0 }
  0x2e   : > { %s4576_s21 = scalar_lea.vmem [#allocation13], %s3312_s17  ;;  %s172_s10 = sshll.u32 (!%p3313_p3), %s6052_s1, 4  ;;  %s173_s10 = int_to_ptr.hbm [resolvable:$true] %s172_s10 }
  0x2f   : > { %164 = sbr.rel (%p3313_p3) target bundleno = 65 (0x41), region = 32  ;;  %s4443_s13 = smov (!%p3313_p3), [#allocation2]  }
  0x30   : > { %s174_s14 = sshll.u32 (!%p3313_p3), %s4443_s13, 4  ;;  %s186_s30 = sshll.u32 (!%p3313_p3), %s6053_s2, 4  ;;  %s175_s14 = int_to_ptr.vmem [resolvable:$true] %s174_s14  ;;  %s187_s30 = int_to_ptr.hbm [resolvable:$true] %s186_s30 }
  0x31   : > { %177 = dma.hbm_to_vmem [thread:$0]  (!%p3313_p3), %s173_s10, 4096, %s175_s14, [#allocation9] }
  0x32   : > { %s4444_s28 = smov (!%p3313_p3), [#allocation3]   ;;  %s200_s29 = sshll.u32 (!%p3313_p3), %s6054_s3, 4  ;;  %s201_s29 = int_to_ptr.hbm [resolvable:$true] %s200_s29 }
  0x33   : > { %s188_s6 = sshll.u32 (!%p3313_p3), %s4444_s28, 4  ;;  %s4445_s11 = smov (!%p3313_p3), [#allocation4]   ;;  %s189_s6 = int_to_ptr.vmem [resolvable:$true] %s188_s6 }
  0x34   : > { %191 = dma.hbm_to_vmem [thread:$0]  %s187_s30, 8192, %s189_s6, [#allocation9 + $0x1] }
  0x35   : > { %s202_s17 = sshll.u32 %s4445_s11, 4  ;;  %s203_s17 = int_to_ptr.vmem [resolvable:$true] %s202_s17 }
  0x36   : > { %205 = dma.hbm_to_vmem [thread:$0]  %s201_s29, 64, %s203_s17, [#allocation9 + $0x2] }
  0x37   : > { %4398 = dma.done.wait [#allocation9], 4096 }
  0x38   : > { %4399 = vsyncadd [#allocation9], 4294963200 }
  0x39   : > { %4400 = dma.done.wait [#allocation9 + $0x1], 8192 }
  0x3a   : > { %4401 = vsyncadd [#allocation9 + $0x1], 4294959104 }
  0x3b   : > { %4402 = dma.done.wait [#allocation9 + $0x2], 64 }
  0x3c   : > { %4403 = vsyncadd [#allocation9 + $0x2], 4294967232  ;;  %v4446_v0 = vmov 0.0  }
  0x3d   : > { %217 = vst [vmem:[#allocation5] sm:$0xff] %v4446_v0 }
  0x3e   : > { %218 = vst [vmem:[#allocation6] sm:$0xff] %v4446_v0 }
  0x3f   : > { %219 = vst [vmem:[#allocation7] sm:$0xff] %v4446_v0 }
  0x40   : > { %220 = vst [vmem:[#allocation8] sm:$0xff] %v4446_v0 }
  0x41 PF: > { %v3428_v1 = vld [vmem:[#allocation2 + $0xe0] sm:$0xf]  ;;  %v3821_v2 = vld [vmem:[#allocation2 + $0xec] sm:$0xf0]  ;;  %v3819_v3 = vld [vmem:[#allocation2 + $0xe4] sm:$0xf] }
  0x42   : > { %v4588_v4 = vor.u32 %v3821_v2, %v3428_v1  ;;  %v3430_v5 = vld [vmem:[#allocation2 + $0xf0] sm:$0xf0]  ;;  %v3820_v6 = vld [vmem:[#allocation2 + $0xec] sm:$0xf]  ;;  %v3438_v7 = vld [vmem:[#allocation2 + $0xf8] sm:$0xf0] }
  0x43   : > { %v4590_v8 = vor.u32 %v3819_v3, %v3430_v5  ;;  %v4592_v9 = vor.u32 %v3820_v6, %v3438_v7  ;;  %v3412_v10 = vld [vmem:[#allocation2 + $0xc0] sm:$0xf]  ;;  %v3817_v11 = vld [vmem:[#allocation2 + $0xcc] sm:$0xf0]  ;;  %v3815_v12 = vld [vmem:[#allocation2 + $0xc4] sm:$0xf] }
  0x44   : > { %496 = vmatpush.bf16.msra.mxu0 %v4588_v4  ;;  %v4595_v13 = vor.u32 %v3817_v11, %v3412_v10  ;;  %v3414_v14 = vld [vmem:[#allocation2 + $0xd0] sm:$0xf0]  ;;  %v3816_v15 = vld [vmem:[#allocation2 + $0xcc] sm:$0xf]  ;;  %v3422_v16 = vld [vmem:[#allocation2 + $0xd8] sm:$0xf0] }
  0x45   : > { %6268 = vst [vmem:[#allocation32_spill] sm:$0xff] %v4590_v8  ;;  %509 = vmatpush.bf16.msra.mxu1 %v4590_v8  ;;  %535 = vmatpush.bf16.msra.mxu3 %v4592_v9  ;;  %v4599_v17 = vor.u32 %v3815_v12, %v3414_v14  ;;  %v4601_v18 = vor.u32 %v3816_v15, %v3422_v16  ;;  %v3436_v19 = vld [vmem:[#allocation2 + $0xe8] sm:$0xf]  ;;  %v3822_v20 = vld [vmem:[#allocation2 + $0xf4] sm:$0xf0]  ;;  %s3189_s23 = sshll.u32 %s4576_s21, 4  ;;  %s3190_s23 = int_to_ptr.vmem [resolvable:$true] %s3189_s23 }
  0x46   : > { %6269 = vst [vmem:[#allocation33_spill] sm:$0xff] %v4592_v9  ;;  %v3396_v21 = vld [vmem:[#allocation2 + $0xa0] sm:$0xf]  ;;  %v4603_v22 = vor.u32 %v3822_v20, %v3436_v19  ;;  %v3813_v23 = vld [vmem:[#allocation2 + $0xac] sm:$0xf0]  ;;  %s4354_s7 = scalar_lea.hbm %s6055_s4, 256 }
  0x47   : > { %6270 = vst [vmem:[#allocation34_spill] sm:$0xff] %v4599_v17  ;;  %v3811_v24 = vld [vmem:[#allocation2 + $0xa4] sm:$0xf]  ;;  %v3398_v25 = vld [vmem:[#allocation2 + $0xb0] sm:$0xf0]  ;;  %v4607_v29 = vor.u32 %v3813_v23, %v3396_v21 }
  0x48   : > { %6271 = vst [vmem:[#allocation35_spill] sm:$0xff] %v4601_v18  ;;  %v3812_v26 = vld [vmem:[#allocation2 + $0xac] sm:$0xf]  ;;  %v3406_v27 = vld [vmem:[#allocation2 + $0xb8] sm:$0xf0]  ;;  %497 = vmatpush.bf16.msra.mxu0 %v4595_v13  ;;  %522 = vmatpush.bf16.msra.mxu2 %v4603_v22  ;;  %v4611_v33 = vor.u32 %v3811_v24, %v3398_v25 }
  0x49   : > { %v3420_v28 = vld [vmem:[#allocation2 + $0xc8] sm:$0xf]  ;;  %v3818_v30 = vld [vmem:[#allocation2 + $0xd4] sm:$0xf0]  ;;  %v3380_v31 = vld [vmem:[#allocation2 + $0x80] sm:$0xf]  ;;  %510 = vmatpush.bf16.msra.mxu1 %v4599_v17  ;;  %536 = vmatpush.bf16.msra.mxu3 %v4601_v18  ;;  %v4613_v34 = vor.u32 %v3812_v26, %v3406_v27 }
  0x4a   : > { %v3809_v32 = vld [vmem:[#allocation2 + $0x8c] sm:$0xf0]  ;;  %6272 = vst [vmem:[#allocation36_spill] sm:$0xff] %v4611_v33  ;;  %v4615_v35 = vor.u32 %v3818_v30, %v3420_v28  ;;  %v3807_v36 = vld [vmem:[#allocation2 + $0x84] sm:$0xf] }
  0x4b   : > { %6273 = vst [vmem:[#allocation37_spill] sm:$0xff] %v4613_v34  ;;  %v3382_v37 = vld [vmem:[#allocation2 + $0x90] sm:$0xf0]  ;;  %v3808_v38 = vld [vmem:[#allocation2 + $0x8c] sm:$0xf]  ;;  %v4619_v42 = vor.u32 %v3809_v32, %v3380_v31 }
  0x4c   : > { %v3390_v39 = vld [vmem:[#allocation2 + $0x98] sm:$0xf0]  ;;  %v3404_v40 = vld [vmem:[#allocation2 + $0xa8] sm:$0xf]  ;;  %v3814_v41 = vld [vmem:[#allocation2 + $0xb4] sm:$0xf0]  ;;  %498 = vmatpush.bf16.msra.mxu0 %v4607_v29  ;;  %523 = vmatpush.bf16.msra.mxu2 %v4615_v35  ;;  %v4625_v46 = vor.u32 %v3807_v36, %v3382_v37 }
  0x4d   : > { %v4621_v43 = vor.u32 %v3814_v41, %v3404_v40  ;;  %v3364_v44 = vld [vmem:[#allocation2 + $0x60] sm:$0xf]  ;;  %v3805_v45 = vld [vmem:[#allocation2 + $0x6c] sm:$0xf0]  ;;  %511 = vmatpush.bf16.msra.mxu1 %v4611_v33  ;;  %537 = vmatpush.bf16.msra.mxu3 %v4613_v34  ;;  %v4627_v47 = vor.u32 %v3808_v38, %v3390_v39  ;;  %v3803_v48 = vld [vmem:[#allocation2 + $0x64] sm:$0xf] }
  0x4e   : > { %6274 = vst [vmem:[#allocation38_spill] sm:$0xff] %v4625_v46  ;;  %v3388_v49 = vld [vmem:[#allocation2 + $0x88] sm:$0xf]  ;;  %v3810_v50 = vld [vmem:[#allocation2 + $0x94] sm:$0xf0]  ;;  %v4631_v54 = vor.u32 %v3805_v45, %v3364_v44 }
  0x4f   : > { %6275 = vst [vmem:[#allocation39_spill] sm:$0xff] %v4627_v47  ;;  %v3366_v51 = vld [vmem:[#allocation2 + $0x70] sm:$0xf0]  ;;  %v3804_v52 = vld [vmem:[#allocation2 + $0x6c] sm:$0xf]  ;;  %v4633_v55 = vor.u32 %v3810_v50, %v3388_v49  ;;  %v327_v44 = vld [vmem:[#allocation5] sm:$0xff] }
  0x50   : > { %v3374_v53 = vld [vmem:[#allocation2 + $0x78] sm:$0xf0]  ;;  %499 = vmatpush.bf16.msra.mxu0 %v4619_v42  ;;  %524 = vmatpush.bf16.msra.mxu2 %v4621_v43  ;;  %6276 = vst [vmem:[#allocation40_spill] sm:$0xff] %v4631_v54  ;;  %v3348_v56 = vld [vmem:[#allocation2 + $0x40] sm:$0xf]  ;;  %v4637_v58 = vor.u32 %v3803_v48, %v3366_v51 }
  0x51   : > { %v3801_v57 = vld [vmem:[#allocation2 + $0x4c] sm:$0xf0]  ;;  %512 = vmatpush.bf16.msra.mxu1 %v4625_v46  ;;  %538 = vmatpush.bf16.msra.mxu3 %v4627_v47  ;;  %v4639_v59 = vor.u32 %v3804_v52, %v3374_v53  ;;  %v3799_v60 = vld [vmem:[#allocation2 + $0x44] sm:$0xf]  ;;  %v3372_v61 = vld [vmem:[#allocation2 + $0x68] sm:$0xf] }
  0x52   : > { %6277 = vst [vmem:[#allocation41_spill] sm:$0xff] %v4637_v58  ;;  %v3806_v62 = vld [vmem:[#allocation2 + $0x74] sm:$0xf0]  ;;  %v3350_v63 = vld [vmem:[#allocation2 + $0x50] sm:$0xf0]  ;;  %v4643_v2 = vor.u32 %v3801_v57, %v3348_v56  ;;  %v335_v57 = vpack.c.bf16 %v327_v44, %v327_v44 }
  0x53   : > { %6278 = vst [vmem:[#allocation42_spill] sm:$0xff] %v4639_v59  ;;  %v3800_v0 = vld [vmem:[#allocation2 + $0x4c] sm:$0xf]  ;;  %v3358_v1 = vld [vmem:[#allocation2 + $0x58] sm:$0xf0]  ;;  %v4645_v3 = vor.u32 %v3806_v62, %v3372_v61  ;;  %v4649_v7 = vor.u32 %v3799_v60, %v3350_v63 }
  0x54   : > { %500 = vmatpush.bf16.msra.mxu0 %v4631_v54  ;;  %525 = vmatpush.bf16.msra.mxu2 %v4633_v55  ;;  %6279 = vst [vmem:[#allocation43_spill] sm:$0xff] %v4643_v2  ;;  %v3332_v5 = vld [vmem:[#allocation2 + $0x20] sm:$0xf]  ;;  %v3797_v6 = vld [vmem:[#allocation2 + $0x2c] sm:$0xf0]  ;;  %v4651_v10 = vor.u32 %v3800_v0, %v3358_v1 }
  0x55   : > { %6280 = vst [vmem:[#allocation44_spill] sm:$0xff] %v4645_v3  ;;  %513 = vmatpush.bf16.msra.mxu1 %v4637_v58  ;;  %539 = vmatpush.bf16.msra.mxu3 %v4639_v59  ;;  %v3795_v11 = vld [vmem:[#allocation2 + $0x24] sm:$0xf]  ;;  %v3356_v12 = vld [vmem:[#allocation2 + $0x48] sm:$0xf]  ;;  %v4655_v20 = vor.u32 %v3797_v6, %v3332_v5 }
  0x56   : > { %6281 = vst [vmem:[#allocation45_spill] sm:$0xff] %v4649_v7  ;;  %v3802_v14 = vld [vmem:[#allocation2 + $0x54] sm:$0xf0]  ;;  %v3334_v15 = vld [vmem:[#allocation2 + $0x30] sm:$0xf0] }
  0x57   : > { %6282 = vst [vmem:[#allocation46_spill] sm:$0xff] %v4651_v10  ;;  %v3796_v16 = vld [vmem:[#allocation2 + $0x2c] sm:$0xf]  ;;  %v3342_v19 = vld [vmem:[#allocation2 + $0x38] sm:$0xf0]  ;;  %v4657_v21 = vor.u32 %v3802_v14, %v3356_v12  ;;  %v4661_v26 = vor.u32 %v3795_v11, %v3334_v15 }
  0x58   : > { %501 = vmatpush.bf16.msra.mxu0 %v4643_v2  ;;  %526 = vmatpush.bf16.msra.mxu2 %v4645_v3  ;;  %6283 = vst [vmem:[#allocation47_spill] sm:$0xff] %v4655_v20  ;;  %v3316_v23 = vld [vmem:[#allocation2] sm:$0xf]  ;;  %v3793_v24 = vld [vmem:[#allocation2 + $0xc] sm:$0xf0]  ;;  %v4663_v27 = vor.u32 %v3796_v16, %v3342_v19 }
  0x59   : > { %6284 = vst [vmem:[#allocation48_spill] sm:$0xff] %v4657_v21  ;;  %v3791_v25 = vld [vmem:[#allocation2 + $0x4] sm:$0xf]  ;;  %514 = vmatpush.bf16.msra.mxu1 %v4649_v7  ;;  %540 = vmatpush.bf16.msra.mxu3 %v4651_v10  ;;  %v3318_v28 = vld [vmem:[#allocation2 + $0x10] sm:$0xf0]  ;;  %v4667_v41 = vor.u32 %v3793_v24, %v3316_v23 }
  0x5a   : > { %6285 = vst [vmem:[#allocation49_spill] sm:$0xff] %v4661_v26  ;;  %v3340_v30 = vld [vmem:[#allocation2 + $0x28] sm:$0xf]  ;;  %v3798_v31 = vld [vmem:[#allocation2 + $0x34] sm:$0xf0]  ;;  %v4673_v48 = vor.u32 %v3791_v25, %v3318_v28 }
  0x5b   : > { %6286 = vst [vmem:[#allocation50_spill] sm:$0xff] %v4663_v27  ;;  %v3792_v32 = vld [vmem:[#allocation2 + $0xc] sm:$0xf]  ;;  %v3326_v36 = vld [vmem:[#allocation2 + $0x18] sm:$0xf0]  ;;  %v4669_v45 = vor.u32 %v3798_v31, %v3340_v30 }
  0x5c   : > { %v3687_v37 = vld [vmem:[#allocation3 + $0x1e0] sm:$0xf]  ;;  %v3885_v38 = vld [vmem:[#allocation3 + $0x1ec] sm:$0xf0]  ;;  %v3883_v39 = vld [vmem:[#allocation3 + $0x1e4] sm:$0xf]  ;;  %502 = vmatpush.bf16.msra.mxu0 %v4655_v20  ;;  %527 = vmatpush.bf16.msra.mxu2 %v4657_v21  ;;  %v4675_v49 = vor.u32 %v3792_v32, %v3326_v36 }
  0x5d   : > { %v3689_v40 = vld [vmem:[#allocation3 + $0x1f0] sm:$0xf0]  ;;  %6287 = vst [vmem:[#allocation51_spill] sm:$0xff] %v4667_v41  ;;  %515 = vmatpush.bf16.msra.mxu1 %v4661_v26  ;;  %541 = vmatpush.bf16.msra.mxu3 %v4663_v27  ;;  %v3324_v50 = vld [vmem:[#allocation2 + $0x8] sm:$0xf]  ;;  %v4677_v52 = vor.u32 %v3885_v38, %v3687_v37 }
  0x5e   : > { %6288 = vst [vmem:[#allocation52_spill] sm:$0xff] %v4669_v45  ;;  %v3794_v51 = vld [vmem:[#allocation2 + $0x14] sm:$0xf0]  ;;  %v4679_v53 = vor.u32 %v3883_v39, %v3689_v40  ;;  %v3671_v56 = vld [vmem:[#allocation3 + $0x1c0] sm:$0xf] }
  0x5f   : > { %6289 = vst [vmem:[#allocation53_spill] sm:$0xff] %v4673_v48  ;;  %v3881_v60 = vld [vmem:[#allocation3 + $0x1cc] sm:$0xf0]  ;;  %v3879_v61 = vld [vmem:[#allocation3 + $0x1c4] sm:$0xf]  ;;  %v4685_v63 = vor.u32 %v3794_v51, %v3324_v50 }
  0x60   : > { %6290 = vst [vmem:[#allocation54_spill] sm:$0xff] %v4675_v49  ;;  %v3673_v62 = vld [vmem:[#allocation3 + $0x1d0] sm:$0xf0]  ;;  %503 = vmatpush.bf16.msra.mxu0 %v4667_v41  ;;  %528 = vmatpush.bf16.msra.mxu2 %v4669_v45  ;;  %v3655_v0 = vld [vmem:[#allocation3 + $0x1a0] sm:$0xf]  ;;  %v4689_v5 = vor.u32 %v3881_v60, %v3671_v56 }
  0x61   : > { %6291 = vst [vmem:[#allocation55_spill] sm:$0xff] %v4677_v52  ;;  %516 = vmatpush.bf16.msra.mxu1 %v4673_v48  ;;  %542 = vmatpush.bf16.msra.mxu3 %v4675_v49  ;;  %v3877_v1 = vld [vmem:[#allocation3 + $0x1ac] sm:$0xf0]  ;;  %v4691_v6 = vor.u32 %v3879_v61, %v3673_v62  ;;  %v3875_v11 = vld [vmem:[#allocation3 + $0x1a4] sm:$0xf] }
  0x62   : > { %6292 = vst [vmem:[#allocation56_spill] sm:$0xff] %v4679_v53  ;;  %v3657_v12 = vld [vmem:[#allocation3 + $0x1b0] sm:$0xf0]  ;;  %v3559_v14 = vld [vmem:[#allocation3 + $0xe0] sm:$0xf]  ;;  %v4700_v30 = vor.u32 %v3877_v1, %v3655_v0 }
  0x63   : > { %6293 = vst [vmem:[#allocation57_spill] sm:$0xff] %v4685_v63  ;;  %504 = vmatmul.bf16.vlgmr.msra.gmra.mxu0 %v335_v57  ;;  %v3853_v15 = vld [vmem:[#allocation3 + $0xec] sm:$0xf0]  ;;  %v3851_v16 = vld [vmem:[#allocation3 + $0xe4] sm:$0xf]  ;;  %v4702_v31 = vor.u32 %v3875_v11, %v3657_v12 }
  0x64   : > { %6294 = vst [vmem:[#allocation58_spill] sm:$0xff] %v4689_v5  ;;  %v3561_v19 = vld [vmem:[#allocation3 + $0xf0] sm:$0xf0]  ;;  %517 = vmatmul.bf16.vlgmr.msra.gmra.mxu1 %v335_v57  ;;  %543 = vmatmul.bf16.vlgmr.msra.gmra.mxu3 %v335_v57  ;;  %v4693_v23 = vor.u32 %v3853_v15, %v3559_v14  ;;  %v3543_v25 = vld [vmem:[#allocation3 + $0xc0] sm:$0xf] }
  0x65   : > { %950 = vmatpush.bf16.msrb.mxu1 %v4677_v52  ;;  %976 = vmatpush.bf16.msrb.mxu3 %v4679_v53  ;;  %6295 = vst [vmem:[#allocation59_spill] sm:$0xff] %v4691_v6  ;;  %v4695_v24 = vor.u32 %v3851_v16, %v3561_v19  ;;  %v3849_v28 = vld [vmem:[#allocation3 + $0xcc] sm:$0xf0]  ;;  %v3639_v32 = vld [vmem:[#allocation3 + $0x180] sm:$0xf] }
  0x66   : > { %6296 = vst [vmem:[#allocation60_spill] sm:$0xff] %v4693_v23  ;;  %529 = vmatpush.bf16.msra.mxu2 %v4685_v63  ;;  %v3847_v36 = vld [vmem:[#allocation3 + $0xc4] sm:$0xf]  ;;  %v3545_v37 = vld [vmem:[#allocation3 + $0xd0] sm:$0xf0]  ;;  %937 = vmatpush.bf16.msrb.mxu0 %v4693_v23  ;;  %v4706_v44 = vor.u32 %v3849_v28, %v3543_v25 }
  0x67   : > { %6297 = vst [vmem:[#allocation61_spill] sm:$0xff] %v4695_v24  ;;  %v3873_v38 = vld [vmem:[#allocation3 + $0x18c] sm:$0xf0]  ;;  %v3871_v39 = vld [vmem:[#allocation3 + $0x184] sm:$0xf]  ;;  %v4708_v50 = vor.u32 %v3847_v36, %v3545_v37 }
  0x68   : > { %6298 = vst [vmem:[#allocation62_spill] sm:$0xff] %v4700_v30  ;;  %v3641_v40 = vld [vmem:[#allocation3 + $0x190] sm:$0xf0]  ;;  %v3527_v51 = vld [vmem:[#allocation3 + $0xa0] sm:$0xf]  ;;  %v4712_v62 = vor.u32 %v3873_v38, %v3639_v32 }
  0x69   : > { %951 = vmatpush.bf16.msrb.mxu1 %v4689_v5  ;;  %977 = vmatpush.bf16.msrb.mxu3 %v4691_v6  ;;  %6299 = vst [vmem:[#allocation63_spill] sm:$0xff] %v4702_v31  ;;  %v3845_v56 = vld [vmem:[#allocation3 + $0xac] sm:$0xf0]  ;;  %v3843_v60 = vld [vmem:[#allocation3 + $0xa4] sm:$0xf]  ;;  %v4714_v0 = vor.u32 %v3871_v39, %v3641_v40 }
  0x6a   : > { %963 = vmatpush.bf16.msrb.mxu2 %v4695_v24  ;;  %6300 = vst [vmem:[#allocation64_spill] sm:$0xff] %v4706_v44  ;;  %v3529_v61 = vld [vmem:[#allocation3 + $0xb0] sm:$0xf0]  ;;  %v3623_v1 = vld [vmem:[#allocation3 + $0x160] sm:$0xf]  ;;  %938 = vmatpush.bf16.msrb.mxu0 %v4706_v44 }
  0x6b   : > { %6301 = vst [vmem:[#allocation65_spill] sm:$0xff] %v4708_v50  ;;  %530 = vmatmul.bf16.vlgmr.msra.gmra.mxu2 %v335_v57  ;;  %v3869_v11 = vld [vmem:[#allocation3 + $0x16c] sm:$0xf0]  ;;  %v3867_v12 = vld [vmem:[#allocation3 + $0x164] sm:$0xf]  ;;  %v4718_v57 = vor.u32 %v3845_v56, %v3527_v51  ;;  %v4720_v15 = vor.u32 %v3843_v60, %v3529_v61 }
  0x6c   : > { %6302 = vst [vmem:[#allocation66_spill] sm:$0xff] %v4712_v62  ;;  %v3625_v14 = vld [vmem:[#allocation3 + $0x170] sm:$0xf0]  ;;  %v4724_v16 = vor.u32 %v3869_v11, %v3623_v1  ;;  %v3607_v25 = vld [vmem:[#allocation3 + $0x140] sm:$0xf] }
  0x6d   : > { %952 = vmatpush.bf16.msrb.mxu1 %v4700_v30  ;;  %978 = vmatpush.bf16.msrb.mxu3 %v4702_v31  ;;  %6303 = vst [vmem:[#allocation67_spill] sm:$0xff] %v4714_v0  ;;  %v4726_v19 = vor.u32 %v3867_v12, %v3625_v14  ;;  %v3865_v28 = vld [vmem:[#allocation3 + $0x14c] sm:$0xf0]  ;;  %v3863_v32 = vld [vmem:[#allocation3 + $0x144] sm:$0xf] }
  0x6e   : > { %964 = vmatpush.bf16.msrb.mxu2 %v4708_v50  ;;  %6304 = vst [vmem:[#allocation68_spill] sm:$0xff] %v4718_v57  ;;  %v3609_v36 = vld [vmem:[#allocation3 + $0x150] sm:$0xf0]  ;;  %939 = vmatpush.bf16.msrb.mxu0 %v4718_v57  ;;  %v4732_v37 = vor.u32 %v3865_v28, %v3607_v25  ;;  %v3591_v39 = vld [vmem:[#allocation3 + $0x120] sm:$0xf] }
  0x6f   : > { %6305 = vst [vmem:[#allocation69_spill] sm:$0xff] %v4720_v15  ;;  %v4734_v38 = vor.u32 %v3863_v32, %v3609_v36  ;;  %v3861_v40 = vld [vmem:[#allocation3 + $0x12c] sm:$0xf0]  ;;  %v3859_v51 = vld [vmem:[#allocation3 + $0x124] sm:$0xf] }
  0x70   : > { %6306 = vst [vmem:[#allocation70_spill] sm:$0xff] %v4724_v16  ;;  %v3593_v56 = vld [vmem:[#allocation3 + $0x130] sm:$0xf0]  ;;  %v4738_v60 = vor.u32 %v3861_v40, %v3591_v39  ;;  %v3575_v1 = vld [vmem:[#allocation3 + $0x100] sm:$0xf] }
  0x71   : > { %953 = vmatpush.bf16.msrb.mxu1 %v4712_v62  ;;  %979 = vmatpush.bf16.msrb.mxu3 %v4714_v0  ;;  %6307 = vst [vmem:[#allocation71_spill] sm:$0xff] %v4726_v19  ;;  %v4740_v61 = vor.u32 %v3859_v51, %v3593_v56  ;;  %v3857_v11 = vld [vmem:[#allocation3 + $0x10c] sm:$0xf0]  ;;  %v3855_v12 = vld [vmem:[#allocation3 + $0x104] sm:$0xf] }
  0x72   : > { %965 = vmatpush.bf16.msrb.mxu2 %v4720_v15  ;;  %6308 = vst [vmem:[#allocation72_spill] sm:$0xff] %v4732_v37  ;;  %v3577_v14 = vld [vmem:[#allocation3 + $0x110] sm:$0xf0]  ;;  %v3695_v25 = vld [vmem:[#allocation3 + $0x1e8] sm:$0xf]  ;;  %v4744_v15 = vor.u32 %v3857_v11, %v3575_v1 }
  0x73   : > { %6309 = vst [vmem:[#allocation73_spill] sm:$0xff] %v4734_v38  ;;  %v3886_v28 = vld [vmem:[#allocation3 + $0x1f4] sm:$0xf0]  ;;  %v3884_v32 = vld [vmem:[#allocation3 + $0x1ec] sm:$0xf]  ;;  %v4746_v57 = vor.u32 %v3855_v12, %v3577_v14 }
  0x74   : > { %6310 = vst [vmem:[#allocation74_spill] sm:$0xff] %v4738_v60  ;;  %v3697_v36 = vld [vmem:[#allocation3 + $0x1f8] sm:$0xf0]  ;;  %v4748_v39 = vor.u32 %v3886_v28, %v3695_v25  ;;  %v3679_v51 = vld [vmem:[#allocation3 + $0x1c8] sm:$0xf] }
  0x75   : > { %954 = vmatpush.bf16.msrb.mxu1 %v4724_v16  ;;  %980 = vmatpush.bf16.msrb.mxu3 %v4726_v19  ;;  %6311 = vst [vmem:[#allocation75_spill] sm:$0xff] %v4740_v61  ;;  %v4750_v40 = vor.u32 %v3884_v32, %v3697_v36  ;;  %v3882_v56 = vld [vmem:[#allocation3 + $0x1d4] sm:$0xf0]  ;;  %v3880_v50 = vld [vmem:[#allocation3 + $0x1cc] sm:$0xf] }
  0x76   : > { %6312 = vst [vmem:[#allocation76_spill] sm:$0xff] %v4744_v15  ;;  %v3681_v44 = vld [vmem:[#allocation3 + $0x1d8] sm:$0xf0]  ;;  %v4756_v1 = vor.u32 %v3882_v56, %v3679_v51  ;;  %v3663_v12 = vld [vmem:[#allocation3 + $0x1a8] sm:$0xf] }
  0x77   : > { %6313 = vst [vmem:[#allocation77_spill] sm:$0xff] %v4746_v57  ;;  %v4758_v11 = vor.u32 %v3880_v50, %v3681_v44  ;;  %v3878_v14 = vld [vmem:[#allocation3 + $0x1b4] sm:$0xf0]  ;;  %v3876_v25 = vld [vmem:[#allocation3 + $0x1ac] sm:$0xf] }
  0x78   : > { %6314 = vst [vmem:[#allocation78_spill] sm:$0xff] %v4748_v39  ;;  %v3665_v28 = vld [vmem:[#allocation3 + $0x1b8] sm:$0xf0]  ;;  %v4762_v32 = vor.u32 %v3878_v14, %v3663_v12  ;;  %v3647_v24 = vld [vmem:[#allocation3 + $0x188] sm:$0xf] }
  0x79   : > { %955 = vmatpush.bf16.msrb.mxu1 %v4732_v37  ;;  %981 = vmatpush.bf16.msrb.mxu3 %v4734_v38  ;;  %6315 = vst [vmem:[#allocation79_spill] sm:$0xff] %v4750_v40  ;;  %v4764_v36 = vor.u32 %v3876_v25, %v3665_v28  ;;  %v3874_v23 = vld [vmem:[#allocation3 + $0x194] sm:$0xf0]  ;;  %v3872_v63 = vld [vmem:[#allocation3 + $0x18c] sm:$0xf] }
  0x7a   : > { %6316 = vst [vmem:[#allocation80_spill] sm:$0xff] %v4756_v1  ;;  %v3649_v41 = vld [vmem:[#allocation3 + $0x198] sm:$0xf0]  ;;  %v4768_v44 = vor.u32 %v3874_v23, %v3647_v24  ;;  %v3511_v51 = vld [vmem:[#allocation3 + $0x80] sm:$0xf] }
  0x7b   : > { %6317 = vst [vmem:[#allocation81_spill] sm:$0xff] %v4758_v11  ;;  %v4770_v50 = vor.u32 %v3872_v63, %v3649_v41  ;;  %v3841_v56 = vld [vmem:[#allocation3 + $0x8c] sm:$0xf0]  ;;  %v3839_v12 = vld [vmem:[#allocation3 + $0x84] sm:$0xf] }
  0x7c   : > { %6318 = vst [vmem:[#allocation82_spill] sm:$0xff] %v4762_v32  ;;  %v4774_v14 = vor.u32 %v3841_v56, %v3511_v51  ;;  %v3513_v25 = vld [vmem:[#allocation3 + $0x90] sm:$0xf0]  ;;  %v3631_v28 = vld [vmem:[#allocation3 + $0x168] sm:$0xf] }
  0x7d   : > { %956 = vmatpush.bf16.msrb.mxu1 %v4738_v60  ;;  %982 = vmatpush.bf16.msrb.mxu3 %v4740_v61  ;;  %6319 = vst [vmem:[#allocation83_spill] sm:$0xff] %v4764_v36  ;;  %v3870_v45 = vld [vmem:[#allocation3 + $0x174] sm:$0xf0]  ;;  %v4776_v20 = vor.u32 %v3839_v12, %v3513_v25  ;;  %v3868_v23 = vld [vmem:[#allocation3 + $0x16c] sm:$0xf] }
  0x7e   : > { %6320 = vst [vmem:[#allocation84_spill] sm:$0xff] %v4768_v44  ;;  %v4778_v21 = vor.u32 %v3870_v45, %v3631_v28  ;;  %v3633_v24 = vld [vmem:[#allocation3 + $0x178] sm:$0xf0]  ;;  %940 = vmatpush.bf16.msrb.mxu0 %v4774_v14  ;;  %v3495_v63 = vld [vmem:[#allocation3 + $0x60] sm:$0xf] }
  0x7f   : > { %6321 = vst [vmem:[#allocation85_spill] sm:$0xff] %v4770_v50  ;;  %v4781_v41 = vor.u32 %v3868_v23, %v3633_v24  ;;  %966 = vmatpush.bf16.msrb.mxu2 %v4776_v20  ;;  %v3837_v51 = vld [vmem:[#allocation3 + $0x6c] sm:$0xf0]  ;;  %v3835_v56 = vld [vmem:[#allocation3 + $0x64] sm:$0xf] }
  0x80   : > { %6322 = vst [vmem:[#allocation86_spill] sm:$0xff] %v4774_v14  ;;  %v4786_v2 = vor.u32 %v3837_v51, %v3495_v63  ;;  %v3497_v12 = vld [vmem:[#allocation3 + $0x70] sm:$0xf0]  ;;  %v3615_v45 = vld [vmem:[#allocation3 + $0x148] sm:$0xf] }
  0x81   : > { %957 = vmatpush.bf16.msrb.mxu1 %v4744_v15  ;;  %983 = vmatpush.bf16.msrb.mxu3 %v4746_v57  ;;  %6323 = vst [vmem:[#allocation87_spill] sm:$0xff] %v4776_v20  ;;  %v3866_v25 = vld [vmem:[#allocation3 + $0x154] sm:$0xf0]  ;;  %v4788_v28 = vor.u32 %v3835_v56, %v3497_v12  ;;  %v3864_v23 = vld [vmem:[#allocation3 + $0x14c] sm:$0xf] }
  0x82   : > { %6324 = vst [vmem:[#allocation88_spill] sm:$0xff] %v4778_v21  ;;  %v4790_v3 = vor.u32 %v3866_v25, %v3615_v45  ;;  %v3617_v24 = vld [vmem:[#allocation3 + $0x158] sm:$0xf0]  ;;  %941 = vmatpush.bf16.msrb.mxu0 %v4786_v2  ;;  %v3479_v14 = vld [vmem:[#allocation3 + $0x40] sm:$0xf] }
  0x83   : > { %6325 = vst [vmem:[#allocation89_spill] sm:$0xff] %v4781_v41  ;;  %v4793_v20 = vor.u32 %v3864_v23, %v3617_v24  ;;  %967 = vmatpush.bf16.msrb.mxu2 %v4788_v28  ;;  %v3833_v63 = vld [vmem:[#allocation3 + $0x4c] sm:$0xf0]  ;;  %v3831_v56 = vld [vmem:[#allocation3 + $0x44] sm:$0xf] }
  0x84   : > { %6326 = vst [vmem:[#allocation90_spill] sm:$0xff] %v4786_v2  ;;  %v4798_v51 = vor.u32 %v3833_v63, %v3479_v14  ;;  %v3481_v12 = vld [vmem:[#allocation3 + $0x50] sm:$0xf0]  ;;  %v3599_v45 = vld [vmem:[#allocation3 + $0x128] sm:$0xf] }
  0x85   : > { %1002 = vmatpush.bf16.msra.mxu1 %v4748_v39  ;;  %1028 = vmatpush.bf16.msra.mxu3 %v4750_v40  ;;  %6327 = vst [vmem:[#allocation91_spill] sm:$0xff] %v4788_v28  ;;  %v4800_v25 = vor.u32 %v3831_v56, %v3481_v12  ;;  %v3601_v2 = vld [vmem:[#allocation3 + $0x138] sm:$0xf0]  ;;  %v3463_v14 = vld [vmem:[#allocation3 + $0x20] sm:$0xf] }
  0x86   : > { %6328 = vst [vmem:[#allocation92_spill] sm:$0xff] %v4790_v3  ;;  %942 = vmatpush.bf16.msrb.mxu0 %v4798_v51  ;;  %v3829_v63 = vld [vmem:[#allocation3 + $0x2c] sm:$0xf0]  ;;  %v3827_v28 = vld [vmem:[#allocation3 + $0x24] sm:$0xf] }
  0x87   : > { %6329 = vst [vmem:[#allocation93_spill] sm:$0xff] %v4793_v20  ;;  %968 = vmatpush.bf16.msrb.mxu2 %v4800_v25  ;;  %v4810_v56 = vor.u32 %v3829_v63, %v3463_v14  ;;  %v3465_v12 = vld [vmem:[#allocation3 + $0x30] sm:$0xf0]  ;;  %v3447_v14 = vld [vmem:[#allocation3] sm:$0xf] }
  0x88   : > { %6330 = vst [vmem:[#allocation94_spill] sm:$0xff] %v4798_v51  ;;  %v4812_v54 = vor.u32 %v3827_v28, %v3465_v12  ;;  %v3825_v63 = vld [vmem:[#allocation3 + $0xc] sm:$0xf0]  ;;  %v3449_v28 = vld [vmem:[#allocation3 + $0x10] sm:$0xf0] }
  0x89   : > { %1003 = vmatpush.bf16.msra.mxu1 %v4756_v1  ;;  %1029 = vmatpush.bf16.msra.mxu3 %v4758_v11  ;;  %6331 = vst [vmem:[#allocation95_spill] sm:$0xff] %v4800_v25  ;;  %v3567_v12 = vld [vmem:[#allocation3 + $0xe8] sm:$0xf] }
  0x8a   : > { %6334 = vst [vmem:[#allocation98_spill] sm:$0xff] %v4810_v56  ;;  %943 = vmatpush.bf16.msrb.mxu0 %v4810_v56  ;;  %v3854_v56 = vld [vmem:[#allocation3 + $0xf4] sm:$0xf0] }
  0x8b   : > { %6335 = vst [vmem:[#allocation99_spill] sm:$0xff] %v4812_v54  ;;  %969 = vmatpush.bf16.msrb.mxu2 %v4812_v54 }
  0x8d   : > { %1004 = vmatpush.bf16.msra.mxu1 %v4762_v32  ;;  %1030 = vmatpush.bf16.msra.mxu3 %v4764_v36 }
  0x91   : > { %1005 = vmatpush.bf16.msra.mxu1 %v4768_v44  ;;  %1031 = vmatpush.bf16.msra.mxu3 %v4770_v50 }
  0x95   : > { %1006 = vmatpush.bf16.msra.mxu1 %v4778_v21  ;;  %1032 = vmatpush.bf16.msra.mxu3 %v4781_v41  ;;  %v3862_v41 = vld [vmem:[#allocation3 + $0x134] sm:$0xf0]  ;;  %v3860_v21 = vld [vmem:[#allocation3 + $0x12c] sm:$0xf] }
  0x96   : > { %v4803_v23 = vor.u32 %v3862_v41, %v3599_v45  ;;  %v4805_v24 = vor.u32 %v3860_v21, %v3601_v2  ;;  %v3858_v2 = vld [vmem:[#allocation3 + $0x114] sm:$0xf0]  ;;  %v3856_v21 = vld [vmem:[#allocation3 + $0x10c] sm:$0xf]  ;;  %v3585_v45 = vld [vmem:[#allocation3 + $0x118] sm:$0xf0] }
  0x97   : > { %v4819_v51 = vor.u32 %v3856_v21, %v3585_v45  ;;  %v3852_v21 = vld [vmem:[#allocation3 + $0xec] sm:$0xf]  ;;  %v3569_v45 = vld [vmem:[#allocation3 + $0xf8] sm:$0xf0] }
  0x98   : > { %6332 = vst [vmem:[#allocation96_spill] sm:$0xff] %v4803_v23  ;;  %v4835_v54 = vor.u32 %v3852_v21, %v3569_v45  ;;  %v3535_v21 = vld [vmem:[#allocation3 + $0xa8] sm:$0xf]  ;;  %v3846_v45 = vld [vmem:[#allocation3 + $0xb4] sm:$0xf0] }
  0x99   : > { %1007 = vmatpush.bf16.msra.mxu1 %v4790_v3  ;;  %1033 = vmatpush.bf16.msra.mxu3 %v4793_v20  ;;  %6333 = vst [vmem:[#allocation97_spill] sm:$0xff] %v4805_v24  ;;  %v329_v20 = vld [vmem:[#allocation7] sm:$0xff]  ;;  %v3583_v3 = vld [vmem:[#allocation3 + $0x108] sm:$0xf] }
  0x9a   : > { %v4814_v41 = vpack.c.bf16 %v329_v20, %v329_v20  ;;  %v4817_v25 = vor.u32 %v3858_v2, %v3583_v3  ;;  %6337 = vst [vmem:[#allocation101_spill] sm:$0xff] %v4819_v51  ;;  %v4825_v20 = vor.u32 %v3825_v63, %v3447_v14  ;;  %v4831_v2 = vor.u32 %v3854_v56, %v3567_v12  ;;  %v3551_v14 = vld [vmem:[#allocation3 + $0xc8] sm:$0xf]  ;;  %v3850_v63 = vld [vmem:[#allocation3 + $0xd4] sm:$0xf0] }
  0x9b   : > { %6341 = vst [vmem:[#allocation105_spill] sm:$0xff] %v4835_v54  ;;  %v4841_v56 = vor.u32 %v3850_v63, %v3551_v14  ;;  %v3537_v14 = vld [vmem:[#allocation3 + $0xb8] sm:$0xf0] }
  0x9c   : > { %6336 = vst [vmem:[#allocation100_spill] sm:$0xff] %v4817_v25  ;;  %958 = vmatmul.bf16.vlgmr.msrb.gmra.mxu1 %v4814_v41  ;;  %984 = vmatmul.bf16.vlgmr.msrb.gmra.mxu3 %v4814_v41 }
  0x9d   : > { %1008 = vmatpush.bf16.msra.mxu1 %v4803_v23  ;;  %1034 = vmatpush.bf16.msra.mxu3 %v4805_v24  ;;  %v3823_v24 = vld [vmem:[#allocation3 + $0x4] sm:$0xf]  ;;  %6338 = vst [vmem:[#allocation102_spill] sm:$0xff] %v4825_v20 }
  0x9e   : > { %v4829_v3 = vor.u32 %v3823_v24, %v3449_v28  ;;  %6340 = vst [vmem:[#allocation104_spill] sm:$0xff] %v4831_v2  ;;  %944 = vmatpush.bf16.msrb.mxu0 %v4825_v20  ;;  %v3848_v24 = vld [vmem:[#allocation3 + $0xcc] sm:$0xf]  ;;  %v3553_v28 = vld [vmem:[#allocation3 + $0xd8] sm:$0xf0] }
  0x9f   : > { %6342 = vst [vmem:[#allocation106_spill] sm:$0xff] %v4841_v56  ;;  %v4844_v12 = vor.u32 %v3848_v24, %v3553_v28  ;;  %v3519_v24 = vld [vmem:[#allocation3 + $0x88] sm:$0xf]  ;;  %v3842_v28 = vld [vmem:[#allocation3 + $0x94] sm:$0xf0] }
  0xa0   : > { %6339 = vst [vmem:[#allocation103_spill] sm:$0xff] %v4829_v3  ;;  %970 = vmatpush.bf16.msrb.mxu2 %v4829_v3 }
  0xa1   : > { %1009 = vmatpush.bf16.msra.mxu1 %v4817_v25  ;;  %1035 = vmatpush.bf16.msra.mxu3 %v4819_v51  ;;  %6343 = vst [vmem:[#allocation107_spill] sm:$0xff] %v4844_v12 }
  0xa2   : > { %989 = vmatpush.bf16.msra.mxu0 %v4831_v2 }
  0xa4   : > { %1015 = vmatpush.bf16.msra.mxu2 %v4835_v54 }
  0xa5   : > { %1123 = vmatpush.bf16.msrb.mxu1 %v4590_v8  ;;  %1149 = vmatpush.bf16.msrb.mxu3 %v4592_v9  ;;  %v3844_v9 = vld [vmem:[#allocation3 + $0xac] sm:$0xf]  ;;  %v4849_v8 = vor.u32 %v3846_v45, %v3535_v21 }
  0xa6   : > { %990 = vmatpush.bf16.msra.mxu0 %v4841_v56  ;;  %v4852_v63 = vor.u32 %v3844_v9, %v3537_v14  ;;  %v332_v21 = vld [vmem:[%s4569_s12 + $0x8] sm:$0xff] }
  0xa7   : > { %6344 = vst [vmem:[#allocation108_spill] sm:$0xff] %v4849_v8 }
  0xa8   : > { %1016 = vmatpush.bf16.msra.mxu2 %v4844_v12  ;;  %6345 = vst [vmem:[#allocation109_spill] sm:$0xff] %v4852_v63  ;;  %v4858_v12 = vor.u32 %v3842_v28, %v3519_v24  ;;  %v3503_v24 = vld [vmem:[#allocation3 + $0x68] sm:$0xf]  ;;  %v3838_v28 = vld [vmem:[#allocation3 + $0x74] sm:$0xf0] }
  0xa9   : > { %1124 = vmatpush.bf16.msrb.mxu1 %v4599_v17  ;;  %1150 = vmatpush.bf16.msrb.mxu3 %v4601_v18  ;;  %v3840_v18 = vld [vmem:[#allocation3 + $0x8c] sm:$0xf]  ;;  %v331_v17 = vld [vmem:[%s4569_s12] sm:$0xff] }
  0xaa   : > { %991 = vmatpush.bf16.msra.mxu0 %v4849_v8  ;;  %6346 = vst [vmem:[#allocation110_spill] sm:$0xff] %v4858_v12 }
  0xac   : > { %1017 = vmatpush.bf16.msra.mxu2 %v4852_v63  ;;  %1010 = vmatmul.bf16.vlgmr.msra.gmra.mxu1 %v4814_v41 }
  0xad   : > { %1125 = vmatpush.bf16.msrb.mxu1 %v4611_v33  ;;  %1151 = vmatpush.bf16.msrb.mxu3 %v4613_v34  ;;  %v3521_v33 = vld [vmem:[#allocation3 + $0x98] sm:$0xf0] }
  0xae   : > { %v4862_v45 = vor.u32 %v3840_v18, %v3521_v33  ;;  %992 = vmatpush.bf16.msra.mxu0 %v4858_v12  ;;  %1036 = vmatmul.bf16.vlgmr.msra.gmra.mxu3 %v4814_v41  ;;  %v4869_v18 = vor.u32 %v3838_v28, %v3503_v24  ;;  %v3505_v33 = vld [vmem:[#allocation3 + $0x78] sm:$0xf0]  ;;  %v3487_v41 = vld [vmem:[#allocation3 + $0x48] sm:$0xf] }
  0xb0   : > { %6347 = vst [vmem:[#allocation111_spill] sm:$0xff] %v4862_v45  ;;  %1018 = vmatpush.bf16.msra.mxu2 %v4862_v45  ;;  %v3834_v45 = vld [vmem:[#allocation3 + $0x54] sm:$0xf0] }
  0xb1   : > { %1126 = vmatpush.bf16.msrb.mxu1 %v4625_v46  ;;  %1152 = vmatpush.bf16.msrb.mxu3 %v4627_v47  ;;  %v3836_v46 = vld [vmem:[#allocation3 + $0x6c] sm:$0xf]  ;;  %6348 = vst [vmem:[#allocation112_spill] sm:$0xff] %v4869_v18 }
  0xb2   : > { %v4872_v12 = vor.u32 %v3836_v46, %v3505_v33  ;;  %993 = vmatpush.bf16.msra.mxu0 %v4869_v18  ;;  %v3471_v33 = vld [vmem:[#allocation3 + $0x28] sm:$0xf] }
  0xb4   : > { %6349 = vst [vmem:[#allocation113_spill] sm:$0xff] %v4872_v12  ;;  %1019 = vmatpush.bf16.msra.mxu2 %v4872_v12 }
  0xb5   : > { %1127 = vmatpush.bf16.msrb.mxu1 %v4637_v58  ;;  %1153 = vmatpush.bf16.msrb.mxu3 %v4639_v59  ;;  %v3830_v59 = vld [vmem:[#allocation3 + $0x34] sm:$0xf0] }
  0xb9   : > { %1128 = vmatpush.bf16.msrb.mxu1 %v4649_v7  ;;  %1154 = vmatpush.bf16.msrb.mxu3 %v4651_v10 }
  0xbd   : > { %1129 = vmatpush.bf16.msrb.mxu1 %v4661_v26  ;;  %1155 = vmatpush.bf16.msrb.mxu3 %v4663_v27 }
  0xc1   : > { %1130 = vmatpush.bf16.msrb.mxu1 %v4673_v48  ;;  %1156 = vmatpush.bf16.msrb.mxu3 %v4675_v49 }
  0xc5   : > { %1244 = vmatpush.bf16.msra.mxu1 %v4677_v52  ;;  %1270 = vmatpush.bf16.msra.mxu3 %v4679_v53 }
  0xc9   : > { %1245 = vmatpush.bf16.msra.mxu1 %v4689_v5  ;;  %1271 = vmatpush.bf16.msra.mxu3 %v4691_v6 }
  0xcd   : > { %1246 = vmatpush.bf16.msra.mxu1 %v4700_v30  ;;  %1272 = vmatpush.bf16.msra.mxu3 %v4702_v31  ;;  %v328_v31 = vld [vmem:[#allocation6] sm:$0xff] }
  0xd1   : > { %1247 = vmatpush.bf16.msra.mxu1 %v4712_v62  ;;  %1273 = vmatpush.bf16.msra.mxu3 %v4714_v0 }
  0xd5   : > { %1248 = vmatpush.bf16.msra.mxu1 %v4724_v16  ;;  %1274 = vmatpush.bf16.msra.mxu3 %v4726_v19 }
  0xd9   : > { %1249 = vmatpush.bf16.msra.mxu1 %v4732_v37  ;;  %1275 = vmatpush.bf16.msra.mxu3 %v4734_v38 }
  0xdd   : > { %1250 = vmatpush.bf16.msra.mxu1 %v4738_v60  ;;  %1276 = vmatpush.bf16.msra.mxu3 %v4740_v61 }
  0xe0   : > { %v505_v9 = vpop.f32.mrf.mxu0 }
  0xe1   : > { %v548_v14 = vadd.f32 %v505_v9, %v331_v17  ;;  %v518_v34 = vpop.f32.mrf.mxu1  ;;  %v334_v9 = vld [vmem:[%s4569_s12 + $0x18] sm:$0xff]  ;;  %1251 = vmatpush.bf16.msra.mxu1 %v4744_v15  ;;  %1277 = vmatpush.bf16.msra.mxu3 %v4746_v57 }
  0xe2   : > { %v549_v63 = vadd.f32 %v518_v34, %v332_v21  ;;  %v3832_v34 = vld [vmem:[#allocation3 + $0x4c] sm:$0xf]  ;;  %v4878_v21 = vor.u32 %v3834_v45, %v3487_v41  ;;  %v4886_v45 = vor.u32 %v3830_v59, %v3471_v33  ;;  %v3473_v41 = vld [vmem:[#allocation3 + $0x38] sm:$0xf0]  ;;  %v333_v33 = vld [vmem:[%s4569_s12 + $0x10] sm:$0xff] }
  0xe3   : > { %v3442_v47 = vmul.f32 -1.442695, %v548_v14  ;;  %v3489_v14 = vld [vmem:[#allocation3 + $0x58] sm:$0xf0]  ;;  %v3824_v59 = vld [vmem:[#allocation3 + $0xc] sm:$0xf] }
  0xe4   : > { %v3443_v17 = vmul.f32 -1.442695, %v549_v63  ;;  %6350 = vst [vmem:[#allocation114_spill] sm:$0xff] %v4878_v21  ;;  %v4881_v46 = vor.u32 %v3832_v34, %v3489_v14  ;;  %994 = vmatpush.bf16.msra.mxu0 %v4878_v21 }
  0xe5   : > { %3976 = vpow2.f32 %v3442_v47  ;;  %6352 = vst [vmem:[#allocation116_spill] sm:$0xff] %v4886_v45 }
  0xe6   : > { %3978 = vpow2.f32 %v3443_v17  ;;  %6351 = vst [vmem:[#allocation115_spill] sm:$0xff] %v4881_v46  ;;  %1020 = vmatpush.bf16.msra.mxu2 %v4881_v46  ;;  %v3828_v17 = vld [vmem:[#allocation3 + $0x2c] sm:$0xf] }
  0xe7   : > { %v544_v24 = vpop.f32.mrf.mxu3 }
  0xe8   : > { %v551_v63 = vadd.f32 %v544_v24, %v334_v9  ;;  %v507_v28 = vpop.f32.mrf.mxu0  ;;  %v4889_v9 = vor.u32 %v3828_v17, %v3473_v41  ;;  %995 = vmatpush.bf16.msra.mxu0 %v4886_v45  ;;  %v3457_v17 = vld [vmem:[#allocation3 + $0x18] sm:$0xf0] }
  0xe9   : > { %v520_v47 = vpop.f32.mrf.mxu1 }
  0xea   : > { %v3444_v58 = vmul.f32 -1.442695, %v551_v63  ;;  %6353 = vst [vmem:[#allocation117_spill] sm:$0xff] %v4889_v9  ;;  %1021 = vmatpush.bf16.msra.mxu2 %v4889_v9  ;;  %v3455_v63 = vld [vmem:[#allocation3 + $0x8] sm:$0xf] }
  0xeb   : > { %v3977_v7 = vpop.eup %3976  ;;  %v3826_v47 = vld [vmem:[#allocation3 + $0x14] sm:$0xf0] }
  0xec   : > { %v3979_v14 = vpop.eup %3978  ;;  %v555_v24 = vadd.f32 1.0, %v3977_v7  ;;  %3980 = vpow2.f32 %v3444_v58  ;;  %v4897_v58 = vor.u32 %v3826_v47, %v3455_v63  ;;  %v4900_v7 = vor.u32 %v3824_v59, %v3457_v17 }
  0xed   : > { %v574_v28 = vadd.f32 1.0, %v3979_v14 }
  0xee   : > { %v531_v34 = vpop.f32.mrf.mxu2  ;;  %3982 = vrcp.f32 %v555_v24  ;;  %6354 = vst [vmem:[#allocation118_spill] sm:$0xff] %v4897_v58  ;;  %996 = vmatpush.bf16.msra.mxu0 %v4897_v58  ;;  %1022 = vmatpush.bf16.msra.mxu2 %v4900_v7  ;;  %v565_v5 = vand.u32 2147483647, %v555_v24  ;;  %vm561_vm2 = vweird.f32 %v555_v24 }
  0xef   : > { %3984 = vrcp.f32 %v574_v28  ;;  %v546_v26 = vpop.f32.mrf.mxu3  ;;  %6355 = vst [vmem:[#allocation119_spill] sm:$0xff] %v4900_v7  ;;  %v550_v14 = vadd.f32 %v531_v34, %v333_v33  ;;  %v567_v33 = vand.u32 2147483648, %v555_v24  ;;  %v584_v6 = vand.u32 2147483647, %v574_v28 }
  0xf0   : > { %vm580_vm3 = vweird.f32 %v574_v28  ;;  %vm566_vm6 = vcmp.eq.f32.partialorder %v565_v5, 8.507059e+37 }
  0xf1   : > { %vm585_vm7 = vcmp.eq.f32.partialorder %v584_v6, 8.507059e+37 }
  0xf2   : > { %v3981_v41 = vpop.eup %3980 }
  0xf3   : > { %v4903_v48 = vadd.f32 1.0, %v3981_v41 }
  0xf4   : > { %v3983_v26 = vpop.eup %3982 }
  0xf5   : > { %v3985_v63 = vpop.eup %3984  ;;  %v557_v47 = vmul.f32 %v3983_v26, %v555_v24  ;;  %3986 = vrcp.f32 %v4903_v48  ;;  %vm562_vm0 = vweird.f32 %v3983_v26  ;;  %vm600_vm9 = vweird.f32 %v4903_v48 }
  0xf6   : > { %v533_v27 = vpop.f32.mrf.mxu2  ;;  %v576_v59 = vmul.f32 %v3985_v63, %v574_v28  ;;  %3988 = vtanh.f32 %v550_v14  ;;  %vm581_vm1 = vweird.f32 %v3985_v63  ;;  %vm563_vm4 = vmor %vm561_vm2, %vm562_vm0  ;;  %v604_v5 = vand.u32 2147483647, %v4903_v48 }
  0xf7   : > { %v558_v17 = vsub.f32 1.0, %v557_v47  ;;  %v586_v27 = vand.u32 2147483648, %v574_v28  ;;  %vm582_vm5 = vmor %vm580_vm3, %vm581_vm1 }
  0xf8   : > { %v577_v34 = vsub.f32 1.0, %v576_v59  ;;  %v568_v59 = vor.u32 1.1754944e-38, %v567_v33  ;;  %vm605_vm11 = vcmp.eq.f32.partialorder %v604_v5, 8.507059e+37  ;;  %v6372_v5 = vld [vmem:[#allocation65_spill] sm:$0xff] }
  0xf9   : > { %v559_v41 = vmul.f32 %v3983_v26, %v558_v17  ;;  %v587_v17 = vor.u32 1.1754944e-38, %v586_v27  ;;  %v6361_v27 = vld [vmem:[#allocation48_spill] sm:$0xff] }
  0xfa   : > { %v578_v53 = vmul.f32 %v3985_v63, %v577_v34 }
  0xfb   : > { %v3987_v52 = vpop.eup %3986  ;;  %v560_v49 = vadd.f32 %v3983_v26, %v559_v41 }
  0xfc   : > { %v3989_v14 = vpop.eup %3988  ;;  %v596_v47 = vmul.f32 %v3987_v52, %v4903_v48  ;;  %v579_v30 = vadd.f32 %v3985_v63, %v578_v53  ;;  %vm601_vm8 = vweird.f32 %v3987_v52 }
  0xfd   : > { %v564_v34 = vsel %vm563_vm4, %v3983_v26, %v560_v49  ;;  %v606_v49 = vand.u32 2147483648, %v4903_v48  ;;  %vm602_vm10 = vmor %vm600_vm9, %vm601_vm8  ;;  %v6356_v48 = vld [vmem:[#allocation40_spill] sm:$0xff]  ;;  %v6359_v26 = vld [vmem:[#allocation89_spill] sm:$0xff] }
  0xfe   : > { %v597_v10 = vsub.f32 1.0, %v596_v47  ;;  %v569_v7 = vsel %vm566_vm6, %v568_v59, %v564_v34  ;;  %v583_v41 = vsel %vm582_vm5, %v3985_v63, %v579_v30  ;;  %v6360_v63 = vld [vmem:[#allocation43_spill] sm:$0xff]  ;;  %v6363_v47 = vld [vmem:[#allocation93_spill] sm:$0xff] }
  0xff   : > { %v588_v24 = vsel %vm585_vm7, %v587_v17, %v583_v41  ;;  %v611_v62 = vmul.f32 %v3989_v14, %v569_v7  ;;  %v607_v6 = vor.u32 1.1754944e-38, %v606_v49  ;;  %v6358_v7 = vld [vmem:[#allocation88_spill] sm:$0xff]  ;;  %v6364_v59 = vld [vmem:[#allocation47_spill] sm:$0xff]  ;;  %v6366_v34 = vld [vmem:[#allocation97_spill] sm:$0xff] }
 0x100   : > { %v598_v28 = vmul.f32 %v3987_v52, %v597_v10  ;;  %v610_v58 = vmul.f32 %v588_v24, %v328_v31  ;;  %v6362_v14 = vld [vmem:[#allocation92_spill] sm:$0xff]  ;;  %v6367_v41 = vld [vmem:[#allocation51_spill] sm:$0xff]  ;;  %v6368_v24 = vld [vmem:[#allocation57_spill] sm:$0xff] }
 0x101   : > { %v6365_v17 = vld [vmem:[#allocation52_spill] sm:$0xff] }
 0x102   : > { %v4916_v53 = vadd.f32 %v611_v62, %v610_v58  ;;  %v599_v33 = vadd.f32 %v3987_v52, %v598_v28  ;;  %v6369_v28 = vld [vmem:[#allocation60_spill] sm:$0xff] }
 0x103   : > { %v6371_v49 = vld [vmem:[#allocation64_spill] sm:$0xff] }
 0x104   : > { %3990 = vtanh.f32 %v4916_v53  ;;  %v603_v10 = vsel %vm602_vm10, %v3987_v52, %v599_v33  ;;  %v6357_v52 = vld [vmem:[#allocation44_spill] sm:$0xff]  ;;  %v6370_v33 = vld [vmem:[#allocation61_spill] sm:$0xff] }
 0x105   : > { %v608_v31 = vsel %vm605_vm11, %v607_v6, %v603_v10  ;;  %v6373_v10 = vld [vmem:[#allocation68_spill] sm:$0xff]  ;;  %v6374_v6 = vld [vmem:[#allocation69_spill] sm:$0xff] }
 0x10a   : > { %v3991_v30 = vpop.eup %3990 }
 0x10b   : > { %v614_v62 = vmul.f32 %v3991_v30, %v608_v31  ;;  %v6375_v30 = vld [vmem:[#allocation86_spill] sm:$0xff]  ;;  %v6376_v31 = vld [vmem:[#allocation87_spill] sm:$0xff] }
 0x10d   : > { %v615_v58 = vpack.c.bf16 %v614_v62, %v614_v62  ;;  %v6377_v62 = vld [vmem:[#allocation90_spill] sm:$0xff] }
 0x10f   : > { %945 = vmatmul.bf16.vlgmr.msrb.gmra.mxu0 %v615_v58  ;;  %971 = vmatmul.bf16.vlgmr.msrb.gmra.mxu2 %v615_v58 }
 0x110   : > { %1131 = vmatmul.bf16.vlgmr.msrb.gmra.mxu1 %v615_v58  ;;  %1157 = vmatmul.bf16.vlgmr.msrb.gmra.mxu3 %v615_v58 }
 0x111   : > { %1110 = vmatpush.bf16.msrb.mxu0 %v4588_v4  ;;  %1136 = vmatpush.bf16.msrb.mxu2 %v4603_v22 }
 0x112   : > { %1296 = vmatpush.bf16.msrb.mxu1 %v4748_v39  ;;  %1322 = vmatpush.bf16.msrb.mxu3 %v4750_v40 }
 0x115   : > { %1111 = vmatpush.bf16.msrb.mxu0 %v4595_v13  ;;  %1137 = vmatpush.bf16.msrb.mxu2 %v4615_v35 }
 0x116   : > { %1297 = vmatpush.bf16.msrb.mxu1 %v4756_v1  ;;  %1323 = vmatpush.bf16.msrb.mxu3 %v4758_v11 }
 0x119   : > { %1112 = vmatpush.bf16.msrb.mxu0 %v4607_v29  ;;  %1138 = vmatpush.bf16.msrb.mxu2 %v4621_v43 }
 0x11a   : > { %1298 = vmatpush.bf16.msrb.mxu1 %v4762_v32  ;;  %1324 = vmatpush.bf16.msrb.mxu3 %v4764_v36 }
 0x11d   : > { %1113 = vmatpush.bf16.msrb.mxu0 %v4619_v42  ;;  %1139 = vmatpush.bf16.msrb.mxu2 %v4633_v55 }
 0x11e   : > { %1299 = vmatpush.bf16.msrb.mxu1 %v4768_v44  ;;  %1325 = vmatpush.bf16.msrb.mxu3 %v4770_v50 }
 0x11f   : > { %997 = vmatmul.bf16.vlgmr.msra.gmra.mxu0 %v615_v58  ;;  %1023 = vmatmul.bf16.vlgmr.msra.gmra.mxu2 %v615_v58 }
 0x121   : > { %1114 = vmatpush.bf16.msrb.mxu0 %v6356_v48  ;;  %1140 = vmatpush.bf16.msrb.mxu2 %v6357_v52 }
 0x122   : > { %1300 = vmatpush.bf16.msrb.mxu1 %v6358_v7  ;;  %1326 = vmatpush.bf16.msrb.mxu3 %v6359_v26  ;;  %v6384_v26 = vld [vmem:[#allocation109_spill] sm:$0xff]  ;;  %v985_v7 = vpop.f32.mrf.mxu3 }
 0x125   : > { %1115 = vmatpush.bf16.msrb.mxu0 %v6360_v63  ;;  %1141 = vmatpush.bf16.msrb.mxu2 %v6361_v27 }
 0x126   : > { %1301 = vmatpush.bf16.msrb.mxu1 %v6362_v14  ;;  %1327 = vmatpush.bf16.msrb.mxu3 %v6363_v47  ;;  %v959_v47 = vpop.f32.mrf.mxu1  ;;  %v6383_v14 = vld [vmem:[#allocation107_spill] sm:$0xff] }
 0x129   : > { %1116 = vmatpush.bf16.msrb.mxu0 %v6364_v59  ;;  %1142 = vmatpush.bf16.msrb.mxu2 %v6365_v17 }
 0x12a   : > { %1302 = vmatpush.bf16.msrb.mxu1 %v4803_v23  ;;  %1328 = vmatpush.bf16.msrb.mxu3 %v6366_v34  ;;  %v6378_v34 = vld [vmem:[#allocation91_spill] sm:$0xff] }
 0x12b   : > { %v6382_v23 = vld [vmem:[#allocation99_spill] sm:$0xff] }
 0x12d   : > { %1117 = vmatpush.bf16.msrb.mxu0 %v6367_v41  ;;  %1143 = vmatpush.bf16.msrb.mxu2 %v6368_v24 }
 0x12e   : > { %1303 = vmatpush.bf16.msrb.mxu1 %v4817_v25  ;;  %1329 = vmatpush.bf16.msrb.mxu3 %v4819_v51  ;;  %v6379_v25 = vld [vmem:[#allocation94_spill] sm:$0xff]  ;;  %v6380_v51 = vld [vmem:[#allocation95_spill] sm:$0xff] }
 0x130   : > { %1118 = vmatmul.bf16.vlgmr.msrb.gmra.mxu0 %v615_v58  ;;  %1144 = vmatmul.bf16.vlgmr.msrb.gmra.mxu2 %v615_v58  ;;  %v6381_v58 = vld [vmem:[#allocation98_spill] sm:$0xff] }
 0x131   : > { %1231 = vmatpush.bf16.msra.mxu0 %v6369_v28  ;;  %1257 = vmatpush.bf16.msra.mxu2 %v6370_v33 }
 0x135   : > { %1232 = vmatpush.bf16.msra.mxu0 %v6371_v49  ;;  %1258 = vmatpush.bf16.msra.mxu2 %v6372_v5 }
 0x139   : > { %1233 = vmatpush.bf16.msra.mxu0 %v6373_v10  ;;  %1259 = vmatpush.bf16.msra.mxu2 %v6374_v6 }
 0x13d   : > { %1234 = vmatpush.bf16.msra.mxu0 %v6375_v30  ;;  %1260 = vmatpush.bf16.msra.mxu2 %v6376_v31 }
 0x141   : > { %1235 = vmatpush.bf16.msra.mxu0 %v6377_v62  ;;  %1261 = vmatpush.bf16.msra.mxu2 %v6378_v34 }
 0x145   : > { %1236 = vmatpush.bf16.msra.mxu0 %v6379_v25  ;;  %1262 = vmatpush.bf16.msra.mxu2 %v6380_v51 }
 0x149   : > { %1237 = vmatpush.bf16.msra.mxu0 %v6381_v58  ;;  %1263 = vmatpush.bf16.msra.mxu2 %v6382_v23  ;;  %v961_v58 = vpop.f32.mrf.mxu1  ;;  %v6385_v23 = vld [vmem:[#allocation110_spill] sm:$0xff] }
 0x14d   : > { %1238 = vmatpush.bf16.msra.mxu0 %v4825_v20  ;;  %1264 = vmatpush.bf16.msra.mxu2 %v4829_v3  ;;  %v6386_v20 = vld [vmem:[#allocation111_spill] sm:$0xff] }
 0x151   : > { %1283 = vmatpush.bf16.msrb.mxu0 %v4831_v2  ;;  %1309 = vmatpush.bf16.msrb.mxu2 %v4835_v54  ;;  %v987_v54 = vpop.f32.mrf.mxu3  ;;  %v1011_v2 = vpop.f32.mrf.mxu1 }
 0x155   : > { %1284 = vmatpush.bf16.msrb.mxu0 %v4841_v56  ;;  %1310 = vmatpush.bf16.msrb.mxu2 %v6383_v14 }
 0x159   : > { %1285 = vmatpush.bf16.msrb.mxu0 %v4849_v8  ;;  %1311 = vmatpush.bf16.msrb.mxu2 %v6384_v26  ;;  %v1037_v26 = vpop.f32.mrf.mxu3  ;;  %v1013_v58 = vpop.f32.mrf.mxu1  ;;  %v6387_v8 = vld [vmem:[#allocation118_spill] sm:$0xff] }
 0x15d   : > { %1286 = vmatpush.bf16.msrb.mxu0 %v6385_v23  ;;  %1312 = vmatpush.bf16.msrb.mxu2 %v6386_v20  ;;  %v6388_v20 = vld [vmem:[#allocation119_spill] sm:$0xff] }
 0x15e   : > { %v317_v23 = vld [vmem:[#allocation4] sm:$0xf] }
 0x15f   : > { %v4995_v56 = vperm.slane %v317_v23, 1 }
 0x161   : > { %1287 = vmatpush.bf16.msrb.mxu0 %v4869_v18  ;;  %1313 = vmatpush.bf16.msrb.mxu2 %v4872_v12  ;;  %v1039_v18 = vpop.f32.mrf.mxu3  ;;  %v4992_v12 = vperm.slane %v317_v23, 0  ;;  %6390 = vst [vmem:[#allocation44_spill] sm:$0xff] %v4995_v56 }
 0x163   : > { %6389 = vst [vmem:[#allocation40_spill] sm:$0xff] %v4992_v12 }
 0x165   : > { %1288 = vmatpush.bf16.msrb.mxu0 %v4878_v21  ;;  %1314 = vmatpush.bf16.msrb.mxu2 %v4881_v46 }
 0x169   : > { %1289 = vmatpush.bf16.msrb.mxu0 %v4886_v45  ;;  %1315 = vmatpush.bf16.msrb.mxu2 %v4889_v9 }
 0x16d   : > { %1290 = vmatpush.bf16.msrb.mxu0 %v6387_v8  ;;  %1316 = vmatpush.bf16.msrb.mxu2 %v6388_v20  ;;  %v3705_v8 = vld [vmem:[%s4569_s12 + $0x28] sm:$0xff] }
 0x18c   : > { %v946_v54 = vpop.f32.mrf.mxu0 }
 0x18d   : > { %v947_v21 = vadd.f32 %v946_v54, %v4992_v12  ;;  %v1132_v14 = vpop.f32.mrf.mxu1 }
 0x18e   : > { %v1163_v44 = vadd.f32 %v3705_v8, %v1132_v14 }
 0x18f   : > { %v960_v46 = vadd.f32 %v959_v47, %v947_v21  ;;  %v4999_v21 = vperm.slane %v317_v23, 2 }
 0x190   : > { %v3709_v47 = vmul.f32 -1.442695, %v1163_v44 }
 0x191   : > { %v3701_v45 = vmul.f32 -1.442695, %v960_v46  ;;  %6391 = vst [vmem:[#allocation43_spill] sm:$0xff] %v4999_v21 }
 0x192   : > { %v972_v9 = vpop.f32.mrf.mxu2 }
 0x193   : > { %3992 = vpow2.f32 %v3701_v45  ;;  %v973_v58 = vadd.f32 %v972_v9, %v4995_v56  ;;  %v1158_v3 = vpop.f32.mrf.mxu3 }
 0x194   : > { %v948_v50 = vpop.f32.mrf.mxu0 }
 0x195   : > { %v986_v20 = vadd.f32 %v985_v7, %v973_v58  ;;  %v1134_v18 = vpop.f32.mrf.mxu1  ;;  %v3707_v50 = vld [vmem:[%s4569_s12 + $0x38] sm:$0xff]  ;;  %v5003_v58 = vperm.slane %v317_v23, 3 }
 0x197   : > { %v3702_v51 = vmul.f32 -1.442695, %v986_v20  ;;  %6392 = vst [vmem:[#allocation48_spill] sm:$0xff] %v5003_v58  ;;  %v1165_v20 = vadd.f32 %v3707_v50, %v1158_v3 }
 0x199   : > { %v3993_v25 = vpop.eup %3992  ;;  %3994 = vpow2.f32 %v3702_v51  ;;  %v3710_v36 = vmul.f32 -1.442695, %v1165_v20 }
 0x19a   : > { %v1044_v54 = vadd.f32 1.0, %v3993_v25  ;;  %v974_v12 = vpop.f32.mrf.mxu2 }
 0x19b   : > { %v1160_v46 = vpop.f32.mrf.mxu3 }
 0x19c   : > { %3996 = vrcp.f32 %v1044_v54  ;;  %v998_v45 = vpop.f32.mrf.mxu0  ;;  %v1056_v32 = vand.u32 2147483648, %v1044_v54  ;;  %vm1050_vm13 = vweird.f32 %v1044_v54 }
 0x19d   : > { %v999_v9 = vadd.f32 %v998_v45, %v4999_v21  ;;  %3998 = vpow2.f32 %v3709_v47  ;;  %v1054_v47 = vand.u32 2147483647, %v1044_v54 }
 0x19e   : > { %v1057_v50 = vor.u32 1.1754944e-38, %v1056_v32 }
 0x19f   : > { %v3995_v56 = vpop.eup %3994  ;;  %v1012_v51 = vadd.f32 %v1011_v2, %v999_v9  ;;  %vm1055_vm15 = vcmp.eq.f32.partialorder %v1054_v47, 8.507059e+37 }
 0x1a0   : > { %v1063_v7 = vadd.f32 1.0, %v3995_v56 }
 0x1a2   : > { %v3997_v8 = vpop.eup %3996  ;;  %4000 = vrcp.f32 %v1063_v7  ;;  %v1024_v25 = vpop.f32.mrf.mxu2  ;;  %vm1069_vm1 = vweird.f32 %v1063_v7 }
 0x1a3   : > { %v1046_v12 = vmul.f32 %v3997_v8, %v1044_v54  ;;  %v3999_v18 = vpop.eup %3998  ;;  %v1025_v46 = vadd.f32 %v1024_v25, %v5003_v58  ;;  %4002 = vtanh.f32 %v1012_v51  ;;  %vm1051_vm12 = vweird.f32 %v3997_v8  ;;  %v3704_v51 = vld [vmem:[%s4569_s12 + $0x20] sm:$0xff] }
 0x1a4   : > { %v1000_v14 = vpop.f32.mrf.mxu0  ;;  %v5006_v21 = vadd.f32 1.0, %v3999_v18  ;;  %4004 = vpow2.f32 %v3710_v36  ;;  %vm1052_vm14 = vmor %vm1050_vm13, %vm1051_vm12 }
 0x1a5   : > { %v1047_v44 = vsub.f32 1.0, %v1046_v12  ;;  %v1038_v23 = vadd.f32 %v1037_v26, %v1025_v46  ;;  %v1075_v26 = vand.u32 2147483648, %v1063_v7  ;;  %v1073_v46 = vand.u32 2147483647, %v1063_v7 }
 0x1a6   : > { %vm1194_vm9 = vweird.f32 %v5006_v21 }
 0x1a7   : > { %v1048_v45 = vmul.f32 %v3997_v8, %v1047_v44  ;;  %v3703_v9 = vmul.f32 -1.442695, %v1038_v23  ;;  %vm1074_vm3 = vcmp.eq.f32.partialorder %v1073_v46, 8.507059e+37 }
 0x1a8   : > { %v4001_v56 = vpop.eup %4000 }
 0x1a9   : > { %v1065_v3 = vmul.f32 %v4001_v56, %v1063_v7  ;;  %v1049_v2 = vadd.f32 %v3997_v8, %v1048_v45  ;;  %4006 = vpow2.f32 %v3703_v9  ;;  %v4003_v14 = vpop.eup %4002  ;;  %vm1070_vm0 = vweird.f32 %v4001_v56 }
 0x1aa   : > { %v1026_v12 = vpop.f32.mrf.mxu2  ;;  %4008 = vrcp.f32 %v5006_v21  ;;  %v4005_v32 = vpop.eup %4004  ;;  %vm1071_vm2 = vmor %vm1069_vm1, %vm1070_vm0 }
 0x1ab   : > { %v1066_v25 = vsub.f32 1.0, %v1065_v3  ;;  %v1053_v20 = vsel %vm1052_vm14, %v3997_v8, %v1049_v2  ;;  %v1076_v3 = vor.u32 1.1754944e-38, %v1075_v26  ;;  %v330_v8 = vld [vmem:[#allocation8] sm:$0xff]  ;;  %v5016_v26 = vadd.f32 1.0, %v4005_v32 }
 0x1ac   : > { %v1058_v44 = vsel %vm1055_vm15, %v1057_v50, %v1053_v20 }
 0x1ad   : > { %v1067_v18 = vmul.f32 %v4001_v56, %v1066_v25  ;;  %v1100_v45 = vmul.f32 %v4003_v14, %v1058_v44  ;;  %v1119_v54 = vpop.f32.mrf.mxu0  ;;  %vm1214_vm1 = vweird.f32 %v5016_v26 }
 0x1ae   : > { %v1162_v23 = vadd.f32 %v3704_v51, %v1119_v54 }
 0x1af   : > { %v1068_v36 = vadd.f32 %v4001_v56, %v1067_v18  ;;  %v4007_v2 = vpop.eup %4006 }
 0x1b0   : > { %v3708_v47 = vmul.f32 -1.442695, %v1162_v23  ;;  %v5010_v12 = vpop.eup %4008  ;;  %v1083_v50 = vadd.f32 1.0, %v4007_v2 }
 0x1b1   : > { %v1072_v9 = vsel %vm1071_vm2, %v4001_v56, %v1068_v36  ;;  %v1190_v14 = vmul.f32 %v5010_v12, %v5006_v21  ;;  %vm1195_vm6 = vweird.f32 %v5010_v12 }
 0x1b2   : > { %v1077_v58 = vsel %vm1074_vm3, %v1076_v3, %v1072_v9  ;;  %4010 = vpow2.f32 %v3708_v47  ;;  %v1095_v3 = vand.u32 2147483648, %v1083_v50  ;;  %v1093_v32 = vand.u32 2147483647, %v1083_v50  ;;  %vm5031_vm10 = vmor %vm1194_vm9, %vm1195_vm6 }
 0x1b3   : > { %v1099_v25 = vmul.f32 %v1077_v58, %v330_v8  ;;  %v1145_v20 = vpop.f32.mrf.mxu2  ;;  %4012 = vrcp.f32 %v1083_v50  ;;  %v1191_v46 = vsub.f32 1.0, %v1190_v14  ;;  %vm1089_vm5 = vweird.f32 %v1083_v50 }
 0x1b4   : > { %4014 = vrcp.f32 %v5016_v26  ;;  %vm1094_vm8 = vcmp.eq.f32.partialorder %v1093_v32, 8.507059e+37 }
 0x1b5   : > { %v5012_v51 = vadd.f32 %v1100_v45, %v1099_v25  ;;  %v1121_v7 = vpop.f32.mrf.mxu0  ;;  %v1192_v36 = vmul.f32 %v5010_v12, %v1191_v46  ;;  %v3706_v45 = vld [vmem:[%s4569_s12 + $0x30] sm:$0xff]  ;;  %v1200_v46 = vand.u32 2147483648, %v5006_v21 }
 0x1b6   : > { %v1164_v9 = vadd.f32 %v3706_v45, %v1145_v20 }
 0x1b7   : > { %6393 = vst [vmem:[#allocation120_spill] sm:$0xff] %v5012_v51  ;;  %v1193_v14 = vadd.f32 %v5010_v12, %v1192_v36  ;;  %v1201_v32 = vor.u32 1.1754944e-38, %v1200_v46 }
 0x1b8   : > { %v4011_v44 = vpop.eup %4010 }
 0x1b9   : > { %v1169_v56 = vadd.f32 1.0, %v4011_v44  ;;  %v4013_v18 = vpop.eup %4012  ;;  %v1096_v44 = vor.u32 1.1754944e-38, %v1095_v3 }
 0x1ba   : > { %v1085_v54 = vmul.f32 %v4013_v18, %v1083_v50  ;;  %vm1090_vm4 = vweird.f32 %v4013_v18  ;;  %v5022_v47 = vpop.eup %4014  ;;  %v1198_v50 = vand.u32 2147483647, %v5006_v21 }
 0x1bb   : > { %4016 = vrcp.f32 %v1169_v56  ;;  %v1147_v58 = vpop.f32.mrf.mxu2  ;;  %vm1091_vm7 = vmor %vm1089_vm5, %vm1090_vm4  ;;  %v1181_v36 = vand.u32 2147483648, %v1169_v56  ;;  %v1179_v34 = vand.u32 2147483647, %v1169_v56  ;;  %vm1175_vm12 = vweird.f32 %v1169_v56 }
 0x1bc   : > { %v1086_v23 = vsub.f32 1.0, %v1085_v54  ;;  %4018 = vtanh.f32 %v5012_v51  ;;  %v1210_v54 = vmul.f32 %v5022_v47, %v5016_v26  ;;  %vm1199_vm13 = vcmp.eq.f32.partialorder %v1198_v50, 8.507059e+37  ;;  %v6399_v50 = vld [vmem:[#allocation35_spill] sm:$0xff] }
 0x1bd   : > { %4020 = vtanh.f32 %v1164_v9  ;;  %vm1180_vm15 = vcmp.eq.f32.partialorder %v1179_v34, 8.507059e+37  ;;  %vm1215_vm0 = vweird.f32 %v5022_v47  ;;  %v1220_v34 = vand.u32 2147483648, %v5016_v26 }
 0x1be   : > { %v1087_v8 = vmul.f32 %v4013_v18, %v1086_v23  ;;  %vm1216_vm2 = vmor %vm1214_vm1, %vm1215_vm0 }
 0x1c0   : > { %v1088_v25 = vadd.f32 %v4013_v18, %v1087_v8  ;;  %v1218_v8 = vand.u32 2147483647, %v5016_v26  ;;  %v6404_v26 = vld [vmem:[#allocation41_spill] sm:$0xff] }
 0x1c1   : > { %v4017_v2 = vpop.eup %4016 }
 0x1c2   : > { %v1171_v7 = vmul.f32 %v4017_v2, %v1169_v56  ;;  %v1092_v58 = vsel %vm1091_vm7, %v4013_v18, %v1088_v25  ;;  %v4019_v23 = vpop.eup %4018  ;;  %vm1176_vm11 = vweird.f32 %v4017_v2  ;;  %v1197_v18 = vsel %vm5031_vm10, %v5010_v12, %v1193_v14 }
 0x1c3   : > { %v1097_v45 = vsel %vm1094_vm8, %v1096_v44, %v1092_v58  ;;  %v1211_v25 = vsub.f32 1.0, %v1210_v54  ;;  %vm1177_vm14 = vmor %vm1175_vm12, %vm1176_vm11  ;;  %v1182_v44 = vor.u32 1.1754944e-38, %v1181_v36  ;;  %v1202_v58 = vsel %vm1199_vm13, %v1201_v32, %v1197_v18  ;;  %v6398_v54 = vld [vmem:[#allocation34_spill] sm:$0xff]  ;;  %v6401_v36 = vld [vmem:[#allocation37_spill] sm:$0xff] }
 0x1c4   : > { %v1172_v20 = vsub.f32 1.0, %v1171_v7  ;;  %v1103_v3 = vmul.f32 %v4019_v23, %v1097_v45  ;;  %v6396_v23 = vld [vmem:[#allocation32_spill] sm:$0xff]  ;;  %v4021_v45 = vpop.eup %4020  ;;  %v1224_v46 = vmul.f32 %v1202_v58, %v4916_v53  ;;  %v1221_v18 = vor.u32 1.1754944e-38, %v1220_v34 }
 0x1c5   : > { %v1212_v12 = vmul.f32 %v5022_v47, %v1211_v25  ;;  %v6400_v53 = vld [vmem:[#allocation36_spill] sm:$0xff]  ;;  %vm1219_vm3 = vcmp.eq.f32.partialorder %v1218_v8, 8.507059e+37  ;;  %v6414_v8 = vld [vmem:[#allocation58_spill] sm:$0xff] }
 0x1c6   : > { %v1173_v51 = vmul.f32 %v4017_v2, %v1172_v20  ;;  %1104 = vst [vmem:[%s4576_s21] sm:$0xff] %v1103_v3  ;;  %v1230_v7 = vpack.c.bf16 %v1103_v3, %v1103_v3  ;;  %v6397_v20 = vld [vmem:[#allocation33_spill] sm:$0xff]  ;;  %v6413_v34 = vld [vmem:[#allocation56_spill] sm:$0xff] }
 0x1c8   : > { %v1174_v21 = vadd.f32 %v4017_v2, %v1173_v51  ;;  %1252 = vmatmul.bf16.vlgmr.msra.gmra.mxu1 %v1230_v7  ;;  %1278 = vmatmul.bf16.vlgmr.msra.gmra.mxu3 %v1230_v7 }
 0x1c9   : > { %1418 = vmatpush.bf16.msra.mxu1 %v6396_v23  ;;  %1444 = vmatpush.bf16.msra.mxu3 %v6397_v20 }
 0x1ca   : > { %v1178_v9 = vsel %vm1177_vm14, %v4017_v2, %v1174_v21  ;;  %v1213_v2 = vadd.f32 %v5022_v47, %v1212_v12  ;;  %v6402_v21 = vld [vmem:[#allocation38_spill] sm:$0xff] }
 0x1cb   : > { %v1183_v14 = vsel %vm1180_vm15, %v1182_v44, %v1178_v9  ;;  %v6403_v44 = vld [vmem:[#allocation39_spill] sm:$0xff]  ;;  %v6407_v12 = vld [vmem:[#allocation46_spill] sm:$0xff] }
 0x1cc   : > { %v1225_v51 = vmul.f32 %v4021_v45, %v1183_v14  ;;  %v1217_v3 = vsel %vm1216_vm2, %v5022_v47, %v1213_v2  ;;  %v6405_v45 = vld [vmem:[#allocation42_spill] sm:$0xff]  ;;  %v6406_v47 = vld [vmem:[#allocation45_spill] sm:$0xff]  ;;  %v6412_v2 = vld [vmem:[#allocation55_spill] sm:$0xff] }
 0x1cd   : > { %1419 = vmatpush.bf16.msra.mxu1 %v6398_v54  ;;  %1445 = vmatpush.bf16.msra.mxu3 %v6399_v50  ;;  %v1222_v25 = vsel %vm1219_vm3, %v1221_v18, %v1217_v3  ;;  %v6408_v14 = vld [vmem:[#allocation49_spill] sm:$0xff]  ;;  %v6415_v3 = vld [vmem:[#allocation59_spill] sm:$0xff]  ;;  %v6416_v18 = vld [vmem:[#allocation62_spill] sm:$0xff] }
 0x1ce   : > { %v5043_v56 = vadd.f32 %v1225_v51, %v1224_v46  ;;  %v6410_v46 = vld [vmem:[#allocation53_spill] sm:$0xff]  ;;  %v6411_v51 = vld [vmem:[#allocation54_spill] sm:$0xff] }
 0x1d0   : > { %4022 = vtanh.f32 %v5043_v56 }
 0x1d1   : > { %1420 = vmatpush.bf16.msra.mxu1 %v6400_v53  ;;  %1446 = vmatpush.bf16.msra.mxu3 %v6401_v36 }
 0x1d5   : > { %1421 = vmatpush.bf16.msra.mxu1 %v6402_v21  ;;  %1447 = vmatpush.bf16.msra.mxu3 %v6403_v44 }
 0x1d6   : > { %v4023_v32 = vpop.eup %4022 }
 0x1d7   : > { %v1228_v58 = vmul.f32 %v4023_v32, %v1222_v25  ;;  %v6417_v32 = vld [vmem:[#allocation63_spill] sm:$0xff]  ;;  %v6418_v25 = vld [vmem:[#allocation66_spill] sm:$0xff] }
 0x1d8   : > { %1304 = vmatmul.bf16.vlgmr.msrb.gmra.mxu1 %v1230_v7  ;;  %1330 = vmatmul.bf16.vlgmr.msrb.gmra.mxu3 %v1230_v7  ;;  %v6409_v7 = vld [vmem:[#allocation50_spill] sm:$0xff] }
 0x1d9   : > { %v1229_v9 = vpack.c.bf16 %v1228_v58, %v1228_v58  ;;  %1422 = vmatpush.bf16.msra.mxu1 %v6404_v26  ;;  %1448 = vmatpush.bf16.msra.mxu3 %v6405_v45  ;;  %v6419_v58 = vld [vmem:[#allocation91_spill] sm:$0xff] }
 0x1db   : > { %1239 = vmatmul.bf16.vlgmr.msra.gmra.mxu0 %v1229_v9  ;;  %1265 = vmatmul.bf16.vlgmr.msra.gmra.mxu2 %v1229_v9 }
 0x1dc   : > { %1405 = vmatpush.bf16.msra.mxu0 %v4588_v4  ;;  %1431 = vmatpush.bf16.msra.mxu2 %v4603_v22 }
 0x1dd   : > { %1423 = vmatpush.bf16.msra.mxu1 %v6406_v47  ;;  %1449 = vmatpush.bf16.msra.mxu3 %v6407_v12 }
 0x1e0   : > { %1406 = vmatpush.bf16.msra.mxu0 %v4595_v13  ;;  %1432 = vmatpush.bf16.msra.mxu2 %v4615_v35 }
 0x1e1   : > { %1424 = vmatpush.bf16.msra.mxu1 %v6408_v14  ;;  %1450 = vmatpush.bf16.msra.mxu3 %v6409_v7 }
 0x1e4   : > { %1407 = vmatpush.bf16.msra.mxu0 %v4607_v29  ;;  %1433 = vmatpush.bf16.msra.mxu2 %v4621_v43 }
 0x1e5   : > { %1425 = vmatpush.bf16.msra.mxu1 %v6410_v46  ;;  %1451 = vmatpush.bf16.msra.mxu3 %v6411_v51 }
 0x1e8   : > { %1408 = vmatpush.bf16.msra.mxu0 %v4619_v42  ;;  %1434 = vmatpush.bf16.msra.mxu2 %v4633_v55 }
 0x1e9   : > { %1539 = vmatpush.bf16.msrb.mxu1 %v6412_v2  ;;  %1565 = vmatpush.bf16.msrb.mxu3 %v6413_v34 }
 0x1ea   : > { %1426 = vmatmul.bf16.vlgmr.msra.gmra.mxu1 %v1229_v9  ;;  %1452 = vmatmul.bf16.vlgmr.msra.gmra.mxu3 %v1229_v9 }
 0x1eb   : > { %1291 = vmatmul.bf16.vlgmr.msrb.gmra.mxu0 %v1229_v9  ;;  %1317 = vmatmul.bf16.vlgmr.msrb.gmra.mxu2 %v1229_v9 }
 0x1ec   : > { %1409 = vmatpush.bf16.msra.mxu0 %v6356_v48  ;;  %1435 = vmatpush.bf16.msra.mxu2 %v6357_v52 }
 0x1ed   : > { %1540 = vmatpush.bf16.msrb.mxu1 %v6414_v8  ;;  %1566 = vmatpush.bf16.msrb.mxu3 %v6415_v3 }
 0x1f0   : > { %1410 = vmatpush.bf16.msra.mxu0 %v6360_v63  ;;  %1436 = vmatpush.bf16.msra.mxu2 %v6361_v27 }
 0x1f1   : > { %1541 = vmatpush.bf16.msrb.mxu1 %v6416_v18  ;;  %1567 = vmatpush.bf16.msrb.mxu3 %v6417_v32 }
 0x1f4   : > { %1411 = vmatpush.bf16.msra.mxu0 %v6364_v59  ;;  %1437 = vmatpush.bf16.msra.mxu2 %v6365_v17 }
 0x1f5   : > { %1542 = vmatpush.bf16.msrb.mxu1 %v6418_v25  ;;  %1568 = vmatpush.bf16.msrb.mxu3 %v4714_v0  ;;  %v3715_v0 = vld [vmem:[%s4569_s12 + $0x40] sm:$0xff] }
 0x1f8   : > { %1412 = vmatpush.bf16.msra.mxu0 %v6367_v41  ;;  %1438 = vmatpush.bf16.msra.mxu2 %v6368_v24 }
 0x1f9   : > { %1543 = vmatpush.bf16.msrb.mxu1 %v4724_v16  ;;  %1569 = vmatpush.bf16.msrb.mxu3 %v4726_v19 }
 0x1fb   : > { %1413 = vmatmul.bf16.vlgmr.msra.gmra.mxu0 %v1229_v9  ;;  %1439 = vmatmul.bf16.vlgmr.msra.gmra.mxu2 %v1229_v9  ;;  %v6420_v9 = vld [vmem:[#allocation82_spill] sm:$0xff] }
 0x1fc   : > { %1526 = vmatpush.bf16.msrb.mxu0 %v6369_v28  ;;  %1552 = vmatpush.bf16.msrb.mxu2 %v6370_v33 }
 0x1fd   : > { %1544 = vmatpush.bf16.msrb.mxu1 %v4732_v37  ;;  %1570 = vmatpush.bf16.msrb.mxu3 %v4734_v38 }
 0x200   : > { %1527 = vmatpush.bf16.msrb.mxu0 %v6371_v49  ;;  %1553 = vmatpush.bf16.msrb.mxu2 %v6372_v5 }
 0x201   : > { %1545 = vmatpush.bf16.msrb.mxu1 %v4738_v60  ;;  %1571 = vmatpush.bf16.msrb.mxu3 %v4740_v61 }
 0x204   : > { %1528 = vmatpush.bf16.msrb.mxu0 %v6373_v10  ;;  %1554 = vmatpush.bf16.msrb.mxu2 %v6374_v6 }
 0x205   : > { %1546 = vmatpush.bf16.msrb.mxu1 %v4744_v15  ;;  %1572 = vmatpush.bf16.msrb.mxu3 %v4746_v57  ;;  %v6421_v15 = vld [vmem:[#allocation83_spill] sm:$0xff]  ;;  %v6422_v57 = vld [vmem:[#allocation94_spill] sm:$0xff] }
 0x208   : > { %1529 = vmatpush.bf16.msrb.mxu0 %v6375_v30  ;;  %1555 = vmatpush.bf16.msrb.mxu2 %v6376_v31  ;;  %v6425_v30 = vld [vmem:[#allocation85_spill] sm:$0xff]  ;;  %v6426_v31 = vld [vmem:[#allocation98_spill] sm:$0xff] }
 0x209   : > { %1591 = vmatpush.bf16.msra.mxu1 %v4748_v39  ;;  %1617 = vmatpush.bf16.msra.mxu3 %v4750_v40  ;;  %v6423_v39 = vld [vmem:[#allocation95_spill] sm:$0xff]  ;;  %v6424_v40 = vld [vmem:[#allocation84_spill] sm:$0xff] }
 0x20c   : > { %1530 = vmatpush.bf16.msrb.mxu0 %v6377_v62  ;;  %1556 = vmatpush.bf16.msrb.mxu2 %v6419_v58  ;;  %v6429_v62 = vld [vmem:[#allocation89_spill] sm:$0xff]  ;;  %v6430_v58 = vld [vmem:[#allocation102_spill] sm:$0xff] }
 0x20d   : > { %1592 = vmatpush.bf16.msra.mxu1 %v4756_v1  ;;  %1618 = vmatpush.bf16.msra.mxu3 %v4758_v11  ;;  %v6427_v1 = vld [vmem:[#allocation99_spill] sm:$0xff]  ;;  %v6428_v11 = vld [vmem:[#allocation88_spill] sm:$0xff] }
 0x210   : > { %1531 = vmatpush.bf16.msrb.mxu0 %v6422_v57  ;;  %1557 = vmatpush.bf16.msrb.mxu2 %v6423_v39  ;;  %v6433_v57 = vld [vmem:[#allocation105_spill] sm:$0xff]  ;;  %v6434_v39 = vld [vmem:[#allocation92_spill] sm:$0xff] }
 0x211   : > { %1593 = vmatpush.bf16.msra.mxu1 %v6420_v9  ;;  %1619 = vmatpush.bf16.msra.mxu3 %v6421_v15  ;;  %v6431_v9 = vld [vmem:[#allocation103_spill] sm:$0xff]  ;;  %v6432_v15 = vld [vmem:[#allocation104_spill] sm:$0xff] }
 0x214   : > { %1532 = vmatpush.bf16.msrb.mxu0 %v6426_v31  ;;  %1558 = vmatpush.bf16.msrb.mxu2 %v6427_v1  ;;  %v6437_v31 = vld [vmem:[#allocation107_spill] sm:$0xff]  ;;  %v6438_v1 = vld [vmem:[#allocation96_spill] sm:$0xff] }
 0x215   : > { %1594 = vmatpush.bf16.msra.mxu1 %v6424_v40  ;;  %1620 = vmatpush.bf16.msra.mxu3 %v6425_v30  ;;  %v6435_v40 = vld [vmem:[#allocation93_spill] sm:$0xff]  ;;  %v6436_v30 = vld [vmem:[#allocation106_spill] sm:$0xff] }
 0x218   : > { %1533 = vmatpush.bf16.msrb.mxu0 %v6430_v58  ;;  %1559 = vmatpush.bf16.msrb.mxu2 %v6431_v9  ;;  %v6441_v58 = vld [vmem:[#allocation109_spill] sm:$0xff]  ;;  %v6442_v9 = vld [vmem:[#allocation100_spill] sm:$0xff] }
 0x219   : > { %1595 = vmatpush.bf16.msra.mxu1 %v6428_v11  ;;  %1621 = vmatpush.bf16.msra.mxu3 %v6429_v62  ;;  %v6439_v11 = vld [vmem:[#allocation97_spill] sm:$0xff]  ;;  %v6440_v62 = vld [vmem:[#allocation108_spill] sm:$0xff] }
 0x21c   : > { %1578 = vmatpush.bf16.msra.mxu0 %v6432_v15  ;;  %1604 = vmatpush.bf16.msra.mxu2 %v6433_v57  ;;  %v6443_v15 = vld [vmem:[#allocation101_spill] sm:$0xff]  ;;  %v6444_v57 = vld [vmem:[#allocation110_spill] sm:$0xff] }
 0x21d   : > { %1596 = vmatpush.bf16.msra.mxu1 %v6434_v39  ;;  %1622 = vmatpush.bf16.msra.mxu3 %v6435_v40  ;;  %v6445_v39 = vld [vmem:[#allocation111_spill] sm:$0xff]  ;;  %v6446_v40 = vld [vmem:[#allocation112_spill] sm:$0xff] }
 0x220   : > { %1579 = vmatpush.bf16.msra.mxu0 %v6436_v30  ;;  %1605 = vmatpush.bf16.msra.mxu2 %v6437_v31  ;;  %v6447_v30 = vld [vmem:[#allocation113_spill] sm:$0xff]  ;;  %v6448_v31 = vld [vmem:[#allocation114_spill] sm:$0xff] }
 0x221   : > { %1597 = vmatpush.bf16.msra.mxu1 %v6438_v1  ;;  %1623 = vmatpush.bf16.msra.mxu3 %v6439_v11  ;;  %v6449_v1 = vld [vmem:[#allocation115_spill] sm:$0xff]  ;;  %v6450_v11 = vld [vmem:[#allocation116_spill] sm:$0xff] }
 0x224   : > { %1580 = vmatpush.bf16.msra.mxu0 %v6440_v62  ;;  %1606 = vmatpush.bf16.msra.mxu2 %v6441_v58  ;;  %v6451_v62 = vld [vmem:[#allocation117_spill] sm:$0xff]  ;;  %v6452_v58 = vld [vmem:[#allocation118_spill] sm:$0xff] }
 0x225   : > { %1598 = vmatpush.bf16.msra.mxu1 %v6442_v9  ;;  %1624 = vmatpush.bf16.msra.mxu3 %v6443_v15  ;;  %v6453_v9 = vld [vmem:[#allocation119_spill] sm:$0xff] }
 0x228   : > { %1581 = vmatpush.bf16.msra.mxu0 %v6444_v57  ;;  %1607 = vmatpush.bf16.msra.mxu2 %v6445_v39 }
 0x22c   : > { %1582 = vmatpush.bf16.msra.mxu0 %v6446_v40  ;;  %1608 = vmatpush.bf16.msra.mxu2 %v6447_v30  ;;  %v6454_v30 = vld [vmem:[#allocation40_spill] sm:$0xff] }
 0x230   : > { %1583 = vmatpush.bf16.msra.mxu0 %v6448_v31  ;;  %1609 = vmatpush.bf16.msra.mxu2 %v6449_v1 }
 0x234   : > { %1584 = vmatpush.bf16.msra.mxu0 %v6450_v11  ;;  %1610 = vmatpush.bf16.msra.mxu2 %v6451_v62  ;;  %v6455_v62 = vld [vmem:[#allocation44_spill] sm:$0xff] }
 0x238   : > { %1585 = vmatpush.bf16.msra.mxu0 %v6452_v58  ;;  %1611 = vmatpush.bf16.msra.mxu2 %v6453_v9 }
 0x245   : > { %v1253_v15 = vpop.f32.mrf.mxu1 }
 0x24b   : > { %v1279_v57 = vpop.f32.mrf.mxu3 }
 0x24d   : > { %v1255_v6 = vpop.f32.mrf.mxu1 }
 0x24e   : > { %v3716_v6 = vld [vmem:[%s4569_s12 + $0x48] sm:$0xff] }
 0x253   : > { %v1281_v39 = vpop.f32.mrf.mxu3 }
 0x255   : > { %v1305_v40 = vpop.f32.mrf.mxu1 }
 0x258   : > { %v1240_v10 = vpop.f32.mrf.mxu0 }
 0x259   : > { %v1241_v61 = vadd.f32 %v1240_v10, %v6454_v30 }
 0x25b   : > { %v1254_v31 = vadd.f32 %v1253_v15, %v1241_v61  ;;  %v1331_v60 = vpop.f32.mrf.mxu3 }
 0x25d   : > { %v3711_v1 = vmul.f32 -1.442695, %v1254_v31  ;;  %v1307_v5 = vpop.f32.mrf.mxu1 }
 0x25e   : > { %v1266_v11 = vpop.f32.mrf.mxu2 }
 0x25f   : > { %4024 = vpow2.f32 %v3711_v1  ;;  %v1267_v49 = vadd.f32 %v1266_v11, %v6455_v62 }
 0x260   : > { %v1242_v58 = vpop.f32.mrf.mxu0 }
 0x261   : > { %v1280_v38 = vadd.f32 %v1279_v57, %v1267_v49  ;;  %v3718_v57 = vld [vmem:[%s4569_s12 + $0x58] sm:$0xff] }
 0x263   : > { %v3712_v9 = vmul.f32 -1.442695, %v1280_v38  ;;  %v1333_v37 = vpop.f32.mrf.mxu3 }
 0x265   : > { %v4025_v33 = vpop.eup %4024  ;;  %4026 = vpow2.f32 %v3712_v9 }
 0x266   : > { %v5149_v39 = vadd.f32 1.0, %v4025_v33  ;;  %v1268_v10 = vpop.f32.mrf.mxu2  ;;  %v6456_v33 = vld [vmem:[#allocation48_spill] sm:$0xff] }
 0x267   : > { %v1427_v28 = vpop.f32.mrf.mxu1 }
 0x268   : > { %v1458_v15 = vadd.f32 %v3716_v6, %v1427_v28  ;;  %4028 = vrcp.f32 %v5149_v39  ;;  %v1292_v61 = vpop.f32.mrf.mxu0  ;;  %vm1344_vm6 = vweird.f32 %v5149_v39 }
 0x26a   : > { %v3720_v5 = vmul.f32 -1.442695, %v1458_v15 }
 0x26b   : > { %v4027_v1 = vpop.eup %4026 }
 0x26c   : > { %4030 = vpow2.f32 %v3720_v5  ;;  %v1357_v11 = vadd.f32 1.0, %v4027_v1  ;;  %v6457_v5 = vld [vmem:[#allocation43_spill] sm:$0xff] }
 0x26d   : > { %v1453_v31 = vpop.f32.mrf.mxu3  ;;  %v1293_v1 = vadd.f32 %v1292_v61, %v6457_v5 }
 0x26e   : > { %v4029_v38 = vpop.eup %4028  ;;  %4032 = vrcp.f32 %v1357_v11  ;;  %v1318_v49 = vpop.f32.mrf.mxu2  ;;  %v1460_v10 = vadd.f32 %v3718_v57, %v1453_v31  ;;  %v1350_v57 = vand.u32 2147483648, %v5149_v39  ;;  %vm1363_vm7 = vweird.f32 %v1357_v11 }
 0x26f   : > { %v1429_v37 = vpop.f32.mrf.mxu1  ;;  %v1340_v58 = vmul.f32 %v4029_v38, %v5149_v39  ;;  %v1319_v9 = vadd.f32 %v1318_v49, %v6456_v33  ;;  %v1306_v31 = vadd.f32 %v1305_v40, %v1293_v1  ;;  %vm1345_vm4 = vweird.f32 %v4029_v38 }
 0x270   : > { %v1294_v28 = vpop.f32.mrf.mxu0  ;;  %v3721_v16 = vmul.f32 -1.442695, %v1460_v10  ;;  %vm5163_vm8 = vmor %vm1344_vm6, %vm1345_vm4 }
 0x271   : > { %v1341_v62 = vsub.f32 1.0, %v1340_v58  ;;  %v1332_v30 = vadd.f32 %v1331_v60, %v1319_v9  ;;  %v1369_v60 = vand.u32 2147483648, %v1357_v11 }
 0x272   : > { %v4031_v6 = vpop.eup %4030 }
 0x273   : > { %v5155_v15 = vadd.f32 1.0, %v4031_v6  ;;  %v3713_v24 = vmul.f32 -1.442695, %v1332_v30  ;;  %v1342_v19 = vmul.f32 %v4029_v38, %v1341_v62  ;;  %v1367_v62 = vand.u32 2147483647, %v1357_v11 }
 0x274   : > { %v4033_v41 = vpop.eup %4032  ;;  %v1351_v6 = vor.u32 1.1754944e-38, %v1350_v57 }
 0x275   : > { %v1455_v37 = vpop.f32.mrf.mxu3  ;;  %v1359_v17 = vmul.f32 %v4033_v41, %v1357_v11  ;;  %4034 = vpow2.f32 %v3713_v24  ;;  %v1343_v58 = vadd.f32 %v4029_v38, %v1342_v19  ;;  %vm1364_vm5 = vweird.f32 %v4033_v41 }
 0x276   : > { %v1320_v59 = vpop.f32.mrf.mxu2  ;;  %4036 = vrcp.f32 %v5155_v15  ;;  %vm1365_vm9 = vmor %vm1363_vm7, %vm1364_vm5  ;;  %vm1368_vm10 = vcmp.eq.f32.partialorder %v1367_v62, 8.507059e+37  ;;  %vm1489_vm1 = vweird.f32 %v5155_v15 }
 0x277   : > { %v1360_v49 = vsub.f32 1.0, %v1359_v17  ;;  %4038 = vpow2.f32 %v3721_v16  ;;  %v1348_v59 = vand.u32 2147483647, %v5149_v39  ;;  %v1370_v16 = vor.u32 1.1754944e-38, %v1369_v60  ;;  %v6460_v60 = vld [vmem:[#allocation120_spill] sm:$0xff] }
 0x278   : > { %v1414_v61 = vpop.f32.mrf.mxu0  ;;  %4040 = vtanh.f32 %v1306_v31  ;;  %v1347_v10 = vsel %vm5163_vm8, %v4029_v38, %v1343_v58 }
 0x279   : > { %v1361_v30 = vmul.f32 %v4033_v41, %v1360_v49  ;;  %v1457_v9 = vadd.f32 %v3715_v0, %v1414_v61  ;;  %vm1349_vm11 = vcmp.eq.f32.partialorder %v1348_v59, 8.507059e+37 }
 0x27a   : > { %v1352_v49 = vsel %vm1349_vm11, %v1351_v6, %v1347_v10  ;;  %v3717_v6 = vld [vmem:[%s4569_s12 + $0x50] sm:$0xff] }
 0x27b   : > { %v4035_v24 = vpop.eup %4034  ;;  %v1362_v40 = vadd.f32 %v4033_v41, %v1361_v30  ;;  %v3719_v19 = vmul.f32 -1.442695, %v1457_v9 }
 0x27c   : > { %v1377_v28 = vadd.f32 1.0, %v4035_v24  ;;  %v5169_v0 = vpop.eup %4036 }
 0x27d   : > { %v1366_v1 = vsel %vm1365_vm9, %v4033_v41, %v1362_v40  ;;  %4042 = vpow2.f32 %v3719_v19  ;;  %v4039_v39 = vpop.eup %4038  ;;  %v1485_v31 = vmul.f32 %v5169_v0, %v5155_v15  ;;  %vm1490_vm14 = vweird.f32 %v5169_v0 }
 0x27e   : > { %v1371_v11 = vsel %vm1368_vm10, %v1370_v16, %v1366_v1  ;;  %4044 = vrcp.f32 %v1377_v28  ;;  %v1440_v37 = vpop.f32.mrf.mxu2  ;;  %v4041_v38 = vpop.eup %4040  ;;  %v5174_v58 = vadd.f32 1.0, %v4039_v39  ;;  %v1389_v10 = vand.u32 2147483648, %v1377_v28  ;;  %vm5190_vm2 = vmor %vm1489_vm1, %vm1490_vm14 }
 0x27f   : > { %v1393_v61 = vmul.f32 %v1371_v11, %v6460_v60  ;;  %v1394_v57 = vmul.f32 %v4041_v38, %v1352_v49  ;;  %v1486_v9 = vsub.f32 1.0, %v1485_v31  ;;  %v1387_v39 = vand.u32 2147483647, %v1377_v28 }
 0x280   : > { %v1416_v30 = vpop.f32.mrf.mxu0  ;;  %4046 = vrcp.f32 %v5174_v58  ;;  %vm1383_vm13 = vweird.f32 %v1377_v28  ;;  %v1459_v60 = vadd.f32 %v3717_v6, %v1440_v37  ;;  %vm1509_vm9 = vweird.f32 %v5174_v58 }
 0x281   : > { %v5176_v24 = vadd.f32 %v1394_v57, %v1393_v61  ;;  %v1487_v16 = vmul.f32 %v5169_v0, %v1486_v9  ;;  %v1390_v30 = vor.u32 1.1754944e-38, %v1389_v10  ;;  %vm1388_vm0 = vcmp.eq.f32.partialorder %v1387_v39, 8.507059e+37 }
 0x282   : > { %v1495_v9 = vand.u32 2147483648, %v5155_v15 }
 0x283   : > { %v4043_v41 = vpop.eup %4042  ;;  %v1488_v61 = vadd.f32 %v5169_v0, %v1487_v16 }
 0x284   : > { %v4045_v62 = vpop.eup %4044  ;;  %v1464_v59 = vadd.f32 1.0, %v4043_v41 }
 0x285   : > { %v1379_v17 = vmul.f32 %v4045_v62, %v1377_v28  ;;  %vm1384_vm12 = vweird.f32 %v4045_v62  ;;  %v1492_v10 = vsel %vm5190_vm2, %v5169_v0, %v1488_v61 }
 0x286   : > { %4048 = vrcp.f32 %v1464_v59  ;;  %v1442_v40 = vpop.f32.mrf.mxu2  ;;  %v5182_v11 = vpop.eup %4046  ;;  %vm1385_vm15 = vmor %vm1383_vm13, %vm1384_vm12  ;;  %vm1470_vm4 = vweird.f32 %v1464_v59 }
 0x287   : > { %v1380_v19 = vsub.f32 1.0, %v1379_v17  ;;  %4050 = vtanh.f32 %v5176_v24  ;;  %v1505_v28 = vmul.f32 %v5182_v11, %v5174_v58  ;;  %vm1510_vm8 = vweird.f32 %v5182_v11 }
 0x288   : > { %4052 = vtanh.f32 %v1459_v60  ;;  %v1513_v40 = vand.u32 2147483647, %v5174_v58  ;;  %vm1511_vm10 = vmor %vm1509_vm9, %vm1510_vm8 }
 0x289   : > { %v1381_v1 = vmul.f32 %v4045_v62, %v1380_v19  ;;  %v1493_v19 = vand.u32 2147483647, %v5155_v15 }
 0x28a   : > { %vm1514_vm11 = vcmp.eq.f32.partialorder %v1513_v40, 8.507059e+37  ;;  %v6481_v40 = vld [vmem:[#allocation77_spill] sm:$0xff] }
 0x28b   : > { %v1382_v49 = vadd.f32 %v4045_v62, %v1381_v1  ;;  %v1474_v1 = vand.u32 2147483647, %v1464_v59  ;;  %vm1494_vm5 = vcmp.eq.f32.partialorder %v1493_v19, 8.507059e+37 }
 0x28c   : > { %v4049_v31 = vpop.eup %4048 }
 0x28d   : > { %v1466_v38 = vmul.f32 %v4049_v31, %v1464_v59  ;;  %v1386_v57 = vsel %vm1385_vm15, %v4045_v62, %v1382_v49  ;;  %v4051_v41 = vpop.eup %4050  ;;  %v1476_v62 = vand.u32 2147483648, %v1464_v59  ;;  %vm1471_vm3 = vweird.f32 %v4049_v31 }
 0x28e   : > { %v1391_v17 = vsel %vm1388_vm0, %v1390_v30, %v1386_v57  ;;  %v1496_v49 = vor.u32 1.1754944e-38, %v1495_v9  ;;  %v1506_v30 = vsub.f32 1.0, %v1505_v28  ;;  %vm1472_vm6 = vmor %vm1470_vm4, %vm1471_vm3  ;;  %vm1475_vm7 = vcmp.eq.f32.partialorder %v1474_v1, 8.507059e+37  ;;  %v4053_v60 = vpop.eup %4052  ;;  %v6466_v1 = vld [vmem:[#allocation70_spill] sm:$0xff] }
 0x28f   : > { %v1467_v37 = vsub.f32 1.0, %v1466_v38  ;;  %v1397_v16 = vmul.f32 %v4051_v41, %v1391_v17  ;;  %v1477_v15 = vor.u32 1.1754944e-38, %v1476_v62 }
 0x290   : > { %v1497_v38 = vsel %vm1494_vm5, %v1496_v49, %v1492_v10  ;;  %v1507_v61 = vmul.f32 %v5182_v11, %v1506_v30  ;;  %v6468_v49 = vld [vmem:[#allocation51_spill] sm:$0xff]  ;;  %v6469_v30 = vld [vmem:[#allocation57_spill] sm:$0xff] }
 0x291   : > { %v1468_v6 = vmul.f32 %v4049_v31, %v1467_v37  ;;  %3714 = vst [vmem:[%s4576_s21 + $0x8] sm:$0xff] %v1397_v16  ;;  %v1525_v39 = vpack.c.bf16 %v1397_v16, %v1397_v16  ;;  %v1519_v9 = vmul.f32 %v1497_v38, %v5043_v56  ;;  %v6472_v38 = vld [vmem:[#allocation72_spill] sm:$0xff] }
 0x292   : > { %v1508_v17 = vadd.f32 %v5182_v11, %v1507_v61  ;;  %v6475_v61 = vld [vmem:[#allocation65_spill] sm:$0xff] }
 0x293   : > { %v1469_v57 = vadd.f32 %v4049_v31, %v1468_v6  ;;  %1547 = vmatmul.bf16.vlgmr.msrb.gmra.mxu1 %v1525_v39  ;;  %1573 = vmatmul.bf16.vlgmr.msrb.gmra.mxu3 %v1525_v39  ;;  %v6465_v6 = vld [vmem:[#allocation52_spill] sm:$0xff] }
 0x294   : > { %1713 = vmatpush.bf16.msrb.mxu1 %v6396_v23  ;;  %1739 = vmatpush.bf16.msrb.mxu3 %v6397_v20  ;;  %v1512_v56 = vsel %vm1511_vm10, %v5182_v11, %v1508_v17  ;;  %v6464_v11 = vld [vmem:[#allocation47_spill] sm:$0xff]  ;;  %v6479_v17 = vld [vmem:[#allocation69_spill] sm:$0xff] }
 0x295   : > { %v1473_v0 = vsel %vm1472_vm6, %v4049_v31, %v1469_v57  ;;  %v1515_v31 = vand.u32 2147483648, %v5174_v58  ;;  %v6463_v58 = vld [vmem:[#allocation67_spill] sm:$0xff]  ;;  %v6470_v57 = vld [vmem:[#allocation60_spill] sm:$0xff] }
 0x296   : > { %v1478_v41 = vsel %vm1475_vm7, %v1477_v15, %v1473_v0  ;;  %v6471_v15 = vld [vmem:[#allocation61_spill] sm:$0xff] }
 0x297   : > { %v1520_v28 = vmul.f32 %v4053_v60, %v1478_v41  ;;  %v1516_v37 = vor.u32 1.1754944e-38, %v1515_v31  ;;  %v6473_v0 = vld [vmem:[#allocation73_spill] sm:$0xff]  ;;  %v6474_v60 = vld [vmem:[#allocation64_spill] sm:$0xff]  ;;  %v6476_v41 = vld [vmem:[#allocation74_spill] sm:$0xff] }
 0x298   : > { %1714 = vmatpush.bf16.msrb.mxu1 %v6398_v54  ;;  %1740 = vmatpush.bf16.msrb.mxu3 %v6399_v50  ;;  %v6480_v31 = vld [vmem:[#allocation76_spill] sm:$0xff] }
 0x299   : > { %v5205_v59 = vadd.f32 %v1520_v28, %v1519_v9  ;;  %v1517_v16 = vsel %vm1514_vm11, %v1516_v37, %v1512_v56  ;;  %v6477_v9 = vld [vmem:[#allocation75_spill] sm:$0xff]  ;;  %v6478_v28 = vld [vmem:[#allocation68_spill] sm:$0xff]  ;;  %v6482_v56 = vld [vmem:[#allocation78_spill] sm:$0xff] }
 0x29a   : > { %v6483_v37 = vld [vmem:[#allocation79_spill] sm:$0xff] }
 0x29b   : > { %4054 = vtanh.f32 %v5205_v59 }
 0x29c   : > { %1715 = vmatpush.bf16.msrb.mxu1 %v6400_v53  ;;  %1741 = vmatpush.bf16.msrb.mxu3 %v6401_v36 }
 0x2a0   : > { %1716 = vmatpush.bf16.msrb.mxu1 %v6402_v21  ;;  %1742 = vmatpush.bf16.msrb.mxu3 %v6403_v44 }
 0x2a1   : > { %v4055_v19 = vpop.eup %4054 }
 0x2a2   : > { %v1523_v62 = vmul.f32 %v4055_v19, %v1517_v16  ;;  %v6484_v19 = vld [vmem:[#allocation86_spill] sm:$0xff]  ;;  %v6485_v16 = vld [vmem:[#allocation87_spill] sm:$0xff] }
 0x2a3   : > { %1599 = vmatmul.bf16.vlgmr.msra.gmra.mxu1 %v1525_v39  ;;  %1625 = vmatmul.bf16.vlgmr.msra.gmra.mxu3 %v1525_v39  ;;  %v6467_v39 = vld [vmem:[#allocation71_spill] sm:$0xff] }
 0x2a4   : > { %v1524_v10 = vpack.c.bf16 %v1523_v62, %v1523_v62  ;;  %1717 = vmatpush.bf16.msrb.mxu1 %v6404_v26  ;;  %1743 = vmatpush.bf16.msrb.mxu3 %v6405_v45  ;;  %v6486_v62 = vld [vmem:[#allocation80_spill] sm:$0xff] }
 0x2a6   : > { %1534 = vmatmul.bf16.vlgmr.msrb.gmra.mxu0 %v1524_v10  ;;  %1560 = vmatmul.bf16.vlgmr.msrb.gmra.mxu2 %v1524_v10 }
 0x2a7   : > { %1700 = vmatpush.bf16.msrb.mxu0 %v4588_v4  ;;  %1726 = vmatpush.bf16.msrb.mxu2 %v4603_v22 }
 0x2a8   : > { %1718 = vmatpush.bf16.msrb.mxu1 %v6406_v47  ;;  %1744 = vmatpush.bf16.msrb.mxu3 %v6407_v12 }
 0x2ab   : > { %1701 = vmatpush.bf16.msrb.mxu0 %v4595_v13  ;;  %1727 = vmatpush.bf16.msrb.mxu2 %v4615_v35 }
 0x2ac   : > { %1719 = vmatpush.bf16.msrb.mxu1 %v6408_v14  ;;  %1745 = vmatpush.bf16.msrb.mxu3 %v6409_v7 }
 0x2af   : > { %1702 = vmatpush.bf16.msrb.mxu0 %v4607_v29  ;;  %1728 = vmatpush.bf16.msrb.mxu2 %v4621_v43 }
 0x2b0   : > { %1720 = vmatpush.bf16.msrb.mxu1 %v6410_v46  ;;  %1746 = vmatpush.bf16.msrb.mxu3 %v6411_v51 }
 0x2b3   : > { %1703 = vmatpush.bf16.msrb.mxu0 %v4619_v42  ;;  %1721 = vmatmul.bf16.vlgmr.msrb.gmra.mxu1 %v1524_v10 }
 0x2b4   : > { %1834 = vmatpush.bf16.msra.mxu1 %v6412_v2  ;;  %1860 = vmatpush.bf16.msra.mxu3 %v6413_v34 }
 0x2b5   : > { %1729 = vmatpush.bf16.msrb.mxu2 %v4633_v55  ;;  %1747 = vmatmul.bf16.vlgmr.msrb.gmra.mxu3 %v1524_v10 }
 0x2b6   : > { %1586 = vmatmul.bf16.vlgmr.msra.gmra.mxu0 %v1524_v10  ;;  %1612 = vmatmul.bf16.vlgmr.msra.gmra.mxu2 %v1524_v10 }
 0x2b7   : > { %1704 = vmatpush.bf16.msrb.mxu0 %v6356_v48 }
 0x2b8   : > { %1835 = vmatpush.bf16.msra.mxu1 %v6414_v8  ;;  %1861 = vmatpush.bf16.msra.mxu3 %v6415_v3 }
 0x2b9   : > { %1730 = vmatpush.bf16.msrb.mxu2 %v6357_v52 }
 0x2bb   : > { %1705 = vmatpush.bf16.msrb.mxu0 %v6360_v63 }
 0x2bc   : > { %1836 = vmatpush.bf16.msra.mxu1 %v6416_v18  ;;  %1862 = vmatpush.bf16.msra.mxu3 %v6417_v32 }
 0x2bd   : > { %1731 = vmatpush.bf16.msrb.mxu2 %v6361_v27 }
 0x2bf   : > { %1706 = vmatpush.bf16.msrb.mxu0 %v6464_v11 }
 0x2c0   : > { %1837 = vmatpush.bf16.msra.mxu1 %v6418_v25  ;;  %1863 = vmatpush.bf16.msra.mxu3 %v6463_v58 }
 0x2c1   : > { %1732 = vmatpush.bf16.msrb.mxu2 %v6465_v6 }
 0x2c3   : > { %1707 = vmatpush.bf16.msrb.mxu0 %v6468_v49 }
 0x2c4   : > { %1838 = vmatpush.bf16.msra.mxu1 %v6466_v1  ;;  %1864 = vmatpush.bf16.msra.mxu3 %v6467_v39 }
 0x2c5   : > { %1733 = vmatpush.bf16.msrb.mxu2 %v6469_v30 }
 0x2c6   : > { %1708 = vmatmul.bf16.vlgmr.msrb.gmra.mxu0 %v1524_v10 }
 0x2c7   : > { %1821 = vmatpush.bf16.msra.mxu0 %v6470_v57 }
 0x2c8   : > { %1839 = vmatpush.bf16.msra.mxu1 %v6472_v38  ;;  %1865 = vmatpush.bf16.msra.mxu3 %v6473_v0 }
 0x2c9   : > { %1847 = vmatpush.bf16.msra.mxu2 %v6471_v15 }
 0x2ca   : > { %1734 = vmatmul.bf16.vlgmr.msrb.gmra.mxu2 %v1524_v10  ;;  %v6487_v10 = vld [vmem:[#allocation81_spill] sm:$0xff] }
 0x2cb   : > { %1822 = vmatpush.bf16.msra.mxu0 %v6474_v60 }
 0x2cc   : > { %1840 = vmatpush.bf16.msra.mxu1 %v6476_v41  ;;  %1866 = vmatpush.bf16.msra.mxu3 %v6477_v9  ;;  %v6488_v9 = vld [vmem:[#allocation90_spill] sm:$0xff] }
 0x2cd   : > { %1848 = vmatpush.bf16.msra.mxu2 %v6475_v61 }
 0x2cf   : > { %1823 = vmatpush.bf16.msra.mxu0 %v6478_v28  ;;  %v6489_v28 = vld [vmem:[#allocation91_spill] sm:$0xff] }
 0x2d0   : > { %1841 = vmatpush.bf16.msra.mxu1 %v6480_v31  ;;  %1867 = vmatpush.bf16.msra.mxu3 %v6481_v40  ;;  %v6491_v31 = vld [vmem:[#allocation83_spill] sm:$0xff]  ;;  %v6492_v40 = vld [vmem:[#allocation94_spill] sm:$0xff] }
 0x2d1   : > { %1849 = vmatpush.bf16.msra.mxu2 %v6479_v17  ;;  %v6490_v17 = vld [vmem:[#allocation82_spill] sm:$0xff] }
 0x2d3   : > { %1824 = vmatpush.bf16.msra.mxu0 %v6484_v19  ;;  %v6495_v19 = vld [vmem:[#allocation85_spill] sm:$0xff] }
 0x2d4   : > { %1886 = vmatpush.bf16.msrb.mxu1 %v6482_v56  ;;  %1912 = vmatpush.bf16.msrb.mxu3 %v6483_v37  ;;  %v6493_v56 = vld [vmem:[#allocation95_spill] sm:$0xff]  ;;  %v6494_v37 = vld [vmem:[#allocation84_spill] sm:$0xff] }
 0x2d5   : > { %1850 = vmatpush.bf16.msra.mxu2 %v6485_v16  ;;  %v6496_v16 = vld [vmem:[#allocation98_spill] sm:$0xff] }
 0x2d7   : > { %1825 = vmatpush.bf16.msra.mxu0 %v6488_v9  ;;  %v6499_v9 = vld [vmem:[#allocation89_spill] sm:$0xff] }
 0x2d8   : > { %1887 = vmatpush.bf16.msrb.mxu1 %v6486_v62  ;;  %1913 = vmatpush.bf16.msrb.mxu3 %v6487_v10  ;;  %v6497_v62 = vld [vmem:[#allocation99_spill] sm:$0xff]  ;;  %v6498_v10 = vld [vmem:[#allocation88_spill] sm:$0xff] }
 0x2d9   : > { %1851 = vmatpush.bf16.msra.mxu2 %v6489_v28  ;;  %v6500_v28 = vld [vmem:[#allocation102_spill] sm:$0xff] }
 0x2db   : > { %1826 = vmatpush.bf16.msra.mxu0 %v6492_v40  ;;  %v6503_v40 = vld [vmem:[#allocation105_spill] sm:$0xff] }
 0x2dc   : > { %1888 = vmatpush.bf16.msrb.mxu1 %v6490_v17  ;;  %1914 = vmatpush.bf16.msrb.mxu3 %v6491_v31  ;;  %v6501_v17 = vld [vmem:[#allocation103_spill] sm:$0xff]  ;;  %v6502_v31 = vld [vmem:[#allocation104_spill] sm:$0xff] }
 0x2dd   : > { %1852 = vmatpush.bf16.msra.mxu2 %v6493_v56  ;;  %v6504_v56 = vld [vmem:[#allocation92_spill] sm:$0xff] }
 0x2df   : > { %1827 = vmatpush.bf16.msra.mxu0 %v6496_v16  ;;  %v6507_v16 = vld [vmem:[#allocation107_spill] sm:$0xff] }
 0x2e0   : > { %1889 = vmatpush.bf16.msrb.mxu1 %v6494_v37  ;;  %1915 = vmatpush.bf16.msrb.mxu3 %v6495_v19  ;;  %v6505_v37 = vld [vmem:[#allocation93_spill] sm:$0xff]  ;;  %v6506_v19 = vld [vmem:[#allocation106_spill] sm:$0xff] }
 0x2e1   : > { %1853 = vmatpush.bf16.msra.mxu2 %v6497_v62  ;;  %v6508_v62 = vld [vmem:[#allocation96_spill] sm:$0xff] }
 0x2e3   : > { %1828 = vmatpush.bf16.msra.mxu0 %v6500_v28  ;;  %v6511_v28 = vld [vmem:[#allocation109_spill] sm:$0xff] }
 0x2e4   : > { %1890 = vmatpush.bf16.msrb.mxu1 %v6498_v10  ;;  %1916 = vmatpush.bf16.msrb.mxu3 %v6499_v9  ;;  %v6509_v10 = vld [vmem:[#allocation97_spill] sm:$0xff]  ;;  %v6510_v9 = vld [vmem:[#allocation108_spill] sm:$0xff] }
 0x2e5   : > { %1854 = vmatpush.bf16.msra.mxu2 %v6501_v17  ;;  %v6512_v17 = vld [vmem:[#allocation100_spill] sm:$0xff] }
 0x2e7   : > { %1873 = vmatpush.bf16.msrb.mxu0 %v6502_v31  ;;  %v6513_v31 = vld [vmem:[#allocation101_spill] sm:$0xff] }
 0x2e8   : > { %1891 = vmatpush.bf16.msrb.mxu1 %v6504_v56  ;;  %1917 = vmatpush.bf16.msrb.mxu3 %v6505_v37  ;;  %v6515_v56 = vld [vmem:[#allocation111_spill] sm:$0xff]  ;;  %v6516_v37 = vld [vmem:[#allocation112_spill] sm:$0xff] }
 0x2e9   : > { %1899 = vmatpush.bf16.msrb.mxu2 %v6503_v40  ;;  %v6514_v40 = vld [vmem:[#allocation110_spill] sm:$0xff] }
 0x2eb   : > { %1874 = vmatpush.bf16.msrb.mxu0 %v6506_v19  ;;  %v6517_v19 = vld [vmem:[#allocation113_spill] sm:$0xff] }
 0x2ec   : > { %1892 = vmatpush.bf16.msrb.mxu1 %v6508_v62  ;;  %1918 = vmatpush.bf16.msrb.mxu3 %v6509_v10  ;;  %v6519_v62 = vld [vmem:[#allocation115_spill] sm:$0xff]  ;;  %v6520_v10 = vld [vmem:[#allocation116_spill] sm:$0xff] }
 0x2ed   : > { %1900 = vmatpush.bf16.msrb.mxu2 %v6507_v16  ;;  %v6518_v16 = vld [vmem:[#allocation114_spill] sm:$0xff] }
 0x2ef   : > { %1875 = vmatpush.bf16.msrb.mxu0 %v6510_v9  ;;  %v6521_v9 = vld [vmem:[#allocation117_spill] sm:$0xff] }
 0x2f0   : > { %1893 = vmatpush.bf16.msrb.mxu1 %v6512_v17  ;;  %1919 = vmatpush.bf16.msrb.mxu3 %v6513_v31  ;;  %v6523_v17 = vld [vmem:[#allocation119_spill] sm:$0xff] }
 0x2f1   : > { %1901 = vmatpush.bf16.msrb.mxu2 %v6511_v28  ;;  %v6522_v28 = vld [vmem:[#allocation118_spill] sm:$0xff] }
 0x2f3   : > { %1876 = vmatpush.bf16.msrb.mxu0 %v6514_v40 }
 0x2f5   : > { %1902 = vmatpush.bf16.msrb.mxu2 %v6515_v56 }
 0x2f7   : > { %1877 = vmatpush.bf16.msrb.mxu0 %v6516_v37 }
 0x2f9   : > { %1903 = vmatpush.bf16.msrb.mxu2 %v6517_v19  ;;  %v6524_v19 = vld [vmem:[#allocation40_spill] sm:$0xff] }
 0x2fb   : > { %1878 = vmatpush.bf16.msrb.mxu0 %v6518_v16 }
 0x2fd   : > { %1904 = vmatpush.bf16.msrb.mxu2 %v6519_v62 }
 0x2ff   : > { %1879 = vmatpush.bf16.msrb.mxu0 %v6520_v10 }
 0x301   : > { %1905 = vmatpush.bf16.msrb.mxu2 %v6521_v9  ;;  %v6525_v9 = vld [vmem:[#allocation44_spill] sm:$0xff] }
 0x303   : > { %1880 = vmatpush.bf16.msrb.mxu0 %v6522_v28 }
 0x305   : > { %1906 = vmatpush.bf16.msrb.mxu2 %v6523_v17 }
 0x310   : > { %v1548_v31 = vpop.f32.mrf.mxu1 }
 0x316   : > { %v1574_v40 = vpop.f32.mrf.mxu3 }
 0x318   : > { %v1550_v41 = vpop.f32.mrf.mxu1 }
 0x319   : > { %v3727_v41 = vld [vmem:[%s4569_s12 + $0x68] sm:$0xff] }
 0x31e   : > { %v1576_v56 = vpop.f32.mrf.mxu3 }
 0x320   : > { %v1600_v37 = vpop.f32.mrf.mxu1 }
 0x323   : > { %v1535_v61 = vpop.f32.mrf.mxu0 }
 0x324   : > { %v1536_v60 = vadd.f32 %v1535_v61, %v6524_v19 }
 0x326   : > { %v1549_v16 = vadd.f32 %v1548_v31, %v1536_v60  ;;  %v1626_v0 = vpop.f32.mrf.mxu3 }
 0x328   : > { %v3722_v62 = vmul.f32 -1.442695, %v1549_v16  ;;  %v1602_v38 = vpop.f32.mrf.mxu1 }
 0x329   : > { %v1561_v10 = vpop.f32.mrf.mxu2 }
 0x32a   : > { %4056 = vpow2.f32 %v3722_v62  ;;  %v1562_v15 = vadd.f32 %v1561_v10, %v6525_v9 }
 0x32b   : > { %v1537_v28 = vpop.f32.mrf.mxu0 }
 0x32c   : > { %v1575_v57 = vadd.f32 %v1574_v40, %v1562_v15  ;;  %v3729_v28 = vld [vmem:[%s4569_s12 + $0x78] sm:$0xff] }
 0x32e   : > { %v3723_v17 = vmul.f32 -1.442695, %v1575_v57  ;;  %v1628_v30 = vpop.f32.mrf.mxu3 }
 0x330   : > { %v4057_v49 = vpop.eup %4056  ;;  %4058 = vpow2.f32 %v3723_v17  ;;  %v1722_v56 = vpop.f32.mrf.mxu1 }
 0x331   : > { %v5309_v39 = vadd.f32 1.0, %v4057_v49  ;;  %v1753_v61 = vadd.f32 %v3727_v41, %v1722_v56  ;;  %v1563_v60 = vpop.f32.mrf.mxu2 }
 0x333   : > { %4060 = vrcp.f32 %v5309_v39  ;;  %v3731_v38 = vmul.f32 -1.442695, %v1753_v61  ;;  %v1587_v31 = vpop.f32.mrf.mxu0  ;;  %vm1639_vm14 = vweird.f32 %v5309_v39 }
 0x334   : > { %v1588_v9 = vadd.f32 %v1587_v31, %v6457_v5 }
 0x335   : > { %4062 = vpow2.f32 %v3731_v38 }
 0x336   : > { %v4059_v16 = vpop.eup %4058  ;;  %v1601_v25 = vadd.f32 %v1600_v37, %v1588_v9 }
 0x337   : > { %v1652_v62 = vadd.f32 1.0, %v4059_v16 }
 0x338   : > { %v1748_v15 = vpop.f32.mrf.mxu3  ;;  %v1724_v40 = vpop.f32.mrf.mxu1 }
 0x339   : > { %v4061_v57 = vpop.eup %4060  ;;  %4064 = vrcp.f32 %v1652_v62  ;;  %v1613_v30 = vpop.f32.mrf.mxu2  ;;  %v1755_v10 = vadd.f32 %v3729_v28, %v1748_v15  ;;  %v3726_v28 = vld [vmem:[%s4569_s12 + $0x60] sm:$0xff]  ;;  %vm1658_vm15 = vweird.f32 %v1652_v62 }
 0x33a   : > { %v1635_v17 = vmul.f32 %v4061_v57, %v5309_v39  ;;  %v1614_v49 = vadd.f32 %v1613_v30, %v6456_v33  ;;  %v1664_v30 = vand.u32 2147483648, %v1652_v62  ;;  %vm1640_vm12 = vweird.f32 %v4061_v57 }
 0x33b   : > { %v1589_v41 = vpop.f32.mrf.mxu0  ;;  %v4063_v56 = vpop.eup %4062  ;;  %v3732_v38 = vmul.f32 -1.442695, %v1755_v10  ;;  %vm5322_vm0 = vmor %vm1639_vm14, %vm1640_vm12 }
 0x33c   : > { %v1636_v60 = vsub.f32 1.0, %v1635_v17  ;;  %v1627_v61 = vadd.f32 %v1626_v0, %v1614_v49  ;;  %v5316_v19 = vadd.f32 1.0, %v4063_v56  ;;  %v1662_v0 = vand.u32 2147483647, %v1652_v62 }
 0x33d   : > { %v1665_v56 = vor.u32 1.1754944e-38, %v1664_v30 }
 0x33e   : > { %v3724_v40 = vmul.f32 -1.442695, %v1627_v61  ;;  %v1637_v11 = vmul.f32 %v4061_v57, %v1636_v60  ;;  %vm1663_vm2 = vcmp.eq.f32.partialorder %v1662_v0, 8.507059e+37  ;;  %vm1784_vm9 = vweird.f32 %v5316_v19 }
 0x33f   : > { %v4065_v16 = vpop.eup %4064 }
 0x340   : > { %v1750_v1 = vpop.f32.mrf.mxu3  ;;  %v1654_v6 = vmul.f32 %v4065_v16, %v1652_v62  ;;  %4066 = vpow2.f32 %v3724_v40  ;;  %vm1659_vm13 = vweird.f32 %v4065_v16  ;;  %v1638_v10 = vadd.f32 %v4061_v57, %v1637_v11 }
 0x341   : > { %v1615_v58 = vpop.f32.mrf.mxu2  ;;  %4068 = vpow2.f32 %v3732_v38  ;;  %v1645_v1 = vand.u32 2147483648, %v5309_v39  ;;  %vm1660_vm1 = vmor %vm1658_vm15, %vm1659_vm13 }
 0x342   : > { %v1655_v15 = vsub.f32 1.0, %v1654_v6  ;;  %4070 = vrcp.f32 %v5316_v19  ;;  %v1643_v6 = vand.u32 2147483647, %v5309_v39  ;;  %v1642_v11 = vsel %vm5322_vm0, %v4061_v57, %v1638_v10 }
 0x343   : > { %v1709_v31 = vpop.f32.mrf.mxu0  ;;  %4072 = vtanh.f32 %v1601_v25  ;;  %v1646_v40 = vor.u32 1.1754944e-38, %v1645_v1 }
 0x344   : > { %v1656_v17 = vmul.f32 %v4065_v16, %v1655_v15  ;;  %v1752_v49 = vadd.f32 %v3726_v28, %v1709_v31  ;;  %vm1644_vm3 = vcmp.eq.f32.partialorder %v1643_v6, 8.507059e+37 }
 0x345   : > { %v1647_v15 = vsel %vm1644_vm3, %v1646_v40, %v1642_v11 }
 0x346   : > { %v1657_v9 = vadd.f32 %v4065_v16, %v1656_v17  ;;  %v3730_v37 = vmul.f32 -1.442695, %v1752_v49  ;;  %v4067_v41 = vpop.eup %4066 }
 0x347   : > { %v4069_v60 = vpop.eup %4068  ;;  %v1672_v38 = vadd.f32 1.0, %v4067_v41 }
 0x348   : > { %v1661_v61 = vsel %vm1660_vm1, %v4065_v16, %v1657_v9  ;;  %v5329_v62 = vpop.eup %4070  ;;  %4074 = vpow2.f32 %v3730_v37  ;;  %v5334_v57 = vadd.f32 1.0, %v4069_v60 }
 0x349   : > { %v1666_v28 = vsel %vm1663_vm2, %v1665_v56, %v1661_v61  ;;  %4076 = vrcp.f32 %v1672_v38  ;;  %v1780_v25 = vmul.f32 %v5329_v62, %v5316_v19  ;;  %v4073_v17 = vpop.eup %4072  ;;  %v3728_v56 = vld [vmem:[%s4569_s12 + $0x70] sm:$0xff]  ;;  %v1682_v11 = vand.u32 2147483647, %v1672_v38 }
 0x34a   : > { %v1688_v30 = vmul.f32 %v1666_v28, %v5176_v24  ;;  %v1689_v16 = vmul.f32 %v4073_v17, %v1647_v15  ;;  %4078 = vrcp.f32 %v5334_v57  ;;  %v1684_v24 = vand.u32 2147483648, %v1672_v38 }
 0x34b   : > { %v1711_v31 = vpop.f32.mrf.mxu0  ;;  %v1781_v49 = vsub.f32 1.0, %v1780_v25  ;;  %vm1678_vm5 = vweird.f32 %v1672_v38  ;;  %vm1785_vm6 = vweird.f32 %v5329_v62  ;;  %vm1683_vm8 = vcmp.eq.f32.partialorder %v1682_v11, 8.507059e+37 }
 0x34c   : > { %v5336_v1 = vadd.f32 %v1689_v16, %v1688_v30  ;;  %v1685_v25 = vor.u32 1.1754944e-38, %v1684_v24  ;;  %vm5350_vm10 = vmor %vm1784_vm9, %vm1785_vm6  ;;  %vm1804_vm1 = vweird.f32 %v5334_v57 }
 0x34d   : > { %v1735_v39 = vpop.f32.mrf.mxu2  ;;  %v1782_v41 = vmul.f32 %v5329_v62, %v1781_v49 }
 0x34e   : > { %v4075_v0 = vpop.eup %4074  ;;  %v1754_v15 = vadd.f32 %v3728_v56, %v1735_v39 }
 0x34f   : > { %v4077_v10 = vpop.eup %4076  ;;  %v1759_v58 = vadd.f32 1.0, %v4075_v0  ;;  %v1783_v31 = vadd.f32 %v5329_v62, %v1782_v41  ;;  %v1790_v0 = vand.u32 2147483648, %v5316_v19 }
 0x350   : > { %v1674_v6 = vmul.f32 %v4077_v10, %v1672_v38  ;;  %vm1679_vm4 = vweird.f32 %v4077_v10  ;;  %v5342_v61 = vpop.eup %4078 }
 0x351   : > { %4080 = vrcp.f32 %v1759_v58  ;;  %vm1680_vm7 = vmor %vm1678_vm5, %vm1679_vm4  ;;  %v1800_v38 = vmul.f32 %v5342_v61, %v5334_v57  ;;  %v1787_v41 = vsel %vm5350_vm10, %v5329_v62, %v1783_v31  ;;  %v1769_v56 = vand.u32 2147483647, %v1759_v58 }
 0x352   : > { %v1675_v37 = vsub.f32 1.0, %v1674_v6  ;;  %4082 = vtanh.f32 %v5336_v1  ;;  %v1791_v11 = vor.u32 1.1754944e-38, %v1790_v0  ;;  %vm1765_vm12 = vweird.f32 %v1759_v58 }
 0x353   : > { %4084 = vtanh.f32 %v1754_v15  ;;  %vm1770_vm15 = vcmp.eq.f32.partialorder %v1769_v56, 8.507059e+37  ;;  %vm1805_vm0 = vweird.f32 %v5342_v61  ;;  %v6534_v56 = vld [vmem:[#allocation70_spill] sm:$0xff] }
 0x354   : > { %v1676_v60 = vmul.f32 %v4077_v10, %v1675_v37  ;;  %vm1806_vm2 = vmor %vm1804_vm1, %vm1805_vm0 }
 0x355   : > { %v1737_v9 = vpop.f32.mrf.mxu2 }
 0x356   : > { %v1677_v40 = vadd.f32 %v4077_v10, %v1676_v60  ;;  %v1788_v9 = vand.u32 2147483647, %v5316_v19 }
 0x357   : > { %v4081_v28 = vpop.eup %4080 }
 0x358   : > { %v1761_v30 = vmul.f32 %v4081_v28, %v1759_v58  ;;  %v1681_v17 = vsel %vm1680_vm7, %v4077_v10, %v1677_v40  ;;  %v4083_v16 = vpop.eup %4082  ;;  %v1771_v10 = vand.u32 2147483648, %v1759_v58  ;;  %vm1766_vm11 = vweird.f32 %v4081_v28 }
 0x359   : > { %v1686_v49 = vsel %vm1683_vm8, %v1685_v25, %v1681_v17  ;;  %v1801_v40 = vsub.f32 1.0, %v1800_v38  ;;  %vm1789_vm13 = vcmp.eq.f32.partialorder %v1788_v9, 8.507059e+37  ;;  %vm1767_vm14 = vmor %vm1765_vm12, %vm1766_vm11  ;;  %v4085_v15 = vpop.eup %4084 }
 0x35a   : > { %v1762_v39 = vsub.f32 1.0, %v1761_v30  ;;  %v1692_v37 = vmul.f32 %v4083_v16, %v1686_v49  ;;  %v1772_v19 = vor.u32 1.1754944e-38, %v1771_v10  ;;  %v1792_v30 = vsel %vm1789_vm13, %v1791_v11, %v1787_v41  ;;  %v6532_v41 = vld [vmem:[#allocation47_spill] sm:$0xff] }
 0x35b   : > { %v1802_v31 = vmul.f32 %v5342_v61, %v1801_v40  ;;  %v1814_v16 = vmul.f32 %v1792_v30, %v5205_v59  ;;  %v1808_v49 = vand.u32 2147483647, %v5334_v57  ;;  %v6536_v11 = vld [vmem:[#allocation51_spill] sm:$0xff]  ;;  %v6537_v40 = vld [vmem:[#allocation57_spill] sm:$0xff]  ;;  %v6540_v30 = vld [vmem:[#allocation72_spill] sm:$0xff] }
 0x35c   : > { %v1763_v24 = vmul.f32 %v4081_v28, %v1762_v39  ;;  %3725 = vst [vmem:[%s4576_s21 + $0x10] sm:$0xff] %v1692_v37  ;;  %v1820_v60 = vpack.c.bf16 %v1692_v37, %v1692_v37 }
 0x35d   : > { %v1803_v38 = vadd.f32 %v5342_v61, %v1802_v31  ;;  %vm1809_vm3 = vcmp.eq.f32.partialorder %v1808_v49, 8.507059e+37  ;;  %v6543_v31 = vld [vmem:[#allocation65_spill] sm:$0xff] }
 0x35e   : > { %v1764_v25 = vadd.f32 %v4081_v28, %v1763_v24  ;;  %1842 = vmatmul.bf16.vlgmr.msra.gmra.mxu1 %v1820_v60  ;;  %1868 = vmatmul.bf16.vlgmr.msra.gmra.mxu3 %v1820_v60  ;;  %v6533_v24 = vld [vmem:[#allocation52_spill] sm:$0xff]  ;;  %v6549_v49 = vld [vmem:[#allocation77_spill] sm:$0xff] }
 0x35f   : > { %2008 = vmatpush.bf16.msra.mxu1 %v6396_v23  ;;  %2034 = vmatpush.bf16.msra.mxu3 %v6397_v20  ;;  %v1807_v59 = vsel %vm1806_vm2, %v5342_v61, %v1803_v38  ;;  %v6531_v61 = vld [vmem:[#allocation67_spill] sm:$0xff]  ;;  %v6547_v38 = vld [vmem:[#allocation69_spill] sm:$0xff] }
 0x360   : > { %v1768_v62 = vsel %vm1767_vm14, %v4081_v28, %v1764_v25  ;;  %v1810_v28 = vand.u32 2147483648, %v5334_v57  ;;  %v6530_v57 = vld [vmem:[#allocation66_spill] sm:$0xff]  ;;  %v6538_v25 = vld [vmem:[#allocation60_spill] sm:$0xff] }
 0x361   : > { %v1773_v17 = vsel %vm1770_vm15, %v1772_v19, %v1768_v62  ;;  %v6539_v19 = vld [vmem:[#allocation61_spill] sm:$0xff] }
 0x362   : > { %v1815_v0 = vmul.f32 %v4085_v15, %v1773_v17  ;;  %v1811_v6 = vor.u32 1.1754944e-38, %v1810_v28  ;;  %v6541_v62 = vld [vmem:[#allocation73_spill] sm:$0xff]  ;;  %v6542_v15 = vld [vmem:[#allocation64_spill] sm:$0xff]  ;;  %v6544_v17 = vld [vmem:[#allocation74_spill] sm:$0xff] }
 0x363   : > { %2009 = vmatpush.bf16.msra.mxu1 %v6398_v54  ;;  %2035 = vmatpush.bf16.msra.mxu3 %v6399_v50  ;;  %v6548_v28 = vld [vmem:[#allocation76_spill] sm:$0xff] }
 0x364   : > { %v5365_v58 = vadd.f32 %v1815_v0, %v1814_v16  ;;  %v1812_v9 = vsel %vm1809_vm3, %v1811_v6, %v1807_v59  ;;  %v6545_v16 = vld [vmem:[#allocation75_spill] sm:$0xff]  ;;  %v6546_v0 = vld [vmem:[#allocation68_spill] sm:$0xff]  ;;  %v6550_v59 = vld [vmem:[#allocation78_spill] sm:$0xff] }
 0x365   : > { %v6551_v6 = vld [vmem:[#allocation79_spill] sm:$0xff] }
 0x366   : > { %4086 = vtanh.f32 %v5365_v58 }
 0x367   : > { %2010 = vmatpush.bf16.msra.mxu1 %v6400_v53  ;;  %2036 = vmatpush.bf16.msra.mxu3 %v6401_v36 }
 0x36b   : > { %2011 = vmatpush.bf16.msra.mxu1 %v6402_v21  ;;  %2037 = vmatpush.bf16.msra.mxu3 %v6403_v44 }
 0x36c   : > { %v4087_v39 = vpop.eup %4086 }
 0x36d   : > { %v1818_v37 = vmul.f32 %v4087_v39, %v1812_v9  ;;  %v6552_v39 = vld [vmem:[#allocation86_spill] sm:$0xff]  ;;  %v6553_v9 = vld [vmem:[#allocation87_spill] sm:$0xff] }
 0x36e   : > { %1894 = vmatmul.bf16.vlgmr.msrb.gmra.mxu1 %v1820_v60  ;;  %1920 = vmatmul.bf16.vlgmr.msrb.gmra.mxu3 %v1820_v60  ;;  %v6535_v60 = vld [vmem:[#allocation71_spill] sm:$0xff] }
 0x36f   : > { %v1819_v10 = vpack.c.bf16 %v1818_v37, %v1818_v37  ;;  %2012 = vmatpush.bf16.msra.mxu1 %v6404_v26  ;;  %2038 = vmatpush.bf16.msra.mxu3 %v6405_v45  ;;  %v6554_v37 = vld [vmem:[#allocation80_spill] sm:$0xff] }
 0x371   : > { %1829 = vmatmul.bf16.vlgmr.msra.gmra.mxu0 %v1819_v10  ;;  %1855 = vmatmul.bf16.vlgmr.msra.gmra.mxu2 %v1819_v10 }
 0x372   : > { %1995 = vmatpush.bf16.msra.mxu0 %v4588_v4  ;;  %2021 = vmatpush.bf16.msra.mxu2 %v4603_v22 }
 0x373   : > { %2013 = vmatpush.bf16.msra.mxu1 %v6406_v47  ;;  %2039 = vmatpush.bf16.msra.mxu3 %v6407_v12 }
 0x376   : > { %1996 = vmatpush.bf16.msra.mxu0 %v4595_v13  ;;  %2022 = vmatpush.bf16.msra.mxu2 %v4615_v35 }
 0x377   : > { %2014 = vmatpush.bf16.msra.mxu1 %v6408_v14  ;;  %2040 = vmatpush.bf16.msra.mxu3 %v6409_v7 }
 0x37a   : > { %1997 = vmatpush.bf16.msra.mxu0 %v4607_v29  ;;  %2023 = vmatpush.bf16.msra.mxu2 %v4621_v43 }
 0x37b   : > { %2015 = vmatpush.bf16.msra.mxu1 %v6410_v46  ;;  %2041 = vmatpush.bf16.msra.mxu3 %v6411_v51 }
 0x37e   : > { %1998 = vmatpush.bf16.msra.mxu0 %v4619_v42  ;;  %2016 = vmatmul.bf16.vlgmr.msra.gmra.mxu1 %v1819_v10 }
 0x37f   : > { %2129 = vmatpush.bf16.msrb.mxu1 %v6412_v2  ;;  %2155 = vmatpush.bf16.msrb.mxu3 %v6413_v34 }
 0x380   : > { %2024 = vmatpush.bf16.msra.mxu2 %v4633_v55  ;;  %2042 = vmatmul.bf16.vlgmr.msra.gmra.mxu3 %v1819_v10 }
 0x381   : > { %1881 = vmatmul.bf16.vlgmr.msrb.gmra.mxu0 %v1819_v10  ;;  %1907 = vmatmul.bf16.vlgmr.msrb.gmra.mxu2 %v1819_v10 }
 0x382   : > { %1999 = vmatpush.bf16.msra.mxu0 %v6356_v48 }
 0x383   : > { %2130 = vmatpush.bf16.msrb.mxu1 %v6414_v8  ;;  %2156 = vmatpush.bf16.msrb.mxu3 %v6415_v3 }
 0x384   : > { %2025 = vmatpush.bf16.msra.mxu2 %v6357_v52 }
 0x386   : > { %2000 = vmatpush.bf16.msra.mxu0 %v6360_v63 }
 0x387   : > { %2131 = vmatpush.bf16.msrb.mxu1 %v6416_v18  ;;  %2157 = vmatpush.bf16.msrb.mxu3 %v6417_v32 }
 0x388   : > { %2026 = vmatpush.bf16.msra.mxu2 %v6361_v27 }
 0x38a   : > { %2001 = vmatpush.bf16.msra.mxu0 %v6532_v41 }
 0x38b   : > { %2132 = vmatpush.bf16.msrb.mxu1 %v6530_v57  ;;  %2158 = vmatpush.bf16.msrb.mxu3 %v6531_v61 }
 0x38c   : > { %2027 = vmatpush.bf16.msra.mxu2 %v6533_v24 }
 0x38e   : > { %2002 = vmatpush.bf16.msra.mxu0 %v6536_v11 }
 0x38f   : > { %2133 = vmatpush.bf16.msrb.mxu1 %v6534_v56  ;;  %2159 = vmatpush.bf16.msrb.mxu3 %v6535_v60 }
 0x390   : > { %2028 = vmatpush.bf16.msra.mxu2 %v6537_v40 }
 0x391   : > { %2003 = vmatmul.bf16.vlgmr.msra.gmra.mxu0 %v1819_v10 }
 0x392   : > { %2116 = vmatpush.bf16.msrb.mxu0 %v6538_v25 }
 0x393   : > { %2134 = vmatpush.bf16.msrb.mxu1 %v6540_v30  ;;  %2160 = vmatpush.bf16.msrb.mxu3 %v6541_v62 }
 0x394   : > { %2142 = vmatpush.bf16.msrb.mxu2 %v6539_v19 }
 0x395   : > { %2029 = vmatmul.bf16.vlgmr.msra.gmra.mxu2 %v1819_v10  ;;  %v6555_v10 = vld [vmem:[#allocation81_spill] sm:$0xff] }
 0x396   : > { %2117 = vmatpush.bf16.msrb.mxu0 %v6542_v15 }
 0x397   : > { %2135 = vmatpush.bf16.msrb.mxu1 %v6544_v17  ;;  %2161 = vmatpush.bf16.msrb.mxu3 %v6545_v16  ;;  %v6556_v16 = vld [vmem:[#allocation90_spill] sm:$0xff] }
 0x398   : > { %2143 = vmatpush.bf16.msrb.mxu2 %v6543_v31 }
 0x39a   : > { %2118 = vmatpush.bf16.msrb.mxu0 %v6546_v0  ;;  %v6557_v0 = vld [vmem:[#allocation91_spill] sm:$0xff] }
 0x39b   : > { %2136 = vmatpush.bf16.msrb.mxu1 %v6548_v28  ;;  %2162 = vmatpush.bf16.msrb.mxu3 %v6549_v49  ;;  %v6559_v28 = vld [vmem:[#allocation83_spill] sm:$0xff]  ;;  %v6560_v49 = vld [vmem:[#allocation94_spill] sm:$0xff] }
 0x39c   : > { %2144 = vmatpush.bf16.msrb.mxu2 %v6547_v38  ;;  %v6558_v38 = vld [vmem:[#allocation82_spill] sm:$0xff] }
 0x39e   : > { %2119 = vmatpush.bf16.msrb.mxu0 %v6552_v39  ;;  %v6563_v39 = vld [vmem:[#allocation85_spill] sm:$0xff] }
 0x39f   : > { %2181 = vmatpush.bf16.msra.mxu1 %v6550_v59  ;;  %2207 = vmatpush.bf16.msra.mxu3 %v6551_v6  ;;  %v6561_v59 = vld [vmem:[#allocation95_spill] sm:$0xff]  ;;  %v6562_v6 = vld [vmem:[#allocation84_spill] sm:$0xff] }
 0x3a0   : > { %2145 = vmatpush.bf16.msrb.mxu2 %v6553_v9  ;;  %v6564_v9 = vld [vmem:[#allocation98_spill] sm:$0xff] }
 0x3a2   : > { %2120 = vmatpush.bf16.msrb.mxu0 %v6556_v16  ;;  %v6567_v16 = vld [vmem:[#allocation89_spill] sm:$0xff] }
 0x3a3   : > { %2182 = vmatpush.bf16.msra.mxu1 %v6554_v37  ;;  %2208 = vmatpush.bf16.msra.mxu3 %v6555_v10  ;;  %v6565_v37 = vld [vmem:[#allocation99_spill] sm:$0xff]  ;;  %v6566_v10 = vld [vmem:[#allocation88_spill] sm:$0xff] }
 0x3a4   : > { %2146 = vmatpush.bf16.msrb.mxu2 %v6557_v0  ;;  %v6568_v0 = vld [vmem:[#allocation102_spill] sm:$0xff] }
 0x3a6   : > { %2121 = vmatpush.bf16.msrb.mxu0 %v6560_v49  ;;  %v6571_v49 = vld [vmem:[#allocation105_spill] sm:$0xff] }
 0x3a7   : > { %2183 = vmatpush.bf16.msra.mxu1 %v6558_v38  ;;  %2209 = vmatpush.bf16.msra.mxu3 %v6559_v28  ;;  %v6569_v38 = vld [vmem:[#allocation103_spill] sm:$0xff]  ;;  %v6570_v28 = vld [vmem:[#allocation104_spill] sm:$0xff] }
 0x3a8   : > { %2147 = vmatpush.bf16.msrb.mxu2 %v6561_v59  ;;  %v6572_v59 = vld [vmem:[#allocation92_spill] sm:$0xff] }
 0x3aa   : > { %2122 = vmatpush.bf16.msrb.mxu0 %v6564_v9  ;;  %v6575_v9 = vld [vmem:[#allocation107_spill] sm:$0xff] }
 0x3ab   : > { %2184 = vmatpush.bf16.msra.mxu1 %v6562_v6  ;;  %2210 = vmatpush.bf16.msra.mxu3 %v6563_v39  ;;  %v6573_v6 = vld [vmem:[#allocation93_spill] sm:$0xff]  ;;  %v6574_v39 = vld [vmem:[#allocation106_spill] sm:$0xff] }
 0x3ac   : > { %2148 = vmatpush.bf16.msrb.mxu2 %v6565_v37  ;;  %v6576_v37 = vld [vmem:[#allocation96_spill] sm:$0xff] }
 0x3ae   : > { %2123 = vmatpush.bf16.msrb.mxu0 %v6568_v0  ;;  %v6579_v0 = vld [vmem:[#allocation109_spill] sm:$0xff] }
 0x3af   : > { %2185 = vmatpush.bf16.msra.mxu1 %v6566_v10  ;;  %2211 = vmatpush.bf16.msra.mxu3 %v6567_v16  ;;  %v6577_v10 = vld [vmem:[#allocation97_spill] sm:$0xff]  ;;  %v6578_v16 = vld [vmem:[#allocation108_spill] sm:$0xff] }
 0x3b0   : > { %2149 = vmatpush.bf16.msrb.mxu2 %v6569_v38  ;;  %v6580_v38 = vld [vmem:[#allocation100_spill] sm:$0xff] }
 0x3b2   : > { %2168 = vmatpush.bf16.msra.mxu0 %v6570_v28  ;;  %v6581_v28 = vld [vmem:[#allocation101_spill] sm:$0xff] }
 0x3b3   : > { %2186 = vmatpush.bf16.msra.mxu1 %v6572_v59  ;;  %2212 = vmatpush.bf16.msra.mxu3 %v6573_v6  ;;  %v6583_v59 = vld [vmem:[#allocation111_spill] sm:$0xff]  ;;  %v6584_v6 = vld [vmem:[#allocation112_spill] sm:$0xff] }
 0x3b4   : > { %2194 = vmatpush.bf16.msra.mxu2 %v6571_v49  ;;  %v6582_v49 = vld [vmem:[#allocation110_spill] sm:$0xff] }
 0x3b6   : > { %2169 = vmatpush.bf16.msra.mxu0 %v6574_v39  ;;  %v6585_v39 = vld [vmem:[#allocation113_spill] sm:$0xff] }
 0x3b7   : > { %2187 = vmatpush.bf16.msra.mxu1 %v6576_v37  ;;  %2213 = vmatpush.bf16.msra.mxu3 %v6577_v10  ;;  %v6587_v37 = vld [vmem:[#allocation115_spill] sm:$0xff]  ;;  %v6588_v10 = vld [vmem:[#allocation116_spill] sm:$0xff] }
 0x3b8   : > { %2195 = vmatpush.bf16.msra.mxu2 %v6575_v9  ;;  %v6586_v9 = vld [vmem:[#allocation114_spill] sm:$0xff] }
 0x3ba   : > { %2170 = vmatpush.bf16.msra.mxu0 %v6578_v16  ;;  %v6589_v16 = vld [vmem:[#allocation117_spill] sm:$0xff] }
 0x3bb   : > { %2188 = vmatpush.bf16.msra.mxu1 %v6580_v38  ;;  %2214 = vmatpush.bf16.msra.mxu3 %v6581_v28  ;;  %v6591_v38 = vld [vmem:[#allocation119_spill] sm:$0xff] }
 0x3bc   : > { %2196 = vmatpush.bf16.msra.mxu2 %v6579_v0  ;;  %v6590_v0 = vld [vmem:[#allocation118_spill] sm:$0xff] }
 0x3be   : > { %2171 = vmatpush.bf16.msra.mxu0 %v6582_v49 }
 0x3c0   : > { %2197 = vmatpush.bf16.msra.mxu2 %v6583_v59 }
 0x3c2   : > { %2172 = vmatpush.bf16.msra.mxu0 %v6584_v6 }
 0x3c4   : > { %2198 = vmatpush.bf16.msra.mxu2 %v6585_v39  ;;  %v6592_v39 = vld [vmem:[#allocation40_spill] sm:$0xff] }
 0x3c6   : > { %2173 = vmatpush.bf16.msra.mxu0 %v6586_v9 }
 0x3c8   : > { %2199 = vmatpush.bf16.msra.mxu2 %v6587_v37 }
 0x3ca   : > { %2174 = vmatpush.bf16.msra.mxu0 %v6588_v10 }
 0x3cc   : > { %2200 = vmatpush.bf16.msra.mxu2 %v6589_v16  ;;  %v6593_v16 = vld [vmem:[#allocation44_spill] sm:$0xff] }
 0x3ce   : > { %2175 = vmatpush.bf16.msra.mxu0 %v6590_v0 }
 0x3d0   : > { %2201 = vmatpush.bf16.msra.mxu2 %v6591_v38 }
 0x3db   : > { %v1843_v28 = vpop.f32.mrf.mxu1 }
 0x3e1   : > { %v1869_v49 = vpop.f32.mrf.mxu3 }
 0x3e3   : > { %v1845_v17 = vpop.f32.mrf.mxu1 }
 0x3e4   : > { %v3738_v17 = vld [vmem:[%s4569_s12 + $0x88] sm:$0xff] }
 0x3e9   : > { %v1871_v59 = vpop.f32.mrf.mxu3 }
 0x3eb   : > { %v1895_v6 = vpop.f32.mrf.mxu1 }
 0x3ee   : > { %v1830_v31 = vpop.f32.mrf.mxu0 }
 0x3ef   : > { %v1831_v15 = vadd.f32 %v1830_v31, %v6592_v39 }
 0x3f1   : > { %v1844_v9 = vadd.f32 %v1843_v28, %v1831_v15  ;;  %v1921_v62 = vpop.f32.mrf.mxu3 }
 0x3f3   : > { %v3733_v37 = vmul.f32 -1.442695, %v1844_v9  ;;  %v1897_v30 = vpop.f32.mrf.mxu1 }
 0x3f4   : > { %v1856_v10 = vpop.f32.mrf.mxu2 }
 0x3f5   : > { %4088 = vpow2.f32 %v3733_v37  ;;  %v1857_v19 = vadd.f32 %v1856_v10, %v6593_v16 }
 0x3f6   : > { %v1832_v0 = vpop.f32.mrf.mxu0 }
 0x3f7   : > { %v1870_v25 = vadd.f32 %v1869_v49, %v1857_v19  ;;  %v3740_v0 = vld [vmem:[%s4569_s12 + $0x98] sm:$0xff] }
 0x3f9   : > { %v3734_v38 = vmul.f32 -1.442695, %v1870_v25  ;;  %v1923_v40 = vpop.f32.mrf.mxu3 }
 0x3fb   : > { %v4089_v11 = vpop.eup %4088  ;;  %4090 = vpow2.f32 %v3734_v38  ;;  %v2017_v59 = vpop.f32.mrf.mxu1 }
 0x3fc   : > { %v5469_v60 = vadd.f32 1.0, %v4089_v11  ;;  %v2048_v31 = vadd.f32 %v3738_v17, %v2017_v59  ;;  %v1858_v15 = vpop.f32.mrf.mxu2 }
 0x3fe   : > { %4092 = vrcp.f32 %v5469_v60  ;;  %v3742_v30 = vmul.f32 -1.442695, %v2048_v31  ;;  %v1882_v28 = vpop.f32.mrf.mxu0  ;;  %vm1934_vm6 = vweird.f32 %v5469_v60 }
 0x3ff   : > { %v1883_v16 = vadd.f32 %v1882_v28, %v6457_v5 }
 0x400   : > { %4094 = vpow2.f32 %v3742_v30 }
 0x401   : > { %v4091_v9 = vpop.eup %4090  ;;  %v1896_v57 = vadd.f32 %v1895_v6, %v1883_v16 }
 0x402   : > { %v1947_v37 = vadd.f32 1.0, %v4091_v9 }
 0x403   : > { %v2043_v19 = vpop.f32.mrf.mxu3  ;;  %v2019_v49 = vpop.f32.mrf.mxu1 }
 0x404   : > { %v4093_v25 = vpop.eup %4092  ;;  %4096 = vrcp.f32 %v1947_v37  ;;  %v1908_v40 = vpop.f32.mrf.mxu2  ;;  %v2050_v10 = vadd.f32 %v3740_v0, %v2043_v19  ;;  %v3737_v0 = vld [vmem:[%s4569_s12 + $0x80] sm:$0xff]  ;;  %vm1953_vm7 = vweird.f32 %v1947_v37 }
 0x405   : > { %v1930_v38 = vmul.f32 %v4093_v25, %v5469_v60  ;;  %v1909_v11 = vadd.f32 %v1908_v40, %v6456_v33  ;;  %v1959_v40 = vand.u32 2147483648, %v1947_v37  ;;  %vm1935_vm4 = vweird.f32 %v4093_v25 }
 0x406   : > { %v1884_v17 = vpop.f32.mrf.mxu0  ;;  %v4095_v59 = vpop.eup %4094  ;;  %v3743_v30 = vmul.f32 -1.442695, %v2050_v10  ;;  %vm5482_vm8 = vmor %vm1934_vm6, %vm1935_vm4 }
 0x407   : > { %v1931_v15 = vsub.f32 1.0, %v1930_v38  ;;  %v1922_v31 = vadd.f32 %v1921_v62, %v1909_v11  ;;  %v5476_v39 = vadd.f32 1.0, %v4095_v59  ;;  %v1957_v62 = vand.u32 2147483647, %v1947_v37 }
 0x408   : > { %v1960_v59 = vor.u32 1.1754944e-38, %v1959_v40 }
 0x409   : > { %v3735_v49 = vmul.f32 -1.442695, %v1922_v31  ;;  %v1932_v41 = vmul.f32 %v4093_v25, %v1931_v15  ;;  %vm1958_vm10 = vcmp.eq.f32.partialorder %v1957_v62, 8.507059e+37  ;;  %vm2079_vm1 = vweird.f32 %v5476_v39 }
 0x40a   : > { %v4097_v9 = vpop.eup %4096 }
 0x40b   : > { %v2045_v56 = vpop.f32.mrf.mxu3  ;;  %v1949_v24 = vmul.f32 %v4097_v9, %v1947_v37  ;;  %4098 = vpow2.f32 %v3735_v49  ;;  %vm1954_vm5 = vweird.f32 %v4097_v9  ;;  %v1933_v10 = vadd.f32 %v4093_v25, %v1932_v41 }
 0x40c   : > { %v1910_v61 = vpop.f32.mrf.mxu2  ;;  %4100 = vpow2.f32 %v3743_v30  ;;  %v1940_v56 = vand.u32 2147483648, %v5469_v60  ;;  %vm1955_vm9 = vmor %vm1953_vm7, %vm1954_vm5 }
 0x40d   : > { %v1950_v19 = vsub.f32 1.0, %v1949_v24  ;;  %4102 = vrcp.f32 %v5476_v39  ;;  %v1938_v24 = vand.u32 2147483647, %v5469_v60  ;;  %v1937_v41 = vsel %vm5482_vm8, %v4093_v25, %v1933_v10 }
 0x40e   : > { %v2004_v28 = vpop.f32.mrf.mxu0  ;;  %4104 = vtanh.f32 %v1896_v57  ;;  %v1941_v49 = vor.u32 1.1754944e-38, %v1940_v56 }
 0x40f   : > { %v1951_v38 = vmul.f32 %v4097_v9, %v1950_v19  ;;  %v2047_v11 = vadd.f32 %v3737_v0, %v2004_v28  ;;  %vm1939_vm11 = vcmp.eq.f32.partialorder %v1938_v24, 8.507059e+37 }
 0x410   : > { %v1942_v19 = vsel %vm1939_vm11, %v1941_v49, %v1937_v41 }
 0x411   : > { %v1952_v16 = vadd.f32 %v4097_v9, %v1951_v38  ;;  %v3741_v6 = vmul.f32 -1.442695, %v2047_v11  ;;  %v4099_v17 = vpop.eup %4098 }
 0x412   : > { %v4101_v15 = vpop.eup %4100  ;;  %v1967_v30 = vadd.f32 1.0, %v4099_v17 }
 0x413   : > { %v1956_v31 = vsel %vm1955_vm9, %v4097_v9, %v1952_v16  ;;  %v5489_v37 = vpop.eup %4102  ;;  %4106 = vpow2.f32 %v3741_v6  ;;  %v5494_v25 = vadd.f32 1.0, %v4101_v15  ;;  %v3739_v15 = vld [vmem:[%s4569_s12 + $0x90] sm:$0xff] }
 0x414   : > { %v1961_v0 = vsel %vm1958_vm10, %v1960_v59, %v1956_v31  ;;  %4108 = vrcp.f32 %v1967_v30  ;;  %v2075_v57 = vmul.f32 %v5489_v37, %v5476_v39  ;;  %v4105_v38 = vpop.eup %4104  ;;  %v1977_v41 = vand.u32 2147483647, %v1967_v30 }
 0x415   : > { %v1983_v40 = vmul.f32 %v1961_v0, %v5336_v1  ;;  %v1984_v9 = vmul.f32 %v4105_v38, %v1942_v19  ;;  %4110 = vrcp.f32 %v5494_v25  ;;  %v1979_v1 = vand.u32 2147483648, %v1967_v30 }
 0x416   : > { %v2006_v28 = vpop.f32.mrf.mxu0  ;;  %v2076_v11 = vsub.f32 1.0, %v2075_v57  ;;  %vm1973_vm13 = vweird.f32 %v1967_v30  ;;  %vm2080_vm14 = vweird.f32 %v5489_v37  ;;  %vm1978_vm0 = vcmp.eq.f32.partialorder %v1977_v41, 8.507059e+37 }
 0x417   : > { %v5496_v56 = vadd.f32 %v1984_v9, %v1983_v40  ;;  %v1980_v19 = vor.u32 1.1754944e-38, %v1979_v1  ;;  %vm5510_vm2 = vmor %vm2079_vm1, %vm2080_vm14  ;;  %vm2099_vm9 = vweird.f32 %v5494_v25 }
 0x418   : > { %v2030_v60 = vpop.f32.mrf.mxu2  ;;  %v2077_v17 = vmul.f32 %v5489_v37, %v2076_v11 }
 0x419   : > { %v4107_v62 = vpop.eup %4106  ;;  %v2049_v28 = vadd.f32 %v3739_v15, %v2030_v60 }
 0x41a   : > { %v4109_v10 = vpop.eup %4108  ;;  %v2054_v61 = vadd.f32 1.0, %v4107_v62  ;;  %v2078_v57 = vadd.f32 %v5489_v37, %v2077_v17  ;;  %v2085_v62 = vand.u32 2147483648, %v5476_v39 }
 0x41b   : > { %v1969_v24 = vmul.f32 %v4109_v10, %v1967_v30  ;;  %vm1974_vm12 = vweird.f32 %v4109_v10  ;;  %v5502_v31 = vpop.eup %4110 }
 0x41c   : > { %4112 = vrcp.f32 %v2054_v61  ;;  %vm1975_vm15 = vmor %vm1973_vm13, %vm1974_vm12  ;;  %v2095_v30 = vmul.f32 %v5502_v31, %v5494_v25  ;;  %v2082_v17 = vsel %vm5510_vm2, %v5489_v37, %v2078_v57  ;;  %v2086_v41 = vor.u32 1.1754944e-38, %v2085_v62 }
 0x41d   : > { %v1970_v6 = vsub.f32 1.0, %v1969_v24  ;;  %4114 = vtanh.f32 %v5496_v56  ;;  %vm2060_vm4 = vweird.f32 %v2054_v61  ;;  %vm2100_vm8 = vweird.f32 %v5502_v31 }
 0x41e   : > { %4116 = vtanh.f32 %v2049_v28  ;;  %vm2101_vm10 = vmor %vm2099_vm9, %vm2100_vm8 }
 0x41f   : > { %v1971_v59 = vmul.f32 %v4109_v10, %v1970_v6 }
 0x420   : > { %v2032_v16 = vpop.f32.mrf.mxu2 }
 0x421   : > { %v1972_v49 = vadd.f32 %v4109_v10, %v1971_v59  ;;  %v2083_v16 = vand.u32 2147483647, %v5476_v39  ;;  %v2064_v59 = vand.u32 2147483647, %v2054_v61 }
 0x422   : > { %v4113_v0 = vpop.eup %4112 }
 0x423   : > { %v2056_v40 = vmul.f32 %v4113_v0, %v2054_v61  ;;  %v1976_v38 = vsel %vm1975_vm15, %v4109_v10, %v1972_v49  ;;  %v4115_v9 = vpop.eup %4114  ;;  %v2066_v10 = vand.u32 2147483648, %v2054_v61  ;;  %vm2061_vm3 = vweird.f32 %v4113_v0 }
 0x424   : > { %v1981_v11 = vsel %vm1978_vm0, %v1980_v19, %v1976_v38  ;;  %v2096_v49 = vsub.f32 1.0, %v2095_v30  ;;  %vm2084_vm5 = vcmp.eq.f32.partialorder %v2083_v16, 8.507059e+37  ;;  %vm2062_vm6 = vmor %vm2060_vm4, %vm2061_vm3  ;;  %vm2065_vm7 = vcmp.eq.f32.partialorder %v2064_v59, 8.507059e+37  ;;  %v4117_v28 = vpop.eup %4116  ;;  %v6602_v59 = vld [vmem:[#allocation70_spill] sm:$0xff] }
 0x425   : > { %v2057_v60 = vsub.f32 1.0, %v2056_v40  ;;  %v1987_v6 = vmul.f32 %v4115_v9, %v1981_v11  ;;  %v2067_v39 = vor.u32 1.1754944e-38, %v2066_v10  ;;  %v2087_v40 = vsel %vm2084_vm5, %v2086_v41, %v2082_v17  ;;  %v6600_v17 = vld [vmem:[#allocation47_spill] sm:$0xff] }
 0x426   : > { %v2097_v57 = vmul.f32 %v5502_v31, %v2096_v49  ;;  %v2109_v9 = vmul.f32 %v2087_v40, %v5365_v58  ;;  %v2103_v11 = vand.u32 2147483647, %v5494_v25  ;;  %v6604_v41 = vld [vmem:[#allocation51_spill] sm:$0xff]  ;;  %v6605_v49 = vld [vmem:[#allocation57_spill] sm:$0xff]  ;;  %v6608_v40 = vld [vmem:[#allocation72_spill] sm:$0xff] }
 0x427   : > { %v2058_v1 = vmul.f32 %v4113_v0, %v2057_v60  ;;  %3736 = vst [vmem:[%s4576_s21 + $0x18] sm:$0xff] %v1987_v6  ;;  %v2115_v15 = vpack.c.bf16 %v1987_v6, %v1987_v6 }
 0x428   : > { %v2098_v30 = vadd.f32 %v5502_v31, %v2097_v57  ;;  %vm2104_vm11 = vcmp.eq.f32.partialorder %v2103_v11, 8.507059e+37  ;;  %v6611_v57 = vld [vmem:[#allocation65_spill] sm:$0xff] }
 0x429   : > { %v2059_v19 = vadd.f32 %v4113_v0, %v2058_v1  ;;  %2137 = vmatmul.bf16.vlgmr.msrb.gmra.mxu1 %v2115_v15  ;;  %2163 = vmatmul.bf16.vlgmr.msrb.gmra.mxu3 %v2115_v15  ;;  %v6601_v1 = vld [vmem:[#allocation52_spill] sm:$0xff]  ;;  %v6617_v11 = vld [vmem:[#allocation77_spill] sm:$0xff] }
 0x42a   : > { %2303 = vmatpush.bf16.msrb.mxu1 %v6396_v23  ;;  %2329 = vmatpush.bf16.msrb.mxu3 %v6397_v20  ;;  %v2102_v58 = vsel %vm2101_vm10, %v5502_v31, %v2098_v30  ;;  %v6599_v31 = vld [vmem:[#allocation67_spill] sm:$0xff]  ;;  %v6615_v30 = vld [vmem:[#allocation69_spill] sm:$0xff] }
 0x42b   : > { %v2063_v37 = vsel %vm2062_vm6, %v4113_v0, %v2059_v19  ;;  %v2105_v0 = vand.u32 2147483648, %v5494_v25  ;;  %v6598_v25 = vld [vmem:[#allocation66_spill] sm:$0xff]  ;;  %v6606_v19 = vld [vmem:[#allocation60_spill] sm:$0xff] }
 0x42c   : > { %v2068_v38 = vsel %vm2065_vm7, %v2067_v39, %v2063_v37  ;;  %v6607_v39 = vld [vmem:[#allocation61_spill] sm:$0xff] }
 0x42d   : > { %v2110_v62 = vmul.f32 %v4117_v28, %v2068_v38  ;;  %v2106_v24 = vor.u32 1.1754944e-38, %v2105_v0  ;;  %v6609_v37 = vld [vmem:[#allocation73_spill] sm:$0xff]  ;;  %v6610_v28 = vld [vmem:[#allocation64_spill] sm:$0xff]  ;;  %v6612_v38 = vld [vmem:[#allocation74_spill] sm:$0xff] }
 0x42e   : > { %2304 = vmatpush.bf16.msrb.mxu1 %v6398_v54  ;;  %2330 = vmatpush.bf16.msrb.mxu3 %v6399_v50  ;;  %v6616_v0 = vld [vmem:[#allocation76_spill] sm:$0xff] }
 0x42f   : > { %v5525_v61 = vadd.f32 %v2110_v62, %v2109_v9  ;;  %v2107_v16 = vsel %vm2104_vm11, %v2106_v24, %v2102_v58  ;;  %v6613_v9 = vld [vmem:[#allocation75_spill] sm:$0xff]  ;;  %v6614_v62 = vld [vmem:[#allocation68_spill] sm:$0xff]  ;;  %v6618_v58 = vld [vmem:[#allocation78_spill] sm:$0xff] }
 0x430   : > { %v6619_v24 = vld [vmem:[#allocation79_spill] sm:$0xff] }
 0x431   : > { %4118 = vtanh.f32 %v5525_v61 }
 0x432   : > { %2305 = vmatpush.bf16.msrb.mxu1 %v6400_v53  ;;  %2331 = vmatpush.bf16.msrb.mxu3 %v6401_v36 }
 0x436   : > { %2306 = vmatpush.bf16.msrb.mxu1 %v6402_v21  ;;  %2332 = vmatpush.bf16.msrb.mxu3 %v6403_v44 }
 0x437   : > { %v4119_v60 = vpop.eup %4118 }
 0x438   : > { %v2113_v6 = vmul.f32 %v4119_v60, %v2107_v16  ;;  %v6620_v60 = vld [vmem:[#allocation86_spill] sm:$0xff]  ;;  %v6621_v16 = vld [vmem:[#allocation87_spill] sm:$0xff] }
 0x439   : > { %2189 = vmatmul.bf16.vlgmr.msra.gmra.mxu1 %v2115_v15  ;;  %2215 = vmatmul.bf16.vlgmr.msra.gmra.mxu3 %v2115_v15  ;;  %v6603_v15 = vld [vmem:[#allocation71_spill] sm:$0xff] }
 0x43a   : > { %v2114_v10 = vpack.c.bf16 %v2113_v6, %v2113_v6  ;;  %2307 = vmatpush.bf16.msrb.mxu1 %v6404_v26  ;;  %2333 = vmatpush.bf16.msrb.mxu3 %v6405_v45  ;;  %v6622_v6 = vld [vmem:[#allocation80_spill] sm:$0xff] }
 0x43c   : > { %2124 = vmatmul.bf16.vlgmr.msrb.gmra.mxu0 %v2114_v10  ;;  %2150 = vmatmul.bf16.vlgmr.msrb.gmra.mxu2 %v2114_v10 }
 0x43d   : > { %2290 = vmatpush.bf16.msrb.mxu0 %v4588_v4  ;;  %2316 = vmatpush.bf16.msrb.mxu2 %v4603_v22 }
 0x43e   : > { %2308 = vmatpush.bf16.msrb.mxu1 %v6406_v47  ;;  %2334 = vmatpush.bf16.msrb.mxu3 %v6407_v12 }
 0x441   : > { %2291 = vmatpush.bf16.msrb.mxu0 %v4595_v13  ;;  %2317 = vmatpush.bf16.msrb.mxu2 %v4615_v35 }
 0x442   : > { %2309 = vmatpush.bf16.msrb.mxu1 %v6408_v14  ;;  %2335 = vmatpush.bf16.msrb.mxu3 %v6409_v7 }
 0x445   : > { %2292 = vmatpush.bf16.msrb.mxu0 %v4607_v29  ;;  %2318 = vmatpush.bf16.msrb.mxu2 %v4621_v43 }
 0x446   : > { %2310 = vmatpush.bf16.msrb.mxu1 %v6410_v46  ;;  %2336 = vmatpush.bf16.msrb.mxu3 %v6411_v51 }
 0x449   : > { %2293 = vmatpush.bf16.msrb.mxu0 %v4619_v42  ;;  %2311 = vmatmul.bf16.vlgmr.msrb.gmra.mxu1 %v2114_v10 }
 0x44a   : > { %2424 = vmatpush.bf16.msra.mxu1 %v6412_v2  ;;  %2450 = vmatpush.bf16.msra.mxu3 %v6413_v34 }
 0x44b   : > { %2319 = vmatpush.bf16.msrb.mxu2 %v4633_v55  ;;  %2337 = vmatmul.bf16.vlgmr.msrb.gmra.mxu3 %v2114_v10 }
 0x44c   : > { %2176 = vmatmul.bf16.vlgmr.msra.gmra.mxu0 %v2114_v10  ;;  %2202 = vmatmul.bf16.vlgmr.msra.gmra.mxu2 %v2114_v10 }
 0x44d   : > { %2294 = vmatpush.bf16.msrb.mxu0 %v6356_v48 }
 0x44e   : > { %2425 = vmatpush.bf16.msra.mxu1 %v6414_v8  ;;  %2451 = vmatpush.bf16.msra.mxu3 %v6415_v3 }
 0x44f   : > { %2320 = vmatpush.bf16.msrb.mxu2 %v6357_v52 }
 0x451   : > { %2295 = vmatpush.bf16.msrb.mxu0 %v6360_v63 }
 0x452   : > { %2426 = vmatpush.bf16.msra.mxu1 %v6416_v18  ;;  %2452 = vmatpush.bf16.msra.mxu3 %v6417_v32 }
 0x453   : > { %2321 = vmatpush.bf16.msrb.mxu2 %v6361_v27 }
 0x455   : > { %2296 = vmatpush.bf16.msrb.mxu0 %v6600_v17 }
 0x456   : > { %2427 = vmatpush.bf16.msra.mxu1 %v6598_v25  ;;  %2453 = vmatpush.bf16.msra.mxu3 %v6599_v31 }
 0x457   : > { %2322 = vmatpush.bf16.msrb.mxu2 %v6601_v1 }
 0x459   : > { %2297 = vmatpush.bf16.msrb.mxu0 %v6604_v41 }
 0x45a   : > { %2428 = vmatpush.bf16.msra.mxu1 %v6602_v59  ;;  %2454 = vmatpush.bf16.msra.mxu3 %v6603_v15 }
 0x45b   : > { %2323 = vmatpush.bf16.msrb.mxu2 %v6605_v49 }
 0x45c   : > { %2298 = vmatmul.bf16.vlgmr.msrb.gmra.mxu0 %v2114_v10 }
 0x45d   : > { %2411 = vmatpush.bf16.msra.mxu0 %v6606_v19 }
 0x45e   : > { %2429 = vmatpush.bf16.msra.mxu1 %v6608_v40  ;;  %2455 = vmatpush.bf16.msra.mxu3 %v6609_v37 }
 0x45f   : > { %2437 = vmatpush.bf16.msra.mxu2 %v6607_v39 }
 0x460   : > { %2324 = vmatmul.bf16.vlgmr.msrb.gmra.mxu2 %v2114_v10  ;;  %v6623_v10 = vld [vmem:[#allocation81_spill] sm:$0xff] }
 0x461   : > { %2412 = vmatpush.bf16.msra.mxu0 %v6610_v28 }
 0x462   : > { %2430 = vmatpush.bf16.msra.mxu1 %v6612_v38  ;;  %2456 = vmatpush.bf16.msra.mxu3 %v6613_v9  ;;  %v6624_v9 = vld [vmem:[#allocation90_spill] sm:$0xff] }
 0x463   : > { %2438 = vmatpush.bf16.msra.mxu2 %v6611_v57 }
 0x465   : > { %2413 = vmatpush.bf16.msra.mxu0 %v6614_v62  ;;  %v6625_v62 = vld [vmem:[#allocation91_spill] sm:$0xff] }
 0x466   : > { %2431 = vmatpush.bf16.msra.mxu1 %v6616_v0  ;;  %2457 = vmatpush.bf16.msra.mxu3 %v6617_v11  ;;  %v6627_v0 = vld [vmem:[#allocation83_spill] sm:$0xff]  ;;  %v6628_v11 = vld [vmem:[#allocation94_spill] sm:$0xff] }
 0x467   : > { %2439 = vmatpush.bf16.msra.mxu2 %v6615_v30  ;;  %v6626_v30 = vld [vmem:[#allocation82_spill] sm:$0xff] }
 0x469   : > { %2414 = vmatpush.bf16.msra.mxu0 %v6620_v60  ;;  %v6631_v60 = vld [vmem:[#allocation85_spill] sm:$0xff] }
 0x46a   : > { %2476 = vmatpush.bf16.msrb.mxu1 %v6618_v58  ;;  %2502 = vmatpush.bf16.msrb.mxu3 %v6619_v24  ;;  %v6629_v58 = vld [vmem:[#allocation95_spill] sm:$0xff]  ;;  %v6630_v24 = vld [vmem:[#allocation84_spill] sm:$0xff] }
 0x46b   : > { %2440 = vmatpush.bf16.msra.mxu2 %v6621_v16  ;;  %v6632_v16 = vld [vmem:[#allocation98_spill] sm:$0xff] }
 0x46d   : > { %2415 = vmatpush.bf16.msra.mxu0 %v6624_v9  ;;  %v6635_v9 = vld [vmem:[#allocation89_spill] sm:$0xff] }
 0x46e   : > { %2477 = vmatpush.bf16.msrb.mxu1 %v6622_v6  ;;  %2503 = vmatpush.bf16.msrb.mxu3 %v6623_v10  ;;  %v6633_v6 = vld [vmem:[#allocation99_spill] sm:$0xff]  ;;  %v6634_v10 = vld [vmem:[#allocation88_spill] sm:$0xff] }
 0x46f   : > { %2441 = vmatpush.bf16.msra.mxu2 %v6625_v62  ;;  %v6636_v62 = vld [vmem:[#allocation102_spill] sm:$0xff] }
 0x471   : > { %2416 = vmatpush.bf16.msra.mxu0 %v6628_v11  ;;  %v6639_v11 = vld [vmem:[#allocation105_spill] sm:$0xff] }
 0x472   : > { %2478 = vmatpush.bf16.msrb.mxu1 %v6626_v30  ;;  %2504 = vmatpush.bf16.msrb.mxu3 %v6627_v0  ;;  %v6637_v30 = vld [vmem:[#allocation103_spill] sm:$0xff]  ;;  %v6638_v0 = vld [vmem:[#allocation104_spill] sm:$0xff] }
 0x473   : > { %2442 = vmatpush.bf16.msra.mxu2 %v6629_v58  ;;  %v6640_v58 = vld [vmem:[#allocation92_spill] sm:$0xff] }
 0x475   : > { %2417 = vmatpush.bf16.msra.mxu0 %v6632_v16  ;;  %v6643_v16 = vld [vmem:[#allocation107_spill] sm:$0xff] }
 0x476   : > { %2479 = vmatpush.bf16.msrb.mxu1 %v6630_v24  ;;  %2505 = vmatpush.bf16.msrb.mxu3 %v6631_v60  ;;  %v6641_v24 = vld [vmem:[#allocation93_spill] sm:$0xff]  ;;  %v6642_v60 = vld [vmem:[#allocation106_spill] sm:$0xff] }
 0x477   : > { %2443 = vmatpush.bf16.msra.mxu2 %v6633_v6  ;;  %v6644_v6 = vld [vmem:[#allocation96_spill] sm:$0xff] }
 0x479   : > { %2418 = vmatpush.bf16.msra.mxu0 %v6636_v62  ;;  %v6647_v62 = vld [vmem:[#allocation109_spill] sm:$0xff] }
 0x47a   : > { %2480 = vmatpush.bf16.msrb.mxu1 %v6634_v10  ;;  %2506 = vmatpush.bf16.msrb.mxu3 %v6635_v9  ;;  %v6645_v10 = vld [vmem:[#allocation97_spill] sm:$0xff]  ;;  %v6646_v9 = vld [vmem:[#allocation108_spill] sm:$0xff] }
 0x47b   : > { %2444 = vmatpush.bf16.msra.mxu2 %v6637_v30  ;;  %v6648_v30 = vld [vmem:[#allocation100_spill] sm:$0xff] }
 0x47d   : > { %2463 = vmatpush.bf16.msrb.mxu0 %v6638_v0  ;;  %v6649_v0 = vld [vmem:[#allocation101_spill] sm:$0xff] }
 0x47e   : > { %2481 = vmatpush.bf16.msrb.mxu1 %v6640_v58  ;;  %2507 = vmatpush.bf16.msrb.mxu3 %v6641_v24  ;;  %v6651_v58 = vld [vmem:[#allocation111_spill] sm:$0xff]  ;;  %v6652_v24 = vld [vmem:[#allocation112_spill] sm:$0xff] }
 0x47f   : > { %2489 = vmatpush.bf16.msrb.mxu2 %v6639_v11  ;;  %v6650_v11 = vld [vmem:[#allocation110_spill] sm:$0xff] }
 0x481   : > { %2464 = vmatpush.bf16.msrb.mxu0 %v6642_v60  ;;  %v6653_v60 = vld [vmem:[#allocation113_spill] sm:$0xff] }
 0x482   : > { %2482 = vmatpush.bf16.msrb.mxu1 %v6644_v6  ;;  %2508 = vmatpush.bf16.msrb.mxu3 %v6645_v10  ;;  %v6655_v6 = vld [vmem:[#allocation115_spill] sm:$0xff]  ;;  %v6656_v10 = vld [vmem:[#allocation116_spill] sm:$0xff] }
 0x483   : > { %2490 = vmatpush.bf16.msrb.mxu2 %v6643_v16  ;;  %v6654_v16 = vld [vmem:[#allocation114_spill] sm:$0xff] }
 0x485   : > { %2465 = vmatpush.bf16.msrb.mxu0 %v6646_v9  ;;  %v6657_v9 = vld [vmem:[#allocation117_spill] sm:$0xff] }
 0x486   : > { %2483 = vmatpush.bf16.msrb.mxu1 %v6648_v30  ;;  %2509 = vmatpush.bf16.msrb.mxu3 %v6649_v0  ;;  %v6659_v30 = vld [vmem:[#allocation119_spill] sm:$0xff] }
 0x487   : > { %2491 = vmatpush.bf16.msrb.mxu2 %v6647_v62  ;;  %v6658_v62 = vld [vmem:[#allocation118_spill] sm:$0xff] }
 0x489   : > { %2466 = vmatpush.bf16.msrb.mxu0 %v6650_v11 }
 0x48b   : > { %2492 = vmatpush.bf16.msrb.mxu2 %v6651_v58 }
 0x48d   : > { %2467 = vmatpush.bf16.msrb.mxu0 %v6652_v24 }
 0x48f   : > { %2493 = vmatpush.bf16.msrb.mxu2 %v6653_v60  ;;  %v6660_v60 = vld [vmem:[#allocation40_spill] sm:$0xff] }
 0x491   : > { %2468 = vmatpush.bf16.msrb.mxu0 %v6654_v16 }
 0x493   : > { %2494 = vmatpush.bf16.msrb.mxu2 %v6655_v6 }
 0x495   : > { %2469 = vmatpush.bf16.msrb.mxu0 %v6656_v10 }
 0x497   : > { %2495 = vmatpush.bf16.msrb.mxu2 %v6657_v9  ;;  %v6661_v9 = vld [vmem:[#allocation44_spill] sm:$0xff] }
 0x499   : > { %2470 = vmatpush.bf16.msrb.mxu0 %v6658_v62 }
 0x49b   : > { %2496 = vmatpush.bf16.msrb.mxu2 %v6659_v30 }
 0x4a6   : > { %v2138_v0 = vpop.f32.mrf.mxu1 }
 0x4ac   : > { %v2164_v11 = vpop.f32.mrf.mxu3 }
 0x4ae   : > { %v2140_v38 = vpop.f32.mrf.mxu1 }
 0x4af   : > { %v3749_v38 = vld [vmem:[%s4569_s12 + $0xa8] sm:$0xff] }
 0x4b4   : > { %v2166_v58 = vpop.f32.mrf.mxu3 }
 0x4b6   : > { %v2190_v24 = vpop.f32.mrf.mxu1 }
 0x4b9   : > { %v2125_v57 = vpop.f32.mrf.mxu0 }
 0x4ba   : > { %v2126_v28 = vadd.f32 %v2125_v57, %v6660_v60 }
 0x4bc   : > { %v2139_v16 = vadd.f32 %v2138_v0, %v2126_v28  ;;  %v2216_v37 = vpop.f32.mrf.mxu3 }
 0x4be   : > { %v3744_v6 = vmul.f32 -1.442695, %v2139_v16  ;;  %v2192_v40 = vpop.f32.mrf.mxu1 }
 0x4bf   : > { %v2151_v10 = vpop.f32.mrf.mxu2 }
 0x4c0   : > { %4120 = vpow2.f32 %v3744_v6  ;;  %v2152_v39 = vadd.f32 %v2151_v10, %v6661_v9 }
 0x4c1   : > { %v2127_v62 = vpop.f32.mrf.mxu0 }
 0x4c2   : > { %v2165_v19 = vadd.f32 %v2164_v11, %v2152_v39  ;;  %v3751_v62 = vld [vmem:[%s4569_s12 + $0xb8] sm:$0xff] }
 0x4c4   : > { %v3745_v30 = vmul.f32 -1.442695, %v2165_v19  ;;  %v2218_v49 = vpop.f32.mrf.mxu3 }
 0x4c6   : > { %v4121_v41 = vpop.eup %4120  ;;  %4122 = vpow2.f32 %v3745_v30  ;;  %v2312_v58 = vpop.f32.mrf.mxu1 }
 0x4c7   : > { %v5629_v15 = vadd.f32 1.0, %v4121_v41  ;;  %v2343_v57 = vadd.f32 %v3749_v38, %v2312_v58  ;;  %v2153_v28 = vpop.f32.mrf.mxu2 }
 0x4c9   : > { %4124 = vrcp.f32 %v5629_v15  ;;  %v3753_v40 = vmul.f32 -1.442695, %v2343_v57  ;;  %v2177_v0 = vpop.f32.mrf.mxu0  ;;  %vm2229_vm14 = vweird.f32 %v5629_v15 }
 0x4ca   : > { %v2178_v9 = vadd.f32 %v2177_v0, %v6457_v5 }
 0x4cb   : > { %4126 = vpow2.f32 %v3753_v40 }
 0x4cc   : > { %v4123_v16 = vpop.eup %4122  ;;  %v2191_v25 = vadd.f32 %v2190_v24, %v2178_v9 }
 0x4cd   : > { %v2242_v6 = vadd.f32 1.0, %v4123_v16 }
 0x4ce   : > { %v2338_v39 = vpop.f32.mrf.mxu3  ;;  %v2314_v11 = vpop.f32.mrf.mxu1 }
 0x4cf   : > { %v4125_v19 = vpop.eup %4124  ;;  %4128 = vrcp.f32 %v2242_v6  ;;  %v2203_v49 = vpop.f32.mrf.mxu2  ;;  %v2345_v10 = vadd.f32 %v3751_v62, %v2338_v39  ;;  %v3748_v62 = vld [vmem:[%s4569_s12 + $0xa0] sm:$0xff]  ;;  %vm2248_vm15 = vweird.f32 %v2242_v6 }
 0x4d0   : > { %v2225_v30 = vmul.f32 %v4125_v19, %v5629_v15  ;;  %v2204_v41 = vadd.f32 %v2203_v49, %v6456_v33  ;;  %v2254_v49 = vand.u32 2147483648, %v2242_v6  ;;  %vm2230_vm12 = vweird.f32 %v4125_v19 }
 0x4d1   : > { %v2179_v38 = vpop.f32.mrf.mxu0  ;;  %v4127_v58 = vpop.eup %4126  ;;  %v3754_v40 = vmul.f32 -1.442695, %v2345_v10  ;;  %vm5642_vm0 = vmor %vm2229_vm14, %vm2230_vm12 }
 0x4d2   : > { %v2226_v28 = vsub.f32 1.0, %v2225_v30  ;;  %v2217_v57 = vadd.f32 %v2216_v37, %v2204_v41  ;;  %v5636_v60 = vadd.f32 1.0, %v4127_v58  ;;  %v2252_v37 = vand.u32 2147483647, %v2242_v6 }
 0x4d3   : > { %v2255_v58 = vor.u32 1.1754944e-38, %v2254_v49 }
 0x4d4   : > { %v3746_v11 = vmul.f32 -1.442695, %v2217_v57  ;;  %v2227_v17 = vmul.f32 %v4125_v19, %v2226_v28  ;;  %vm2253_vm2 = vcmp.eq.f32.partialorder %v2252_v37, 8.507059e+37  ;;  %vm2374_vm9 = vweird.f32 %v5636_v60 }
 0x4d5   : > { %v4129_v16 = vpop.eup %4128 }
 0x4d6   : > { %v2340_v59 = vpop.f32.mrf.mxu3  ;;  %v2244_v1 = vmul.f32 %v4129_v16, %v2242_v6  ;;  %4130 = vpow2.f32 %v3746_v11  ;;  %vm2249_vm13 = vweird.f32 %v4129_v16  ;;  %v2228_v10 = vadd.f32 %v4125_v19, %v2227_v17 }
 0x4d7   : > { %v2205_v31 = vpop.f32.mrf.mxu2  ;;  %4132 = vpow2.f32 %v3754_v40  ;;  %v2235_v59 = vand.u32 2147483648, %v5629_v15  ;;  %vm2250_vm1 = vmor %vm2248_vm15, %vm2249_vm13 }
 0x4d8   : > { %v2245_v39 = vsub.f32 1.0, %v2244_v1  ;;  %4134 = vrcp.f32 %v5636_v60  ;;  %v2233_v1 = vand.u32 2147483647, %v5629_v15  ;;  %v2232_v17 = vsel %vm5642_vm0, %v4125_v19, %v2228_v10 }
 0x4d9   : > { %v2299_v0 = vpop.f32.mrf.mxu0  ;;  %4136 = vtanh.f32 %v2191_v25  ;;  %v2236_v11 = vor.u32 1.1754944e-38, %v2235_v59 }
 0x4da   : > { %v2246_v30 = vmul.f32 %v4129_v16, %v2245_v39  ;;  %v2342_v41 = vadd.f32 %v3748_v62, %v2299_v0  ;;  %vm2234_vm3 = vcmp.eq.f32.partialorder %v2233_v1, 8.507059e+37 }
 0x4db   : > { %v2237_v39 = vsel %vm2234_vm3, %v2236_v11, %v2232_v17 }
 0x4dc   : > { %v2247_v9 = vadd.f32 %v4129_v16, %v2246_v30  ;;  %v3752_v24 = vmul.f32 -1.442695, %v2342_v41  ;;  %v4131_v38 = vpop.eup %4130 }
 0x4dd   : > { %v4133_v28 = vpop.eup %4132  ;;  %v2262_v40 = vadd.f32 1.0, %v4131_v38 }
 0x4de   : > { %v2251_v57 = vsel %vm2250_vm1, %v4129_v16, %v2247_v9  ;;  %v5649_v6 = vpop.eup %4134  ;;  %4138 = vpow2.f32 %v3752_v24  ;;  %v5654_v19 = vadd.f32 1.0, %v4133_v28  ;;  %v3750_v28 = vld [vmem:[%s4569_s12 + $0xb0] sm:$0xff] }
 0x4df   : > { %v2256_v62 = vsel %vm2253_vm2, %v2255_v58, %v2251_v57  ;;  %4140 = vrcp.f32 %v2262_v40  ;;  %v2370_v25 = vmul.f32 %v5649_v6, %v5636_v60  ;;  %v4137_v30 = vpop.eup %4136  ;;  %v2272_v17 = vand.u32 2147483647, %v2262_v40 }
 0x4e0   : > { %v2278_v49 = vmul.f32 %v2256_v62, %v5496_v56  ;;  %v2279_v16 = vmul.f32 %v4137_v30, %v2237_v39  ;;  %4142 = vrcp.f32 %v5654_v19  ;;  %v2274_v56 = vand.u32 2147483648, %v2262_v40 }
 0x4e1   : > { %v2301_v0 = vpop.f32.mrf.mxu0  ;;  %v2371_v41 = vsub.f32 1.0, %v2370_v25  ;;  %vm2268_vm5 = vweird.f32 %v2262_v40  ;;  %vm2375_vm6 = vweird.f32 %v5649_v6  ;;  %vm2273_vm8 = vcmp.eq.f32.partialorder %v2272_v17, 8.507059e+37 }
 0x4e2   : > { %v5656_v59 = vadd.f32 %v2279_v16, %v2278_v49  ;;  %v2275_v39 = vor.u32 1.1754944e-38, %v2274_v56  ;;  %vm5670_vm10 = vmor %vm2374_vm9, %vm2375_vm6  ;;  %vm2394_vm1 = vweird.f32 %v5654_v19 }
 0x4e3   : > { %v2325_v15 = vpop.f32.mrf.mxu2  ;;  %v2372_v38 = vmul.f32 %v5649_v6, %v2371_v41 }
 0x4e4   : > { %v4139_v37 = vpop.eup %4138  ;;  %v2344_v0 = vadd.f32 %v3750_v28, %v2325_v15 }
 0x4e5   : > { %v4141_v10 = vpop.eup %4140  ;;  %v2349_v31 = vadd.f32 1.0, %v4139_v37  ;;  %v2373_v25 = vadd.f32 %v5649_v6, %v2372_v38  ;;  %v2380_v37 = vand.u32 2147483648, %v5636_v60 }
 0x4e6   : > { %v2264_v1 = vmul.f32 %v4141_v10, %v2262_v40  ;;  %vm2269_vm4 = vweird.f32 %v4141_v10  ;;  %v5662_v57 = vpop.eup %4142 }
 0x4e7   : > { %4144 = vrcp.f32 %v2349_v31  ;;  %vm2270_vm7 = vmor %vm2268_vm5, %vm2269_vm4  ;;  %v2390_v40 = vmul.f32 %v5662_v57, %v5654_v19  ;;  %v2377_v38 = vsel %vm5670_vm10, %v5649_v6, %v2373_v25  ;;  %v2381_v17 = vor.u32 1.1754944e-38, %v2380_v37 }
 0x4e8   : > { %v2265_v24 = vsub.f32 1.0, %v2264_v1  ;;  %4146 = vtanh.f32 %v5656_v59  ;;  %vm2355_vm12 = vweird.f32 %v2349_v31  ;;  %vm2395_vm0 = vweird.f32 %v5662_v57 }
 0x4e9   : > { %4148 = vtanh.f32 %v2344_v0  ;;  %vm2396_vm2 = vmor %vm2394_vm1, %vm2395_vm0 }
 0x4ea   : > { %v2266_v58 = vmul.f32 %v4141_v10, %v2265_v24 }
 0x4eb   : > { %v2327_v9 = vpop.f32.mrf.mxu2 }
 0x4ec   : > { %v2267_v11 = vadd.f32 %v4141_v10, %v2266_v58  ;;  %v2378_v9 = vand.u32 2147483647, %v5636_v60  ;;  %v2359_v58 = vand.u32 2147483647, %v2349_v31 }
 0x4ed   : > { %v4145_v62 = vpop.eup %4144 }
 0x4ee   : > { %v2351_v49 = vmul.f32 %v4145_v62, %v2349_v31  ;;  %v2271_v30 = vsel %vm2270_vm7, %v4141_v10, %v2267_v11  ;;  %v4147_v16 = vpop.eup %4146  ;;  %v2361_v10 = vand.u32 2147483648, %v2349_v31  ;;  %vm2356_vm11 = vweird.f32 %v4145_v62 }
 0x4ef   : > { %v2276_v41 = vsel %vm2273_vm8, %v2275_v39, %v2271_v30  ;;  %v2391_v11 = vsub.f32 1.0, %v2390_v40  ;;  %vm2379_vm13 = vcmp.eq.f32.partialorder %v2378_v9, 8.507059e+37  ;;  %vm2357_vm14 = vmor %vm2355_vm12, %vm2356_vm11  ;;  %vm2360_vm15 = vcmp.eq.f32.partialorder %v2359_v58, 8.507059e+37  ;;  %v4149_v0 = vpop.eup %4148  ;;  %v6670_v58 = vld [vmem:[#allocation70_spill] sm:$0xff] }
 0x4f0   : > { %v2352_v15 = vsub.f32 1.0, %v2351_v49  ;;  %v2282_v24 = vmul.f32 %v4147_v16, %v2276_v41  ;;  %v2362_v60 = vor.u32 1.1754944e-38, %v2361_v10  ;;  %v2382_v49 = vsel %vm2379_vm13, %v2381_v17, %v2377_v38  ;;  %v6668_v38 = vld [vmem:[#allocation47_spill] sm:$0xff] }
 0x4f1   : > { %v2392_v25 = vmul.f32 %v5662_v57, %v2391_v11  ;;  %v2404_v16 = vmul.f32 %v2382_v49, %v5525_v61  ;;  %v2398_v41 = vand.u32 2147483647, %v5654_v19  ;;  %v6672_v17 = vld [vmem:[#allocation51_spill] sm:$0xff]  ;;  %v6673_v11 = vld [vmem:[#allocation57_spill] sm:$0xff]  ;;  %v6676_v49 = vld [vmem:[#allocation72_spill] sm:$0xff] }
 0x4f2   : > { %v2353_v56 = vmul.f32 %v4145_v62, %v2352_v15  ;;  %3747 = vst [vmem:[%s4576_s21 + $0x20] sm:$0xff] %v2282_v24  ;;  %v2410_v28 = vpack.c.bf16 %v2282_v24, %v2282_v24 }
 0x4f3   : > { %v2393_v40 = vadd.f32 %v5662_v57, %v2392_v25  ;;  %vm2399_vm3 = vcmp.eq.f32.partialorder %v2398_v41, 8.507059e+37  ;;  %v6679_v25 = vld [vmem:[#allocation65_spill] sm:$0xff] }
 0x4f4   : > { %v2354_v39 = vadd.f32 %v4145_v62, %v2353_v56  ;;  %2432 = vmatmul.bf16.vlgmr.msra.gmra.mxu1 %v2410_v28  ;;  %2458 = vmatmul.bf16.vlgmr.msra.gmra.mxu3 %v2410_v28  ;;  %v6669_v56 = vld [vmem:[#allocation52_spill] sm:$0xff]  ;;  %v6685_v41 = vld [vmem:[#allocation77_spill] sm:$0xff] }
 0x4f5   : > { %2598 = vmatpush.bf16.msra.mxu1 %v6396_v23  ;;  %2624 = vmatpush.bf16.msra.mxu3 %v6397_v20  ;;  %v2397_v61 = vsel %vm2396_vm2, %v5662_v57, %v2393_v40  ;;  %v6667_v57 = vld [vmem:[#allocation67_spill] sm:$0xff]  ;;  %v6683_v40 = vld [vmem:[#allocation69_spill] sm:$0xff] }
 0x4f6   : > { %v2358_v6 = vsel %vm2357_vm14, %v4145_v62, %v2354_v39  ;;  %v2400_v62 = vand.u32 2147483648, %v5654_v19  ;;  %v6666_v19 = vld [vmem:[#allocation66_spill] sm:$0xff]  ;;  %v6674_v39 = vld [vmem:[#allocation60_spill] sm:$0xff] }
 0x4f7   : > { %v2363_v30 = vsel %vm2360_vm15, %v2362_v60, %v2358_v6  ;;  %v6675_v60 = vld [vmem:[#allocation61_spill] sm:$0xff] }
 0x4f8   : > { %v2405_v37 = vmul.f32 %v4149_v0, %v2363_v30  ;;  %v2401_v1 = vor.u32 1.1754944e-38, %v2400_v62  ;;  %v6677_v6 = vld [vmem:[#allocation73_spill] sm:$0xff]  ;;  %v6678_v0 = vld [vmem:[#allocation64_spill] sm:$0xff]  ;;  %v6680_v30 = vld [vmem:[#allocation74_spill] sm:$0xff] }
 0x4f9   : > { %2599 = vmatpush.bf16.msra.mxu1 %v6398_v54  ;;  %2625 = vmatpush.bf16.msra.mxu3 %v6399_v50  ;;  %v6684_v62 = vld [vmem:[#allocation76_spill] sm:$0xff] }
 0x4fa   : > { %v5685_v31 = vadd.f32 %v2405_v37, %v2404_v16  ;;  %v2402_v9 = vsel %vm2399_vm3, %v2401_v1, %v2397_v61  ;;  %v6681_v16 = vld [vmem:[#allocation75_spill] sm:$0xff]  ;;  %v6682_v37 = vld [vmem:[#allocation68_spill] sm:$0xff]  ;;  %v6686_v61 = vld [vmem:[#allocation78_spill] sm:$0xff] }
 0x4fb   : > { %v6687_v1 = vld [vmem:[#allocation79_spill] sm:$0xff] }
 0x4fc   : > { %4150 = vtanh.f32 %v5685_v31 }
 0x4fd   : > { %2600 = vmatpush.bf16.msra.mxu1 %v6400_v53  ;;  %2626 = vmatpush.bf16.msra.mxu3 %v6401_v36 }
 0x501   : > { %2601 = vmatpush.bf16.msra.mxu1 %v6402_v21  ;;  %2627 = vmatpush.bf16.msra.mxu3 %v6403_v44 }
 0x502   : > { %v4151_v15 = vpop.eup %4150 }
 0x503   : > { %v2408_v24 = vmul.f32 %v4151_v15, %v2402_v9  ;;  %v6688_v15 = vld [vmem:[#allocation86_spill] sm:$0xff]  ;;  %v6689_v9 = vld [vmem:[#allocation87_spill] sm:$0xff] }
 0x504   : > { %2484 = vmatmul.bf16.vlgmr.msrb.gmra.mxu1 %v2410_v28  ;;  %2510 = vmatmul.bf16.vlgmr.msrb.gmra.mxu3 %v2410_v28  ;;  %v6671_v28 = vld [vmem:[#allocation71_spill] sm:$0xff] }
 0x505   : > { %v2409_v10 = vpack.c.bf16 %v2408_v24, %v2408_v24  ;;  %2602 = vmatpush.bf16.msra.mxu1 %v6404_v26  ;;  %2628 = vmatpush.bf16.msra.mxu3 %v6405_v45  ;;  %v6690_v24 = vld [vmem:[#allocation80_spill] sm:$0xff] }
 0x507   : > { %2419 = vmatmul.bf16.vlgmr.msra.gmra.mxu0 %v2409_v10  ;;  %2445 = vmatmul.bf16.vlgmr.msra.gmra.mxu2 %v2409_v10 }
 0x508   : > { %2585 = vmatpush.bf16.msra.mxu0 %v4588_v4  ;;  %2611 = vmatpush.bf16.msra.mxu2 %v4603_v22 }
 0x509   : > { %2603 = vmatpush.bf16.msra.mxu1 %v6406_v47  ;;  %2629 = vmatpush.bf16.msra.mxu3 %v6407_v12 }
 0x50c   : > { %2586 = vmatpush.bf16.msra.mxu0 %v4595_v13  ;;  %2612 = vmatpush.bf16.msra.mxu2 %v4615_v35 }
 0x50d   : > { %2604 = vmatpush.bf16.msra.mxu1 %v6408_v14  ;;  %2630 = vmatpush.bf16.msra.mxu3 %v6409_v7 }
 0x510   : > { %2587 = vmatpush.bf16.msra.mxu0 %v4607_v29  ;;  %2613 = vmatpush.bf16.msra.mxu2 %v4621_v43 }
 0x511   : > { %2605 = vmatpush.bf16.msra.mxu1 %v6410_v46  ;;  %2631 = vmatpush.bf16.msra.mxu3 %v6411_v51 }
 0x514   : > { %2588 = vmatpush.bf16.msra.mxu0 %v4619_v42  ;;  %2606 = vmatmul.bf16.vlgmr.msra.gmra.mxu1 %v2409_v10 }
 0x515   : > { %2719 = vmatpush.bf16.msrb.mxu1 %v6412_v2  ;;  %2745 = vmatpush.bf16.msrb.mxu3 %v6413_v34 }
 0x516   : > { %2614 = vmatpush.bf16.msra.mxu2 %v4633_v55  ;;  %2632 = vmatmul.bf16.vlgmr.msra.gmra.mxu3 %v2409_v10 }
 0x517   : > { %2471 = vmatmul.bf16.vlgmr.msrb.gmra.mxu0 %v2409_v10  ;;  %2497 = vmatmul.bf16.vlgmr.msrb.gmra.mxu2 %v2409_v10 }
 0x518   : > { %2589 = vmatpush.bf16.msra.mxu0 %v6356_v48 }
 0x519   : > { %2720 = vmatpush.bf16.msrb.mxu1 %v6414_v8  ;;  %2746 = vmatpush.bf16.msrb.mxu3 %v6415_v3 }
 0x51a   : > { %2615 = vmatpush.bf16.msra.mxu2 %v6357_v52 }
 0x51c   : > { %2590 = vmatpush.bf16.msra.mxu0 %v6360_v63 }
 0x51d   : > { %2721 = vmatpush.bf16.msrb.mxu1 %v6416_v18  ;;  %2747 = vmatpush.bf16.msrb.mxu3 %v6417_v32 }
 0x51e   : > { %2616 = vmatpush.bf16.msra.mxu2 %v6361_v27 }
 0x520   : > { %2591 = vmatpush.bf16.msra.mxu0 %v6668_v38 }
 0x521   : > { %2722 = vmatpush.bf16.msrb.mxu1 %v6666_v19  ;;  %2748 = vmatpush.bf16.msrb.mxu3 %v6667_v57 }
 0x522   : > { %2617 = vmatpush.bf16.msra.mxu2 %v6669_v56 }
 0x524   : > { %2592 = vmatpush.bf16.msra.mxu0 %v6672_v17 }
 0x525   : > { %2723 = vmatpush.bf16.msrb.mxu1 %v6670_v58  ;;  %2749 = vmatpush.bf16.msrb.mxu3 %v6671_v28 }
 0x526   : > { %2618 = vmatpush.bf16.msra.mxu2 %v6673_v11 }
 0x527   : > { %2593 = vmatmul.bf16.vlgmr.msra.gmra.mxu0 %v2409_v10 }
 0x528   : > { %2706 = vmatpush.bf16.msrb.mxu0 %v6674_v39 }
 0x529   : > { %2724 = vmatpush.bf16.msrb.mxu1 %v6676_v49  ;;  %2750 = vmatpush.bf16.msrb.mxu3 %v6677_v6 }
 0x52a   : > { %2732 = vmatpush.bf16.msrb.mxu2 %v6675_v60 }
 0x52b   : > { %2619 = vmatmul.bf16.vlgmr.msra.gmra.mxu2 %v2409_v10  ;;  %v6691_v10 = vld [vmem:[#allocation81_spill] sm:$0xff] }
 0x52c   : > { %2707 = vmatpush.bf16.msrb.mxu0 %v6678_v0 }
 0x52d   : > { %2725 = vmatpush.bf16.msrb.mxu1 %v6680_v30  ;;  %2751 = vmatpush.bf16.msrb.mxu3 %v6681_v16  ;;  %v6692_v16 = vld [vmem:[#allocation90_spill] sm:$0xff] }
 0x52e   : > { %2733 = vmatpush.bf16.msrb.mxu2 %v6679_v25 }
 0x530   : > { %2708 = vmatpush.bf16.msrb.mxu0 %v6682_v37  ;;  %v6693_v37 = vld [vmem:[#allocation91_spill] sm:$0xff] }
 0x531   : > { %2726 = vmatpush.bf16.msrb.mxu1 %v6684_v62  ;;  %2752 = vmatpush.bf16.msrb.mxu3 %v6685_v41  ;;  %v6695_v62 = vld [vmem:[#allocation83_spill] sm:$0xff]  ;;  %v6696_v41 = vld [vmem:[#allocation94_spill] sm:$0xff] }
 0x532   : > { %2734 = vmatpush.bf16.msrb.mxu2 %v6683_v40  ;;  %v6694_v40 = vld [vmem:[#allocation82_spill] sm:$0xff] }
 0x534   : > { %2709 = vmatpush.bf16.msrb.mxu0 %v6688_v15  ;;  %v6699_v15 = vld [vmem:[#allocation85_spill] sm:$0xff] }
 0x535   : > { %2771 = vmatpush.bf16.msra.mxu1 %v6686_v61  ;;  %2797 = vmatpush.bf16.msra.mxu3 %v6687_v1  ;;  %v6697_v61 = vld [vmem:[#allocation95_spill] sm:$0xff]  ;;  %v6698_v1 = vld [vmem:[#allocation84_spill] sm:$0xff] }
 0x536   : > { %2735 = vmatpush.bf16.msrb.mxu2 %v6689_v9  ;;  %v6700_v9 = vld [vmem:[#allocation98_spill] sm:$0xff] }
 0x538   : > { %2710 = vmatpush.bf16.msrb.mxu0 %v6692_v16  ;;  %v6703_v16 = vld [vmem:[#allocation89_spill] sm:$0xff] }
 0x539   : > { %2772 = vmatpush.bf16.msra.mxu1 %v6690_v24  ;;  %2798 = vmatpush.bf16.msra.mxu3 %v6691_v10  ;;  %v6701_v24 = vld [vmem:[#allocation99_spill] sm:$0xff]  ;;  %v6702_v10 = vld [vmem:[#allocation88_spill] sm:$0xff] }
 0x53a   : > { %2736 = vmatpush.bf16.msrb.mxu2 %v6693_v37  ;;  %v6704_v37 = vld [vmem:[#allocation102_spill] sm:$0xff] }
 0x53c   : > { %2711 = vmatpush.bf16.msrb.mxu0 %v6696_v41  ;;  %v6707_v41 = vld [vmem:[#allocation105_spill] sm:$0xff] }
 0x53d   : > { %2773 = vmatpush.bf16.msra.mxu1 %v6694_v40  ;;  %2799 = vmatpush.bf16.msra.mxu3 %v6695_v62  ;;  %v6705_v40 = vld [vmem:[#allocation103_spill] sm:$0xff]  ;;  %v6706_v62 = vld [vmem:[#allocation104_spill] sm:$0xff] }
 0x53e   : > { %2737 = vmatpush.bf16.msrb.mxu2 %v6697_v61  ;;  %v6708_v61 = vld [vmem:[#allocation92_spill] sm:$0xff] }
 0x540   : > { %2712 = vmatpush.bf16.msrb.mxu0 %v6700_v9  ;;  %v6711_v9 = vld [vmem:[#allocation107_spill] sm:$0xff] }
 0x541   : > { %2774 = vmatpush.bf16.msra.mxu1 %v6698_v1  ;;  %2800 = vmatpush.bf16.msra.mxu3 %v6699_v15  ;;  %v6709_v1 = vld [vmem:[#allocation93_spill] sm:$0xff]  ;;  %v6710_v15 = vld [vmem:[#allocation106_spill] sm:$0xff] }
 0x542   : > { %2738 = vmatpush.bf16.msrb.mxu2 %v6701_v24  ;;  %v6712_v24 = vld [vmem:[#allocation96_spill] sm:$0xff] }
 0x544   : > { %2713 = vmatpush.bf16.msrb.mxu0 %v6704_v37  ;;  %v6715_v37 = vld [vmem:[#allocation109_spill] sm:$0xff] }
 0x545   : > { %2775 = vmatpush.bf16.msra.mxu1 %v6702_v10  ;;  %2801 = vmatpush.bf16.msra.mxu3 %v6703_v16  ;;  %v6713_v10 = vld [vmem:[#allocation97_spill] sm:$0xff]  ;;  %v6714_v16 = vld [vmem:[#allocation108_spill] sm:$0xff] }
 0x546   : > { %2739 = vmatpush.bf16.msrb.mxu2 %v6705_v40  ;;  %v6716_v40 = vld [vmem:[#allocation100_spill] sm:$0xff] }
 0x548   : > { %2758 = vmatpush.bf16.msra.mxu0 %v6706_v62  ;;  %v6717_v62 = vld [vmem:[#allocation101_spill] sm:$0xff] }
 0x549   : > { %2776 = vmatpush.bf16.msra.mxu1 %v6708_v61  ;;  %2802 = vmatpush.bf16.msra.mxu3 %v6709_v1  ;;  %v6719_v61 = vld [vmem:[#allocation111_spill] sm:$0xff]  ;;  %v6720_v1 = vld [vmem:[#allocation112_spill] sm:$0xff] }
 0x54a   : > { %2784 = vmatpush.bf16.msra.mxu2 %v6707_v41  ;;  %v6718_v41 = vld [vmem:[#allocation110_spill] sm:$0xff] }
 0x54c   : > { %2759 = vmatpush.bf16.msra.mxu0 %v6710_v15  ;;  %v6721_v15 = vld [vmem:[#allocation113_spill] sm:$0xff] }
 0x54d   : > { %2777 = vmatpush.bf16.msra.mxu1 %v6712_v24  ;;  %2803 = vmatpush.bf16.msra.mxu3 %v6713_v10  ;;  %v6723_v24 = vld [vmem:[#allocation115_spill] sm:$0xff]  ;;  %v6724_v10 = vld [vmem:[#allocation116_spill] sm:$0xff] }
 0x54e   : > { %2785 = vmatpush.bf16.msra.mxu2 %v6711_v9  ;;  %v6722_v9 = vld [vmem:[#allocation114_spill] sm:$0xff] }
 0x550   : > { %2760 = vmatpush.bf16.msra.mxu0 %v6714_v16  ;;  %v6725_v16 = vld [vmem:[#allocation117_spill] sm:$0xff] }
 0x551   : > { %2778 = vmatpush.bf16.msra.mxu1 %v6716_v40  ;;  %2804 = vmatpush.bf16.msra.mxu3 %v6717_v62  ;;  %v6727_v40 = vld [vmem:[#allocation119_spill] sm:$0xff] }
 0x552   : > { %2786 = vmatpush.bf16.msra.mxu2 %v6715_v37  ;;  %v6726_v37 = vld [vmem:[#allocation118_spill] sm:$0xff] }
 0x554   : > { %2761 = vmatpush.bf16.msra.mxu0 %v6718_v41 }
 0x556   : > { %2787 = vmatpush.bf16.msra.mxu2 %v6719_v61 }
 0x558   : > { %2762 = vmatpush.bf16.msra.mxu0 %v6720_v1 }
 0x55a   : > { %2788 = vmatpush.bf16.msra.mxu2 %v6721_v15  ;;  %v6728_v15 = vld [vmem:[#allocation40_spill] sm:$0xff] }
 0x55c   : > { %2763 = vmatpush.bf16.msra.mxu0 %v6722_v9 }
 0x55e   : > { %2789 = vmatpush.bf16.msra.mxu2 %v6723_v24 }
 0x560   : > { %2764 = vmatpush.bf16.msra.mxu0 %v6724_v10 }
 0x562   : > { %2790 = vmatpush.bf16.msra.mxu2 %v6725_v16  ;;  %v6729_v16 = vld [vmem:[#allocation44_spill] sm:$0xff] }
 0x564   : > { %2765 = vmatpush.bf16.msra.mxu0 %v6726_v37 }
 0x566   : > { %2791 = vmatpush.bf16.msra.mxu2 %v6727_v40 }
 0x571   : > { %v2433_v62 = vpop.f32.mrf.mxu1 }
 0x577   : > { %v2459_v41 = vpop.f32.mrf.mxu3 }
 0x579   : > { %v2435_v30 = vpop.f32.mrf.mxu1 }
 0x57a   : > { %v3760_v30 = vld [vmem:[%s4569_s12 + $0xc8] sm:$0xff] }
 0x57f   : > { %v2461_v61 = vpop.f32.mrf.mxu3 }
 0x581   : > { %v2485_v1 = vpop.f32.mrf.mxu1 }
 0x584   : > { %v2420_v25 = vpop.f32.mrf.mxu0 }
 0x585   : > { %v2421_v0 = vadd.f32 %v2420_v25, %v6728_v15 }
 0x587   : > { %v2434_v9 = vadd.f32 %v2433_v62, %v2421_v0  ;;  %v2511_v6 = vpop.f32.mrf.mxu3 }
 0x589   : > { %v3755_v24 = vmul.f32 -1.442695, %v2434_v9  ;;  %v2487_v49 = vpop.f32.mrf.mxu1 }
 0x58a   : > { %v2446_v10 = vpop.f32.mrf.mxu2 }
 0x58b   : > { %4152 = vpow2.f32 %v3755_v24  ;;  %v2447_v60 = vadd.f32 %v2446_v10, %v6729_v16 }
 0x58c   : > { %v2422_v37 = vpop.f32.mrf.mxu0 }
 0x58d   : > { %v2460_v39 = vadd.f32 %v2459_v41, %v2447_v60  ;;  %v3762_v37 = vld [vmem:[%s4569_s12 + $0xd8] sm:$0xff] }
 0x58f   : > { %v3756_v40 = vmul.f32 -1.442695, %v2460_v39  ;;  %v2513_v11 = vpop.f32.mrf.mxu3 }
 0x591   : > { %v4153_v17 = vpop.eup %4152  ;;  %4154 = vpow2.f32 %v3756_v40  ;;  %v2607_v61 = vpop.f32.mrf.mxu1 }
 0x592   : > { %v5789_v28 = vadd.f32 1.0, %v4153_v17  ;;  %v2638_v25 = vadd.f32 %v3760_v30, %v2607_v61  ;;  %v2448_v0 = vpop.f32.mrf.mxu2 }
 0x594   : > { %4156 = vrcp.f32 %v5789_v28  ;;  %v3764_v49 = vmul.f32 -1.442695, %v2638_v25  ;;  %v2472_v62 = vpop.f32.mrf.mxu0  ;;  %vm2524_vm6 = vweird.f32 %v5789_v28 }
 0x595   : > { %v2473_v16 = vadd.f32 %v2472_v62, %v6457_v5 }
 0x596   : > { %4158 = vpow2.f32 %v3764_v49 }
 0x597   : > { %v4155_v9 = vpop.eup %4154  ;;  %v2486_v19 = vadd.f32 %v2485_v1, %v2473_v16 }
 0x598   : > { %v2537_v24 = vadd.f32 1.0, %v4155_v9 }
 0x599   : > { %v2633_v60 = vpop.f32.mrf.mxu3  ;;  %v2609_v41 = vpop.f32.mrf.mxu1 }
 0x59a   : > { %v4157_v39 = vpop.eup %4156  ;;  %4160 = vrcp.f32 %v2537_v24  ;;  %v2498_v11 = vpop.f32.mrf.mxu2  ;;  %v2640_v10 = vadd.f32 %v3762_v37, %v2633_v60  ;;  %v3759_v37 = vld [vmem:[%s4569_s12 + $0xc0] sm:$0xff]  ;;  %vm2543_vm7 = vweird.f32 %v2537_v24 }
 0x59b   : > { %v2520_v40 = vmul.f32 %v4157_v39, %v5789_v28  ;;  %v2499_v17 = vadd.f32 %v2498_v11, %v6456_v33  ;;  %v2549_v11 = vand.u32 2147483648, %v2537_v24  ;;  %vm2525_vm4 = vweird.f32 %v4157_v39 }
 0x59c   : > { %v2474_v30 = vpop.f32.mrf.mxu0  ;;  %v4159_v61 = vpop.eup %4158  ;;  %v3765_v49 = vmul.f32 -1.442695, %v2640_v10  ;;  %vm5802_vm8 = vmor %vm2524_vm6, %vm2525_vm4 }
 0x59d   : > { %v2521_v0 = vsub.f32 1.0, %v2520_v40  ;;  %v2512_v25 = vadd.f32 %v2511_v6, %v2499_v17  ;;  %v5796_v15 = vadd.f32 1.0, %v4159_v61  ;;  %v2547_v6 = vand.u32 2147483647, %v2537_v24 }
 0x59e   : > { %v2550_v61 = vor.u32 1.1754944e-38, %v2549_v11 }
 0x59f   : > { %v3757_v41 = vmul.f32 -1.442695, %v2512_v25  ;;  %v2522_v38 = vmul.f32 %v4157_v39, %v2521_v0  ;;  %vm2548_vm10 = vcmp.eq.f32.partialorder %v2547_v6, 8.507059e+37  ;;  %vm2669_vm1 = vweird.f32 %v5796_v15 }
 0x5a0   : > { %v4161_v9 = vpop.eup %4160 }
 0x5a1   : > { %v2635_v58 = vpop.f32.mrf.mxu3  ;;  %v2539_v56 = vmul.f32 %v4161_v9, %v2537_v24  ;;  %4162 = vpow2.f32 %v3757_v41  ;;  %vm2544_vm5 = vweird.f32 %v4161_v9  ;;  %v2523_v10 = vadd.f32 %v4157_v39, %v2522_v38 }
 0x5a2   : > { %v2500_v57 = vpop.f32.mrf.mxu2  ;;  %4164 = vpow2.f32 %v3765_v49  ;;  %v2530_v58 = vand.u32 2147483648, %v5789_v28  ;;  %vm2545_vm9 = vmor %vm2543_vm7, %vm2544_vm5 }
 0x5a3   : > { %v2540_v60 = vsub.f32 1.0, %v2539_v56  ;;  %4166 = vrcp.f32 %v5796_v15  ;;  %v2528_v56 = vand.u32 2147483647, %v5789_v28  ;;  %v2527_v38 = vsel %vm5802_vm8, %v4157_v39, %v2523_v10 }
 0x5a4   : > { %v2594_v62 = vpop.f32.mrf.mxu0  ;;  %4168 = vtanh.f32 %v2486_v19  ;;  %v2531_v41 = vor.u32 1.1754944e-38, %v2530_v58 }
 0x5a5   : > { %v2541_v40 = vmul.f32 %v4161_v9, %v2540_v60  ;;  %v2637_v17 = vadd.f32 %v3759_v37, %v2594_v62  ;;  %vm2529_vm11 = vcmp.eq.f32.partialorder %v2528_v56, 8.507059e+37 }
 0x5a6   : > { %v2532_v60 = vsel %vm2529_vm11, %v2531_v41, %v2527_v38 }
 0x5a7   : > { %v2542_v16 = vadd.f32 %v4161_v9, %v2541_v40  ;;  %v3763_v1 = vmul.f32 -1.442695, %v2637_v17  ;;  %v4163_v30 = vpop.eup %4162 }
 0x5a8   : > { %v4165_v0 = vpop.eup %4164  ;;  %v2557_v49 = vadd.f32 1.0, %v4163_v30 }
 0x5a9   : > { %v2546_v25 = vsel %vm2545_vm9, %v4161_v9, %v2542_v16  ;;  %v5809_v24 = vpop.eup %4166  ;;  %4170 = vpow2.f32 %v3763_v1  ;;  %v5814_v39 = vadd.f32 1.0, %v4165_v0  ;;  %v3761_v0 = vld [vmem:[%s4569_s12 + $0xd0] sm:$0xff] }
 0x5aa   : > { %v2551_v37 = vsel %vm2548_vm10, %v2550_v61, %v2546_v25  ;;  %4172 = vrcp.f32 %v2557_v49  ;;  %v2665_v19 = vmul.f32 %v5809_v24, %v5796_v15  ;;  %v4169_v40 = vpop.eup %4168  ;;  %v2567_v38 = vand.u32 2147483647, %v2557_v49 }
 0x5ab   : > { %v2573_v11 = vmul.f32 %v2551_v37, %v5656_v59  ;;  %v2574_v9 = vmul.f32 %v4169_v40, %v2532_v60  ;;  %4174 = vrcp.f32 %v5814_v39  ;;  %v2569_v59 = vand.u32 2147483648, %v2557_v49 }
 0x5ac   : > { %v2596_v62 = vpop.f32.mrf.mxu0  ;;  %v2666_v17 = vsub.f32 1.0, %v2665_v19  ;;  %vm2563_vm13 = vweird.f32 %v2557_v49  ;;  %vm2670_vm14 = vweird.f32 %v5809_v24  ;;  %vm2568_vm0 = vcmp.eq.f32.partialorder %v2567_v38, 8.507059e+37 }
 0x5ad   : > { %v5816_v58 = vadd.f32 %v2574_v9, %v2573_v11  ;;  %v2570_v60 = vor.u32 1.1754944e-38, %v2569_v59  ;;  %vm5830_vm2 = vmor %vm2669_vm1, %vm2670_vm14  ;;  %vm2689_vm9 = vweird.f32 %v5814_v39 }
 0x5ae   : > { %v2620_v28 = vpop.f32.mrf.mxu2  ;;  %v2667_v30 = vmul.f32 %v5809_v24, %v2666_v17 }
 0x5af   : > { %v4171_v6 = vpop.eup %4170  ;;  %v2639_v62 = vadd.f32 %v3761_v0, %v2620_v28 }
 0x5b0   : > { %v4173_v10 = vpop.eup %4172  ;;  %v2644_v57 = vadd.f32 1.0, %v4171_v6  ;;  %v2668_v19 = vadd.f32 %v5809_v24, %v2667_v30  ;;  %v2675_v6 = vand.u32 2147483648, %v5796_v15 }
 0x5b1   : > { %v2559_v56 = vmul.f32 %v4173_v10, %v2557_v49  ;;  %vm2564_vm12 = vweird.f32 %v4173_v10  ;;  %v5822_v25 = vpop.eup %4174 }
 0x5b2   : > { %4176 = vrcp.f32 %v2644_v57  ;;  %vm2565_vm15 = vmor %vm2563_vm13, %vm2564_vm12  ;;  %v2685_v49 = vmul.f32 %v5822_v25, %v5814_v39  ;;  %v2672_v30 = vsel %vm5830_vm2, %v5809_v24, %v2668_v19  ;;  %v2676_v38 = vor.u32 1.1754944e-38, %v2675_v6 }
 0x5b3   : > { %v2560_v1 = vsub.f32 1.0, %v2559_v56  ;;  %4178 = vtanh.f32 %v5816_v58  ;;  %vm2650_vm4 = vweird.f32 %v2644_v57  ;;  %vm2690_vm8 = vweird.f32 %v5822_v25 }
 0x5b4   : > { %4180 = vtanh.f32 %v2639_v62  ;;  %vm2691_vm10 = vmor %vm2689_vm9, %vm2690_vm8 }
 0x5b5   : > { %v2561_v61 = vmul.f32 %v4173_v10, %v2560_v1 }
 0x5b6   : > { %v2622_v16 = vpop.f32.mrf.mxu2 }
 0x5b7   : > { %v2562_v41 = vadd.f32 %v4173_v10, %v2561_v61  ;;  %v2673_v16 = vand.u32 2147483647, %v5796_v15  ;;  %v2654_v61 = vand.u32 2147483647, %v2644_v57 }
 0x5b8   : > { %v4177_v37 = vpop.eup %4176 }
 0x5b9   : > { %v2646_v11 = vmul.f32 %v4177_v37, %v2644_v57  ;;  %v2566_v40 = vsel %vm2565_vm15, %v4173_v10, %v2562_v41  ;;  %v4179_v9 = vpop.eup %4178  ;;  %v2656_v10 = vand.u32 2147483648, %v2644_v57  ;;  %vm2651_vm3 = vweird.f32 %v4177_v37 }
 0x5ba   : > { %v2571_v17 = vsel %vm2568_vm0, %v2570_v60, %v2566_v40  ;;  %v2686_v41 = vsub.f32 1.0, %v2685_v49  ;;  %vm2674_vm5 = vcmp.eq.f32.partialorder %v2673_v16, 8.507059e+37  ;;  %vm2652_vm6 = vmor %vm2650_vm4, %vm2651_vm3  ;;  %vm2655_vm7 = vcmp.eq.f32.partialorder %v2654_v61, 8.507059e+37  ;;  %v4181_v62 = vpop.eup %4180  ;;  %v6767_v16 = vld [vmem:[#allocation85_spill] sm:$0xff]  ;;  %v6772_v61 = vld [vmem:[#allocation102_spill] sm:$0xff] }
 0x5bb   : > { %v2647_v28 = vsub.f32 1.0, %v2646_v11  ;;  %v2577_v1 = vmul.f32 %v4179_v9, %v2571_v17  ;;  %v2657_v15 = vor.u32 1.1754944e-38, %v2656_v10  ;;  %v2677_v11 = vsel %vm2674_vm5, %v2676_v38, %v2672_v30  ;;  %v6769_v10 = vld [vmem:[#allocation99_spill] sm:$0xff]  ;;  %v6770_v30 = vld [vmem:[#allocation88_spill] sm:$0xff] }
 0x5bc   : > { %v2687_v19 = vmul.f32 %v5822_v25, %v2686_v41  ;;  %v2699_v9 = vmul.f32 %v2677_v11, %v5685_v31  ;;  %v6774_v38 = vld [vmem:[#allocation104_spill] sm:$0xff]  ;;  %v6775_v41 = vld [vmem:[#allocation105_spill] sm:$0xff]  ;;  %v6778_v11 = vld [vmem:[#allocation106_spill] sm:$0xff] }
 0x5bd   : > { %v2648_v59 = vmul.f32 %v4177_v37, %v2647_v28  ;;  %3758 = vst [vmem:[%s4576_s21 + $0x28] sm:$0xff] %v2577_v1  ;;  %v2705_v0 = vpack.c.bf16 %v2577_v1, %v2577_v1  ;;  %v6766_v28 = vld [vmem:[#allocation84_spill] sm:$0xff]  ;;  %v6768_v1 = vld [vmem:[#allocation98_spill] sm:$0xff] }
 0x5be   : > { %v2688_v49 = vadd.f32 %v5822_v25, %v2687_v19  ;;  %v6781_v19 = vld [vmem:[#allocation97_spill] sm:$0xff] }
 0x5bf   : > { %v2649_v60 = vadd.f32 %v4177_v37, %v2648_v59  ;;  %2727 = vmatmul.bf16.vlgmr.msrb.gmra.mxu1 %v2705_v0  ;;  %2753 = vmatmul.bf16.vlgmr.msrb.gmra.mxu3 %v2705_v0  ;;  %v6771_v59 = vld [vmem:[#allocation89_spill] sm:$0xff] }
 0x5c0   : > { %2893 = vmatpush.bf16.msrb.mxu1 %v6396_v23  ;;  %2919 = vmatpush.bf16.msrb.mxu3 %v6397_v20  ;;  %v2695_v23 = vand.u32 2147483648, %v5814_v39  ;;  %v2693_v20 = vand.u32 2147483647, %v5814_v39  ;;  %v6764_v39 = vld [vmem:[#allocation94_spill] sm:$0xff] }
 0x5c1   : > { %v2653_v24 = vsel %vm2652_vm6, %v4177_v37, %v2649_v60  ;;  %v6776_v60 = vld [vmem:[#allocation92_spill] sm:$0xff] }
 0x5c2   : > { %v2658_v40 = vsel %vm2655_vm7, %v2657_v15, %v2653_v24  ;;  %vm2694_vm11 = vcmp.eq.f32.partialorder %v2693_v20, 8.507059e+37  ;;  %v6777_v15 = vld [vmem:[#allocation93_spill] sm:$0xff]  ;;  %v6779_v24 = vld [vmem:[#allocation107_spill] sm:$0xff] }
 0x5c3   : > { %v2700_v6 = vmul.f32 %v4181_v62, %v2658_v40  ;;  %v6780_v62 = vld [vmem:[#allocation96_spill] sm:$0xff]  ;;  %v6787_v20 = vld [vmem:[#allocation111_spill] sm:$0xff] }
 0x5c4   : > { %2894 = vmatpush.bf16.msrb.mxu1 %v6398_v54  ;;  %2920 = vmatpush.bf16.msrb.mxu3 %v6399_v50  ;;  %v2692_v54 = vsel %vm2691_vm10, %v5822_v25, %v2688_v49  ;;  %v2696_v50 = vor.u32 1.1754944e-38, %v2695_v23  ;;  %v6765_v25 = vld [vmem:[#allocation95_spill] sm:$0xff]  ;;  %v6782_v40 = vld [vmem:[#allocation108_spill] sm:$0xff]  ;;  %v6785_v49 = vld [vmem:[#allocation101_spill] sm:$0xff] }
 0x5c5   : > { %v5845_v57 = vadd.f32 %v2700_v6, %v2699_v9  ;;  %v6783_v9 = vld [vmem:[#allocation109_spill] sm:$0xff]  ;;  %v6784_v6 = vld [vmem:[#allocation100_spill] sm:$0xff]  ;;  %v6786_v23 = vld [vmem:[#allocation110_spill] sm:$0xff] }
 0x5c6   : > { %v2697_v37 = vsel %vm2694_vm11, %v2696_v50, %v2692_v54  ;;  %v6788_v54 = vld [vmem:[#allocation112_spill] sm:$0xff]  ;;  %v6789_v50 = vld [vmem:[#allocation113_spill] sm:$0xff] }
 0x5c7   : > { %4182 = vtanh.f32 %v5845_v57 }
 0x5c8   : > { %2895 = vmatpush.bf16.msrb.mxu1 %v6400_v53  ;;  %2921 = vmatpush.bf16.msrb.mxu3 %v6401_v36  ;;  %v6746_v53 = vld [vmem:[#allocation64_spill] sm:$0xff]  ;;  %v6747_v36 = vld [vmem:[#allocation65_spill] sm:$0xff] }
 0x5cc   : > { %2896 = vmatpush.bf16.msrb.mxu1 %v6402_v21  ;;  %2922 = vmatpush.bf16.msrb.mxu3 %v6403_v44  ;;  %v6748_v21 = vld [vmem:[#allocation74_spill] sm:$0xff]  ;;  %v6749_v44 = vld [vmem:[#allocation75_spill] sm:$0xff] }
 0x5cd   : > { %v4183_v31 = vpop.eup %4182 }
 0x5ce   : > { %v2703_v17 = vmul.f32 %v4183_v31, %v2697_v37  ;;  %v6790_v31 = vld [vmem:[#allocation114_spill] sm:$0xff]  ;;  %v6791_v37 = vld [vmem:[#allocation115_spill] sm:$0xff] }
 0x5cf   : > { %2779 = vmatmul.bf16.vlgmr.msra.gmra.mxu1 %v2705_v0  ;;  %2805 = vmatmul.bf16.vlgmr.msra.gmra.mxu3 %v2705_v0  ;;  %v6773_v0 = vld [vmem:[#allocation103_spill] sm:$0xff] }
 0x5d0   : > { %v2704_v56 = vpack.c.bf16 %v2703_v17, %v2703_v17  ;;  %2897 = vmatpush.bf16.msrb.mxu1 %v6404_v26  ;;  %2923 = vmatpush.bf16.msrb.mxu3 %v6405_v45  ;;  %v6750_v26 = vld [vmem:[#allocation68_spill] sm:$0xff]  ;;  %v6751_v45 = vld [vmem:[#allocation69_spill] sm:$0xff] }
 0x5d1   : > { %v6792_v17 = vld [vmem:[#allocation116_spill] sm:$0xff] }
 0x5d2   : > { %2714 = vmatmul.bf16.vlgmr.msrb.gmra.mxu0 %v2704_v56  ;;  %2740 = vmatmul.bf16.vlgmr.msrb.gmra.mxu2 %v2704_v56 }
 0x5d3   : > { %2880 = vmatpush.bf16.msrb.mxu0 %v4588_v4  ;;  %2906 = vmatpush.bf16.msrb.mxu2 %v4603_v22  ;;  %v6734_v4 = vld [vmem:[#allocation66_spill] sm:$0xff]  ;;  %v6736_v22 = vld [vmem:[#allocation47_spill] sm:$0xff] }
 0x5d4   : > { %2898 = vmatpush.bf16.msrb.mxu1 %v6406_v47  ;;  %2924 = vmatpush.bf16.msrb.mxu3 %v6407_v12  ;;  %v6752_v47 = vld [vmem:[#allocation76_spill] sm:$0xff]  ;;  %v6753_v12 = vld [vmem:[#allocation77_spill] sm:$0xff] }
 0x5d7   : > { %2881 = vmatpush.bf16.msrb.mxu0 %v4595_v13  ;;  %2907 = vmatpush.bf16.msrb.mxu2 %v4615_v35  ;;  %v6735_v13 = vld [vmem:[#allocation67_spill] sm:$0xff]  ;;  %v6738_v35 = vld [vmem:[#allocation70_spill] sm:$0xff] }
 0x5d8   : > { %2899 = vmatpush.bf16.msrb.mxu1 %v6408_v14  ;;  %2925 = vmatpush.bf16.msrb.mxu3 %v6409_v7  ;;  %v6754_v14 = vld [vmem:[#allocation78_spill] sm:$0xff]  ;;  %v6755_v7 = vld [vmem:[#allocation79_spill] sm:$0xff] }
 0x5db   : > { %2882 = vmatpush.bf16.msrb.mxu0 %v4607_v29  ;;  %2908 = vmatpush.bf16.msrb.mxu2 %v4621_v43  ;;  %v6737_v29 = vld [vmem:[#allocation52_spill] sm:$0xff]  ;;  %v6740_v43 = vld [vmem:[#allocation51_spill] sm:$0xff] }
 0x5dc   : > { %2900 = vmatpush.bf16.msrb.mxu1 %v6410_v46  ;;  %2926 = vmatpush.bf16.msrb.mxu3 %v6411_v51  ;;  %v6756_v46 = vld [vmem:[#allocation86_spill] sm:$0xff]  ;;  %v6757_v51 = vld [vmem:[#allocation87_spill] sm:$0xff] }
 0x5df   : > { %2883 = vmatpush.bf16.msrb.mxu0 %v4619_v42  ;;  %2901 = vmatmul.bf16.vlgmr.msrb.gmra.mxu1 %v2704_v56  ;;  %v6739_v42 = vld [vmem:[#allocation71_spill] sm:$0xff] }
 0x5e0   : > { %3014 = vmatpush.bf16.msra.mxu1 %v6412_v2  ;;  %3040 = vmatpush.bf16.msra.mxu3 %v6413_v34  ;;  %v6758_v2 = vld [vmem:[#allocation80_spill] sm:$0xff]  ;;  %v6759_v34 = vld [vmem:[#allocation81_spill] sm:$0xff] }
 0x5e1   : > { %2909 = vmatpush.bf16.msrb.mxu2 %v4633_v55  ;;  %2927 = vmatmul.bf16.vlgmr.msrb.gmra.mxu3 %v2704_v56  ;;  %v6741_v55 = vld [vmem:[#allocation57_spill] sm:$0xff] }
 0x5e2   : > { %2766 = vmatmul.bf16.vlgmr.msra.gmra.mxu0 %v2704_v56  ;;  %2792 = vmatmul.bf16.vlgmr.msra.gmra.mxu2 %v2704_v56 }
 0x5e3   : > { %2884 = vmatpush.bf16.msrb.mxu0 %v6356_v48  ;;  %v6742_v48 = vld [vmem:[#allocation60_spill] sm:$0xff] }
 0x5e4   : > { %3015 = vmatpush.bf16.msra.mxu1 %v6414_v8  ;;  %3041 = vmatpush.bf16.msra.mxu3 %v6415_v3  ;;  %v6760_v8 = vld [vmem:[#allocation90_spill] sm:$0xff]  ;;  %v6761_v3 = vld [vmem:[#allocation91_spill] sm:$0xff] }
 0x5e5   : > { %2910 = vmatpush.bf16.msrb.mxu2 %v6357_v52  ;;  %v6743_v52 = vld [vmem:[#allocation61_spill] sm:$0xff] }
 0x5e7   : > { %2885 = vmatpush.bf16.msrb.mxu0 %v6360_v63  ;;  %v6744_v63 = vld [vmem:[#allocation72_spill] sm:$0xff] }
 0x5e8   : > { %3016 = vmatpush.bf16.msra.mxu1 %v6416_v18  ;;  %3042 = vmatpush.bf16.msra.mxu3 %v6417_v32  ;;  %v6762_v18 = vld [vmem:[#allocation82_spill] sm:$0xff]  ;;  %v6763_v32 = vld [vmem:[#allocation83_spill] sm:$0xff] }
 0x5e9   : > { %2911 = vmatpush.bf16.msrb.mxu2 %v6361_v27  ;;  %v6745_v27 = vld [vmem:[#allocation73_spill] sm:$0xff] }
 0x5eb   : > { %2886 = vmatpush.bf16.msrb.mxu0 %v6736_v22 }
 0x5ec   : > { %3017 = vmatpush.bf16.msra.mxu1 %v6734_v4  ;;  %3043 = vmatpush.bf16.msra.mxu3 %v6735_v13  ;;  %v6794_v4 = vld [vmem:[#allocation118_spill] sm:$0xff]  ;;  %v6795_v13 = vld [vmem:[#allocation119_spill] sm:$0xff] }
 0x5ed   : > { %2912 = vmatpush.bf16.msrb.mxu2 %v6737_v29 }
 0x5ef   : > { %2887 = vmatpush.bf16.msrb.mxu0 %v6740_v43 }
 0x5f0   : > { %3018 = vmatpush.bf16.msra.mxu1 %v6738_v35  ;;  %3044 = vmatpush.bf16.msra.mxu3 %v6739_v42 }
 0x5f1   : > { %2913 = vmatpush.bf16.msrb.mxu2 %v6741_v55 }
 0x5f2   : > { %2888 = vmatmul.bf16.vlgmr.msrb.gmra.mxu0 %v2704_v56 }
 0x5f3   : > { %3001 = vmatpush.bf16.msra.mxu0 %v6742_v48  ;;  %v6796_v48 = vld [vmem:[#allocation40_spill] sm:$0xff] }
 0x5f4   : > { %3019 = vmatpush.bf16.msra.mxu1 %v6744_v63  ;;  %3045 = vmatpush.bf16.msra.mxu3 %v6745_v27 }
 0x5f5   : > { %3027 = vmatpush.bf16.msra.mxu2 %v6743_v52 }
 0x5f6   : > { %2914 = vmatmul.bf16.vlgmr.msrb.gmra.mxu2 %v2704_v56  ;;  %v6793_v56 = vld [vmem:[#allocation117_spill] sm:$0xff] }
 0x5f7   : > { %3002 = vmatpush.bf16.msra.mxu0 %v6746_v53 }
 0x5f8   : > { %3020 = vmatpush.bf16.msra.mxu1 %v6748_v21  ;;  %3046 = vmatpush.bf16.msra.mxu3 %v6749_v44  ;;  %v6797_v44 = vld [vmem:[#allocation44_spill] sm:$0xff] }
 0x5f9   : > { %3028 = vmatpush.bf16.msra.mxu2 %v6747_v36 }
 0x5fb   : > { %3003 = vmatpush.bf16.msra.mxu0 %v6750_v26 }
 0x5fc   : > { %3021 = vmatpush.bf16.msra.mxu1 %v6752_v47  ;;  %3047 = vmatpush.bf16.msra.mxu3 %v6753_v12 }
 0x5fd   : > { %3029 = vmatpush.bf16.msra.mxu2 %v6751_v45 }
 0x5ff   : > { %3004 = vmatpush.bf16.msra.mxu0 %v6756_v46 }
 0x600   : > { %3066 = vmatpush.bf16.msrb.mxu1 %v6754_v14  ;;  %3092 = vmatpush.bf16.msrb.mxu3 %v6755_v7  ;;  %v3771_v7 = vld [vmem:[%s4569_s12 + $0xe8] sm:$0xff] }
 0x601   : > { %3030 = vmatpush.bf16.msra.mxu2 %v6757_v51 }
 0x603   : > { %3005 = vmatpush.bf16.msra.mxu0 %v6760_v8 }
 0x604   : > { %3067 = vmatpush.bf16.msrb.mxu1 %v6758_v2  ;;  %3093 = vmatpush.bf16.msrb.mxu3 %v6759_v34 }
 0x605   : > { %3031 = vmatpush.bf16.msra.mxu2 %v6761_v3 }
 0x607   : > { %3006 = vmatpush.bf16.msra.mxu0 %v6764_v39 }
 0x608   : > { %3068 = vmatpush.bf16.msrb.mxu1 %v6762_v18  ;;  %3094 = vmatpush.bf16.msrb.mxu3 %v6763_v32 }
 0x609   : > { %3032 = vmatpush.bf16.msra.mxu2 %v6765_v25  ;;  %v3773_v25 = vld [vmem:[%s4569_s12 + $0xf8] sm:$0xff] }
 0x60b   : > { %3007 = vmatpush.bf16.msra.mxu0 %v6768_v1 }
 0x60c   : > { %3069 = vmatpush.bf16.msrb.mxu1 %v6766_v28  ;;  %3095 = vmatpush.bf16.msrb.mxu3 %v6767_v16 }
 0x60d   : > { %3033 = vmatpush.bf16.msra.mxu2 %v6769_v10 }
 0x60f   : > { %3008 = vmatpush.bf16.msra.mxu0 %v6772_v61 }
 0x610   : > { %3070 = vmatpush.bf16.msrb.mxu1 %v6770_v30  ;;  %3096 = vmatpush.bf16.msrb.mxu3 %v6771_v59 }
 0x611   : > { %3034 = vmatpush.bf16.msra.mxu2 %v6773_v0 }
 0x613   : > { %3053 = vmatpush.bf16.msrb.mxu0 %v6774_v38 }
 0x614   : > { %3071 = vmatpush.bf16.msrb.mxu1 %v6776_v60  ;;  %3097 = vmatpush.bf16.msrb.mxu3 %v6777_v15 }
 0x615   : > { %3079 = vmatpush.bf16.msrb.mxu2 %v6775_v41 }
 0x617   : > { %3054 = vmatpush.bf16.msrb.mxu0 %v6778_v11 }
 0x618   : > { %3072 = vmatpush.bf16.msrb.mxu1 %v6780_v62  ;;  %3098 = vmatpush.bf16.msrb.mxu3 %v6781_v19 }
 0x619   : > { %3080 = vmatpush.bf16.msrb.mxu2 %v6779_v24 }
 0x61b   : > { %3055 = vmatpush.bf16.msrb.mxu0 %v6782_v40 }
 0x61c   : > { %3073 = vmatpush.bf16.msrb.mxu1 %v6784_v6  ;;  %3099 = vmatpush.bf16.msrb.mxu3 %v6785_v49 }
 0x61d   : > { %3081 = vmatpush.bf16.msrb.mxu2 %v6783_v9 }
 0x61f   : > { %3056 = vmatpush.bf16.msrb.mxu0 %v6786_v23  ;;  %v3770_v23 = vld [vmem:[%s4569_s12 + $0xe0] sm:$0xff] }
 0x621   : > { %3082 = vmatpush.bf16.msrb.mxu2 %v6787_v20 }
 0x623   : > { %3057 = vmatpush.bf16.msrb.mxu0 %v6788_v54 }
 0x625   : > { %3083 = vmatpush.bf16.msrb.mxu2 %v6789_v50 }
 0x627   : > { %3058 = vmatpush.bf16.msrb.mxu0 %v6790_v31 }
 0x629   : > { %3084 = vmatpush.bf16.msrb.mxu2 %v6791_v37 }
 0x62b   : > { %3059 = vmatpush.bf16.msrb.mxu0 %v6792_v17 }
 0x62d   : > { %3085 = vmatpush.bf16.msrb.mxu2 %v6793_v56 }
 0x62f   : > { %3060 = vmatpush.bf16.msrb.mxu0 %v6794_v4 }
 0x631   : > { %3086 = vmatpush.bf16.msrb.mxu2 %v6795_v13 }
 0x63c   : > { %v2728_v22 = vpop.f32.mrf.mxu1 }
 0x642   : > { %v2754_v29 = vpop.f32.mrf.mxu3 }
 0x644   : > { %v2730_v35 = vpop.f32.mrf.mxu1 }
 0x64a   : > { %v2756_v42 = vpop.f32.mrf.mxu3 }
 0x64c   : > { %v2780_v43 = vpop.f32.mrf.mxu1 }
 0x64f   : > { %v2715_v55 = vpop.f32.mrf.mxu0 }
 0x650   : > { %v2716_v52 = vadd.f32 %v2715_v55, %v6796_v48 }
 0x652   : > { %v2729_v63 = vadd.f32 %v2728_v22, %v2716_v52  ;;  %v2806_v27 = vpop.f32.mrf.mxu3 }
 0x654   : > { %v3766_v53 = vmul.f32 -1.442695, %v2729_v63  ;;  %v2782_v36 = vpop.f32.mrf.mxu1 }
 0x655   : > { %v2741_v21 = vpop.f32.mrf.mxu2 }
 0x656   : > { %4184 = vpow2.f32 %v3766_v53  ;;  %v2742_v26 = vadd.f32 %v2741_v21, %v6797_v44 }
 0x657   : > { %v2717_v45 = vpop.f32.mrf.mxu0 }
 0x658   : > { %v2755_v47 = vadd.f32 %v2754_v29, %v2742_v26 }
 0x65a   : > { %v3767_v12 = vmul.f32 -1.442695, %v2755_v47  ;;  %v2808_v14 = vpop.f32.mrf.mxu3 }
 0x65c   : > { %v4185_v46 = vpop.eup %4184  ;;  %4186 = vpow2.f32 %v3767_v12  ;;  %v2902_v51 = vpop.f32.mrf.mxu1 }
 0x65d   : > { %v5949_v2 = vadd.f32 1.0, %v4185_v46  ;;  %v2933_v34 = vadd.f32 %v3771_v7, %v2902_v51  ;;  %v2743_v8 = vpop.f32.mrf.mxu2 }
 0x65f   : > { %4188 = vrcp.f32 %v5949_v2  ;;  %v3775_v3 = vmul.f32 -1.442695, %v2933_v34  ;;  %v2767_v18 = vpop.f32.mrf.mxu0  ;;  %vm2819_vm14 = vweird.f32 %v5949_v2  ;;  %v2825_v13 = vand.u32 2147483648, %v5949_v2 }
 0x660   : > { %v2768_v15 = vadd.f32 %v2767_v18, %v6457_v5  ;;  %v2823_v29 = vand.u32 2147483647, %v5949_v2 }
 0x661   : > { %4190 = vpow2.f32 %v3775_v3  ;;  %v2826_v21 = vor.u32 1.1754944e-38, %v2825_v13 }
 0x662   : > { %v4187_v32 = vpop.eup %4186  ;;  %v2781_v54 = vadd.f32 %v2780_v43, %v2768_v15  ;;  %vm2824_vm3 = vcmp.eq.f32.partialorder %v2823_v29, 8.507059e+37 }
 0x663   : > { %v2832_v39 = vadd.f32 1.0, %v4187_v32 }
 0x664   : > { %v2928_v28 = vpop.f32.mrf.mxu3  ;;  %v2904_v16 = vpop.f32.mrf.mxu1 }
 0x665   : > { %v4189_v1 = vpop.eup %4188  ;;  %4192 = vrcp.f32 %v2832_v39  ;;  %v2793_v10 = vpop.f32.mrf.mxu2  ;;  %v2935_v59 = vadd.f32 %v3773_v25, %v2928_v28  ;;  %v2844_v50 = vand.u32 2147483648, %v2832_v39  ;;  %v2842_v31 = vand.u32 2147483647, %v2832_v39 }
 0x666   : > { %v2815_v30 = vmul.f32 %v4189_v1, %v5949_v2  ;;  %v2794_v61 = vadd.f32 %v2793_v10, %v6456_v33  ;;  %vm2820_vm12 = vweird.f32 %v4189_v1  ;;  %vm2838_vm15 = vweird.f32 %v2832_v39  ;;  %v3772_v10 = vld [vmem:[%s4569_s12 + $0xf0] sm:$0xff]  ;;  %s3887_s12 = sshll.u32 %s4422_s18, 4 }
 0x667   : > { %v2769_v0 = vpop.f32.mrf.mxu0  ;;  %v4191_v38 = vpop.eup %4190  ;;  %v3776_v11 = vmul.f32 -1.442695, %v2935_v59  ;;  %vm5962_vm0 = vmor %vm2819_vm14, %vm2820_vm12  ;;  %v2845_v55 = vor.u32 1.1754944e-38, %v2844_v50  ;;  %vm2843_vm2 = vcmp.eq.f32.partialorder %v2842_v31, 8.507059e+37  ;;  %s3186_s25 = sadd.s32 %s4426_s19, %s3887_s12  ;;  %s3175_s19 = scalar_lea.sflag [#allocation12], %s4565_s26 }
 0x668   : > { %v2816_v41 = vsub.f32 1.0, %v2815_v30  ;;  %v2807_v60 = vadd.f32 %v2806_v27, %v2794_v61  ;;  %v5956_v62 = vadd.f32 1.0, %v4191_v38  ;;  %s3784_s9 = sshll.u32 %s3186_s25, 3 }
 0x669   : > { %s3188_s14 = scalar_lea.hbm %s6055_s4, %s3784_s9 }
 0x66a   : > { %v3768_v19 = vmul.f32 -1.442695, %v2807_v60  ;;  %v2817_v6 = vmul.f32 %v4189_v1, %v2816_v41  ;;  %vm2964_vm9 = vweird.f32 %v5956_v62  ;;  %s3191_s18 = sshll.u32 %s3188_s14, 4  ;;  %s3192_s18 = int_to_ptr.hbm [resolvable:$true] %s3191_s18 }
 0x66b   : > { %v4193_v24 = vpop.eup %4192  ;;  %s4348_s24 = sshra.s32 %s3192_s18, 4  ;;  %s4349_s24 = int_to_ptr.hbm [resolvable:$true] %s4348_s24 }
 0x66c   : > { %v2930_v40 = vpop.f32.mrf.mxu3  ;;  %v2834_v9 = vmul.f32 %v4193_v24, %v2832_v39  ;;  %4194 = vpow2.f32 %v3768_v19  ;;  %vm2839_vm13 = vweird.f32 %v4193_v24  ;;  %v2818_v56 = vadd.f32 %v4189_v1, %v2817_v6  ;;  %s4350_s30 = scalar_lea.hbm %s4349_s24, 64  ;;  %p4355_p8 = scmp.lt.s32.totalorder %s4349_s24, %s6055_s4 }
 0x66d   : > { %v2795_v49 = vpop.f32.mrf.mxu2  ;;  %4196 = vpow2.f32 %v3776_v11  ;;  %vm2840_vm1 = vmor %vm2838_vm15, %vm2839_vm13  ;;  %v2970_v19 = vand.u32 2147483648, %v5956_v62  ;;  %p4351_p5 = scmp.ne.s32.totalorder %s4349_s24, %s4350_s30  ;;  %p4356_p10 = scmp.lt.s32.totalorder %s4354_s7, %s4350_s30 }
 0x66e   : > { %v2835_v20 = vsub.f32 1.0, %v2834_v9  ;;  %4198 = vrcp.f32 %v5956_v62  ;;  %v2822_v63 = vsel %vm5962_vm0, %v4189_v1, %v2818_v56 }
 0x66f   : > { %v2889_v37 = vpop.f32.mrf.mxu0  ;;  %4200 = vtanh.f32 %v2781_v54  ;;  %v2827_v47 = vsel %vm2824_vm3, %v2826_v21, %v2822_v63  ;;  %v2971_v56 = vor.u32 1.1754944e-38, %v2970_v19  ;;  %p4352_p6 = pnand %p4351_p5, %p4540_p9  ;;  %p4357_p11 = por %p4356_p10, %p4355_p8 }
 0x670   : > { %v2836_v17 = vmul.f32 %v4193_v24, %v2835_v20  ;;  %v2932_v4 = vadd.f32 %v3770_v23, %v2889_v37  ;;  %v2968_v23 = vand.u32 2147483647, %v5956_v62 }
 0x671   : > { %p4353_p7 = pneg %p4352_p6 }
 0x672   : > { %v2837_v35 = vadd.f32 %v4193_v24, %v2836_v17  ;;  %v3774_v42 = vmul.f32 -1.442695, %v2932_v4  ;;  %v4195_v43 = vpop.eup %4194  ;;  %vm2969_vm13 = vcmp.eq.f32.partialorder %v2968_v23, 8.507059e+37 }
 0x673   : > { %v4197_v52 = vpop.eup %4196  ;;  %v2852_v53 = vadd.f32 1.0, %v4195_v43  ;;  %p4358_p13 = pnand %p4357_p11, %p4353_p7 }
 0x674   : > { %v2841_v27 = vsel %vm2840_vm1, %v4193_v24, %v2837_v35  ;;  %v5969_v36 = vpop.eup %4198  ;;  %4202 = vpow2.f32 %v3774_v42  ;;  %v5974_v51 = vadd.f32 1.0, %v4197_v52 }
 0x675   : > { %v2846_v26 = vsel %vm2843_vm2, %v2845_v55, %v2841_v27  ;;  %4204 = vrcp.f32 %v2852_v53  ;;  %v2960_v14 = vmul.f32 %v5969_v36, %v5956_v62  ;;  %v4201_v46 = vpop.eup %4200  ;;  %v2862_v30 = vand.u32 2147483647, %v2852_v53 }
 0x676   : > { %v2868_v7 = vmul.f32 %v2846_v26, %v5816_v58  ;;  %v2869_v2 = vmul.f32 %v4201_v46, %v2827_v47  ;;  %4206 = vrcp.f32 %v5974_v51  ;;  %v2864_v58 = vand.u32 2147483648, %v2852_v53 }
 0x677   : > { %v2891_v12 = vpop.f32.mrf.mxu0  ;;  %v2961_v3 = vsub.f32 1.0, %v2960_v14  ;;  %vm2858_vm5 = vweird.f32 %v2852_v53  ;;  %vm2965_vm6 = vweird.f32 %v5969_v36  ;;  %vm2863_vm8 = vcmp.eq.f32.partialorder %v2862_v30, 8.507059e+37 }
 0x678   : > { %v5976_v18 = vadd.f32 %v2869_v2, %v2868_v7  ;;  %v2865_v38 = vor.u32 1.1754944e-38, %v2864_v58  ;;  %vm5987_vm10 = vmor %vm2964_vm9, %vm2965_vm6  ;;  %vm2984_vm1 = vweird.f32 %v5974_v51 }
 0x679   : > { %v2915_v45 = vpop.f32.mrf.mxu2  ;;  %v2962_v16 = vmul.f32 %v5969_v36, %v2961_v3 }
 0x67a   : > { %v4203_v34 = vpop.eup %4202  ;;  %v2934_v41 = vadd.f32 %v3772_v10, %v2915_v45 }
 0x67b   : > { %v4205_v8 = vpop.eup %4204  ;;  %v2939_v32 = vadd.f32 1.0, %v4203_v34  ;;  %v2963_v60 = vadd.f32 %v5969_v36, %v2962_v16 }
 0x67c   : > { %v2854_v39 = vmul.f32 %v4205_v8, %v2852_v53  ;;  %vm2859_vm4 = vweird.f32 %v4205_v8  ;;  %v4207_v59 = vpop.eup %4206  ;;  %v2990_v53 = vand.u32 2147483648, %v5974_v51 }
 0x67d   : > { %4208 = vrcp.f32 %v2939_v32  ;;  %vm2860_vm7 = vmor %vm2858_vm5, %vm2859_vm4  ;;  %v2980_v40 = vmul.f32 %v4207_v59, %v5974_v51  ;;  %v2951_v54 = vand.u32 2147483648, %v2939_v32  ;;  %v2967_v50 = vsel %vm5987_vm10, %v5969_v36, %v2963_v60 }
 0x67e   : > { %v2855_v28 = vsub.f32 1.0, %v2854_v39  ;;  %4210 = vtanh.f32 %v5976_v18  ;;  %v2949_v37 = vand.u32 2147483647, %v2939_v32  ;;  %vm2945_vm12 = vweird.f32 %v2939_v32 }
 0x67f   : > { %4212 = vtanh.f32 %v2934_v41  ;;  %v2981_v4 = vsub.f32 1.0, %v2980_v40  ;;  %v2952_v62 = vor.u32 1.1754944e-38, %v2951_v54  ;;  %v2972_v22 = vsel %vm2969_vm13, %v2971_v56, %v2967_v50 }
 0x680   : > { %v2856_v1 = vmul.f32 %v4205_v8, %v2855_v28  ;;  %vm2950_vm15 = vcmp.eq.f32.partialorder %v2949_v37, 8.507059e+37  ;;  %v2994_v55 = vmul.f32 %v2972_v22, %v5845_v57  ;;  %vm2985_vm0 = vweird.f32 %v4207_v59 }
 0x681   : > { %v2917_v25 = vpop.f32.mrf.mxu2  ;;  %v2982_v42 = vmul.f32 %v4207_v59, %v2981_v4  ;;  %v2988_v36 = vand.u32 2147483647, %v5974_v51  ;;  %vm2986_vm2 = vmor %vm2984_vm1, %vm2985_vm0  ;;  %v2991_v26 = vor.u32 1.1754944e-38, %v2990_v53 }
 0x682   : > { %v2857_v61 = vadd.f32 %v4205_v8, %v2856_v1 }
 0x683   : > { %v4209_v0 = vpop.eup %4208  ;;  %v2983_v27 = vadd.f32 %v4207_v59, %v2982_v42  ;;  %vm2989_vm3 = vcmp.eq.f32.partialorder %v2988_v36, 8.507059e+37 }
 0x684   : > { %v2941_v15 = vmul.f32 %v4209_v0, %v2939_v32  ;;  %v2861_v11 = vsel %vm2860_vm7, %v4205_v8, %v2857_v61  ;;  %v4211_v24 = vpop.eup %4210  ;;  %vm2946_vm11 = vweird.f32 %v4209_v0 }
 0x685   : > { %v2866_v9 = vsel %vm2863_vm8, %v2865_v38, %v2861_v11  ;;  %vm2947_vm14 = vmor %vm2945_vm12, %vm2946_vm11  ;;  %v4213_v35 = vpop.eup %4212  ;;  %v2987_v21 = vsel %vm2986_vm2, %v4207_v59, %v2983_v27 }
 0x686   : > { %v2942_v49 = vsub.f32 1.0, %v2941_v15  ;;  %v2872_v20 = vmul.f32 %v4211_v24, %v2866_v9  ;;  %v2992_v47 = vsel %vm2989_vm3, %v2991_v26, %v2987_v21 }
 0x688   : > { %v2943_v31 = vmul.f32 %v4209_v0, %v2942_v49  ;;  %3769 = vst [vmem:[%s4576_s21 + $0x30] sm:$0xff] %v2872_v20  ;;  %v3000_v17 = vpack.c.bf16 %v2872_v20, %v2872_v20 }
 0x68a   : > { %v2944_v13 = vadd.f32 %v4209_v0, %v2943_v31  ;;  %3022 = vmatmul.bf16.vlgmr.msra.gmra.mxu1 %v3000_v17  ;;  %3048 = vmatmul.bf16.vlgmr.msra.gmra.mxu3 %v3000_v17 }
 0x68c   : > { %v2948_v29 = vsel %vm2947_vm14, %v4209_v0, %v2944_v13 }
 0x68d   : > { %v2953_v43 = vsel %vm2950_vm15, %v2952_v62, %v2948_v29 }
 0x68e   : > { %v2995_v52 = vmul.f32 %v4213_v35, %v2953_v43 }
 0x690   : > { %v2996_v63 = vadd.f32 %v2995_v52, %v2994_v55 }
 0x692   : > { %4214 = vtanh.f32 %v2996_v63  ;;  %3171 = vst [vmem:[#allocation6] sm:$0xff] %v2996_v63 }
 0x698   : > { %v4215_v45 = vpop.eup %4214 }
 0x699   : > { %v2998_v12 = vmul.f32 %v4215_v45, %v2992_v47 }
 0x69a   : > { %3074 = vmatmul.bf16.vlgmr.msrb.gmra.mxu1 %v3000_v17  ;;  %3100 = vmatmul.bf16.vlgmr.msrb.gmra.mxu3 %v3000_v17 }
 0x69b   : > { %v2999_v57 = vpack.c.bf16 %v2998_v12, %v2998_v12  ;;  %3170 = vst [vmem:[#allocation5] sm:$0xff] %v2998_v12 }
 0x69d   : > { %3009 = vmatmul.bf16.vlgmr.msra.gmra.mxu0 %v2999_v57  ;;  %3035 = vmatmul.bf16.vlgmr.msra.gmra.mxu2 %v2999_v57 }
 0x6ad   : > { %3061 = vmatmul.bf16.vlgmr.msrb.gmra.mxu0 %v2999_v57  ;;  %3087 = vmatmul.bf16.vlgmr.msrb.gmra.mxu2 %v2999_v57 }
 0x707   : > { %v3023_v14 = vpop.f32.mrf.mxu1 }
 0x70d   : > { %v3049_v7 = vpop.f32.mrf.mxu3 }
 0x70f   : > { %v3025_v46 = vpop.f32.mrf.mxu1 }
 0x715   : > { %v3051_v2 = vpop.f32.mrf.mxu3 }
 0x717   : > { %v3075_v51 = vpop.f32.mrf.mxu1 }
 0x71a   : > { %v3010_v34 = vpop.f32.mrf.mxu0 }
 0x71b   : > { %v3011_v8 = vadd.f32 %v3010_v34, %v6796_v48 }
 0x71d   : > { %v3024_v3 = vadd.f32 %v3023_v14, %v3011_v8  ;;  %v3101_v32 = vpop.f32.mrf.mxu3 }
 0x71f   : > { %v3777_v39 = vmul.f32 -1.442695, %v3024_v3  ;;  %v3077_v25 = vpop.f32.mrf.mxu1 }
 0x720   : > { %v3036_v28 = vpop.f32.mrf.mxu2 }
 0x721   : > { %4216 = vpow2.f32 %v3777_v39  ;;  %v3037_v16 = vadd.f32 %v3036_v28, %v6797_v44 }
 0x722   : > { %v3012_v58 = vpop.f32.mrf.mxu0 }
 0x723   : > { %v3050_v1 = vadd.f32 %v3049_v7, %v3037_v16 }
 0x725   : > { %v3778_v10 = vmul.f32 -1.442695, %v3050_v1  ;;  %v3103_v30 = vpop.f32.mrf.mxu3 }
 0x727   : > { %v4217_v59 = vpop.eup %4216  ;;  %4218 = vpow2.f32 %v3778_v10 }
 0x728   : > { %v3108_v61 = vadd.f32 1.0, %v4217_v59  ;;  %v3038_v0 = vpop.f32.mrf.mxu2 }
 0x72a   : > { %4220 = vrcp.f32 %v3108_v61  ;;  %v3062_v38 = vpop.f32.mrf.mxu0  ;;  %v3120_v31 = vand.u32 2147483648, %v3108_v61  ;;  %vm3114_vm5 = vweird.f32 %v3108_v61  ;;  %v3118_v56 = vand.u32 2147483647, %v3108_v61 }
 0x72b   : > { %v3063_v44 = vadd.f32 %v3062_v38, %v6457_v5 }
 0x72c   : > { %v3121_v62 = vor.u32 1.1754944e-38, %v3120_v31  ;;  %vm3119_vm9 = vcmp.eq.f32.partialorder %v3118_v56, 8.507059e+37 }
 0x72d   : > { %v4219_v41 = vpop.eup %4218  ;;  %v3076_v20 = vadd.f32 %v3075_v51, %v3063_v44 }
 0x72e   : > { %v3127_v48 = vadd.f32 1.0, %v4219_v41 }
 0x730   : > { %v4221_v60 = vpop.eup %4220  ;;  %4222 = vrcp.f32 %v3127_v48  ;;  %v3088_v15 = vpop.f32.mrf.mxu2  ;;  %v3139_v4 = vand.u32 2147483648, %v3127_v48  ;;  %v3137_v13 = vand.u32 2147483647, %v3127_v48  ;;  %vm3133_vm8 = vweird.f32 %v3127_v48 }
 0x731   : > { %v3110_v11 = vmul.f32 %v4221_v60, %v3108_v61  ;;  %v3089_v24 = vadd.f32 %v3088_v15, %v6456_v33  ;;  %vm3115_vm4 = vweird.f32 %v4221_v60 }
 0x732   : > { %v3064_v19 = vpop.f32.mrf.mxu0  ;;  %vm3116_vm6 = vmor %vm3114_vm5, %vm3115_vm4  ;;  %v3140_v35 = vor.u32 1.1754944e-38, %v3139_v4  ;;  %vm3138_vm11 = vcmp.eq.f32.partialorder %v3137_v13, 8.507059e+37 }
 0x733   : > { %v3111_v40 = vsub.f32 1.0, %v3110_v11  ;;  %v3102_v9 = vadd.f32 %v3101_v32, %v3089_v24 }
 0x735   : > { %v3112_v6 = vmul.f32 %v4221_v60, %v3111_v40  ;;  %v3779_v49 = vmul.f32 -1.442695, %v3102_v9 }
 0x736   : > { %v4223_v23 = vpop.eup %4222 }
 0x737   : > { %v3129_v54 = vmul.f32 %v4223_v23, %v3127_v48  ;;  %v3113_v50 = vadd.f32 %v4221_v60, %v3112_v6  ;;  %4224 = vpow2.f32 %v3779_v49  ;;  %vm3134_vm7 = vweird.f32 %v4223_v23 }
 0x738   : > { %v3090_v37 = vpop.f32.mrf.mxu2  ;;  %4226 = vtanh.f32 %v3076_v20  ;;  %vm3135_vm10 = vmor %vm3133_vm8, %vm3134_vm7 }
 0x739   : > { %v3130_v17 = vsub.f32 1.0, %v3129_v54  ;;  %v3117_v5 = vsel %vm3116_vm6, %v4221_v60, %v3113_v50 }
 0x73a   : > { %v3122_v42 = vsel %vm3119_vm9, %v3121_v62, %v3117_v5 }
 0x73b   : > { %v3131_v33 = vmul.f32 %v4223_v23, %v3130_v17 }
 0x73d   : > { %v4225_v22 = vpop.eup %4224  ;;  %v3132_v29 = vadd.f32 %v4223_v23, %v3131_v33 }
 0x73e   : > { %v3147_v43 = vadd.f32 1.0, %v4225_v22  ;;  %v4227_v52 = vpop.eup %4226 }
 0x73f   : > { %v3136_v55 = vsel %vm3135_vm10, %v4223_v23, %v3132_v29  ;;  %v3164_v53 = vmul.f32 %v4227_v52, %v3122_v42 }
 0x740   : > { %v3141_v63 = vsel %vm3138_vm11, %v3140_v35, %v3136_v55  ;;  %4228 = vrcp.f32 %v3147_v43  ;;  %v3159_v47 = vand.u32 2147483648, %v3147_v43  ;;  %vm3153_vm13 = vweird.f32 %v3147_v43 }
 0x741   : > { %v3163_v27 = vmul.f32 %v3141_v63, %v5976_v18  ;;  %v3157_v18 = vand.u32 2147483647, %v3147_v43 }
 0x742   : > { %v3160_v14 = vor.u32 1.1754944e-38, %v3159_v47 }
 0x743   : > { %v3165_v36 = vadd.f32 %v3164_v53, %v3163_v27  ;;  %vm3158_vm15 = vcmp.eq.f32.partialorder %v3157_v18, 8.507059e+37 }
 0x745   : > { %3173 = vst [vmem:[#allocation8] sm:$0xff] %v3165_v36  ;;  %4230 = vtanh.f32 %v3165_v36 }
 0x746   : > { %v4229_v21 = vpop.eup %4228 }
 0x747   : > { %v3149_v26 = vmul.f32 %v4229_v21, %v3147_v43  ;;  %vm3154_vm12 = vweird.f32 %v4229_v21 }
 0x748   : > { %vm3155_vm14 = vmor %vm3153_vm13, %vm3154_vm12 }
 0x749   : > { %v3150_v45 = vsub.f32 1.0, %v3149_v26 }
 0x74b   : > { %v3151_v12 = vmul.f32 %v4229_v21, %v3150_v45  ;;  %v4231_v46 = vpop.eup %4230 }
 0x74d   : > { %v3152_v57 = vadd.f32 %v4229_v21, %v3151_v12 }
 0x74f   : > { %v3156_v7 = vsel %vm3155_vm14, %v4229_v21, %v3152_v57 }
 0x750   : > { %v3161_v2 = vsel %vm3158_vm15, %v3160_v14, %v3156_v7 }
 0x751   : > { %v3167_v51 = vmul.f32 %v4231_v46, %v3161_v2 }
 0x753   : > { %3780 = vst [vmem:[%s4576_s21 + $0x38] sm:$0xff] %v3167_v51 }
 0x754   : > { %3172 = vst [vmem:[#allocation7] sm:$0xff] %v3167_v51 }
 0x755   : > { %4361 = shalt.err (!%p4358_p13)
}
 0x756   : > { %s4447_s26 = smov 128   ;;  %s4448_s21 = smov 256  }
 0x757   : > { %s4449_s11 = smov 8  }
 0x758   : > { %3890 = dma.vmem_to_hbm [thread:$0]  (%p4540_p9), %s3190_s23, 1024, %s3192_s18, %s3175_s19, %s4447_s26, %s4448_s21, %s4449_s11  }
 0x759 PF: > { %p3901_p0 = scmp.ge.s32.totalorder %s4438_s22, 2  ;;  %s3206_s17 = sand.u32 1, %s4410_s15  }
 0x75a   : > { %s3207_s12 = scalar_lea.sflag [#allocation12], %s3206_s17 }
 0x75b   : > { %p3897_p1 = pnand %p3901_p0, %p4546_p12 }
 0x75d   : > { %p3898_p2 = pneg %p3897_p1 }
 0x75f   : > { %4405 = dma.done.wait (%p3898_p2), %s3207_s12, 1024  }
 0x760   : > { %4407 = vsyncadd (%p3898_p2), %s3207_s12, 4294966272  ;;  %s20_s22 = sadd.s32 1, %s4438_s22   ;;  %s6802_s25 = sld [smem:[#allocation27_spill]] }
 0x761   : > { %p17_p4 = scmp.ge.s32.totalorder %s20_s22, 6   ;;  %s6803_s17 = sld [smem:[#allocation31_spill]] }
 0x762   : > { %s6804_s19 = sld [smem:[#allocation28_spill]]  ;;  %s6807_s15 = smov %s4414_s16 }
 0x763   : > { %s6805_s5 = sld [smem:[#allocation29_spill]]  ;;  %s6809_s18 = smov %s4430_s20 }
 0x764   : > { %s6806_s21 = sld [smem:[#allocation30_spill]] }
 0x765   :  { %19 = sbr.rel (!%p17_p4) target bundleno = 7 (0x7), region = 103 }
 0x766   : > { %s6808_s16 = smov %s6802_s25 }
 0x769   : > { %s6810_s20 = smov %s6805_s5 }
 0x76a   :  { %3213 = vsyncpa [#allocation11], 1 }
 0x76b   :  { %3215 = vsyncpa [#allocation11 + $0x1], 1 }
 0x76c   :  { %3216 = vsyncpa [#allocation12], 1 }
 0x76d   :  { %3218 = vsyncpa [#allocation12 + $0x1], 1 }
 0x76e   :  { %3219 = vsyncmov [#allocation9] }
 0x771   :  { %s3220_s8 = vpop.sfrf %3219 }
 0x772   :  { %p3787_p9 = scmp.ne.s32.totalorder %s3220_s8, 0 }
 0x774   :  { %3224 = shalt.err (%p3787_p9)  }
 0x775   :  { %3226 = vsyncmov [#allocation9 + $0x1] }
 0x778   :  { %s3227_s9 = vpop.sfrf %3226 }
 0x779   :  { %p3788_p12 = scmp.ne.s32.totalorder %s3227_s9, 0 }
 0x77b   :  { %3231 = shalt.err (%p3788_p12)  }
 0x77c   :  { %3233 = vsyncmov [#allocation9 + $0x2] }
 0x77f   :  { %s3234_s10 = vpop.sfrf %3233 }
 0x780   :  { %p3789_p3 = scmp.ne.s32.totalorder %s3234_s10, 0 }
 0x782   :  { %3238 = shalt.err (%p3789_p3)  }

</bundles_post_ra>
